<compile_context>
chip_gen: v7x
topology: tpu7x:2x2x1
jax: 0.10.0
libtpu: 0.0.40
codegen_flags: <defaults>
</compile_context>

<pallas_src>
import functools

import jax
import jax.numpy as jnp
from jax import lax
from jax.experimental import pallas as pl
from jax.experimental.pallas import tpu as pltpu


def _round_up(x, m):
    return (x + m - 1) // m * m


def encoder_gru_kernel(wave_ref, h0_ref,
                       wih_ref, whh_f_ref, whh_b_ref,
                       bih_ref, bhh_f_ref, bhh_b_ref,
                       out_ref, hN_ref,
                       gi_ref, ob_ref):
    """Bidirectional GRU; all shapes pre-padded (B->8, F->128, per-gate H->128).

    wave_ref : (T*Bp, Fp)           flattened (T, Bp, Fp)
    h0_ref   : (2, Bp, Hp)
    wih_ref  : (Fp, 6*Hp)           [fwd gates | bwd gates], transposed & gate-padded
    whh_*    : (Hp, 3*Hp)           transposed & gate-padded
    bih_ref  : (1, 6*Hp)            [fwd | bwd]
    bhh_*    : (1, 3*Hp)
    out_ref  : (T*Bp, Hp)           relu(fwd + bwd), flattened (T, Bp, Hp)
    hN_ref   : (2, Bp, Hp)          final hidden states
    scratch  : gi_ref (T*Bp, 6*Hp)  fused input projections, ob_ref (T*Bp, Hp) bwd hidden
    """
    TBp, _ = wave_ref.shape
    Bp = h0_ref.shape[1]
    T = TBp // Bp
    Hp3 = whh_f_ref.shape[1]
    Hp = Hp3 // 3

    # ---- hoisted input projections: ONE fused MXU matmul for both directions ----
    gi_ref[...] = (jnp.dot(wave_ref[...], wih_ref[...],
                           preferred_element_type=jnp.float32)
                   + bih_ref[...])

    whh_f = whh_f_ref[...]
    whh_b = whh_b_ref[...]
    # hoist bias broadcasts out of the loop (broadcast_in_dim is not CSE'd)
    bhh_f = jnp.broadcast_to(bhh_f_ref[...], (Bp, Hp3))
    bhh_b = jnp.broadcast_to(bhh_b_ref[...], (Bp, Hp3))

    def cell(gi, h, whh, bhh):
        # PyTorch GRU gate order (r, z, n); each gate is a 128-lane aligned block.
        gh = jnp.dot(h, whh, preferred_element_type=jnp.float32) + bhh
        r = jax.nn.sigmoid(gi[:, 0 * Hp:1 * Hp] + gh[:, 0 * Hp:1 * Hp])
        z = jax.nn.sigmoid(gi[:, 1 * Hp:2 * Hp] + gh[:, 1 * Hp:2 * Hp])
        n = jnp.tanh(gi[:, 2 * Hp:3 * Hp] + r * gh[:, 2 * Hp:3 * Hp])
        return (1.0 - z) * n + z * h

    # ---- single interleaved loop over both directions ----
    def body(i, carry):
        h_f, h_b = carry
        rf = pl.multiple_of(i * Bp, Bp)                  # fwd rows: timestep i
        rb = pl.multiple_of((T - 1 - i) * Bp, Bp)        # bwd rows: timestep T-1-i
        h_f = cell(gi_ref[pl.ds(rf, Bp), 0:Hp3], h_f, whh_f, bhh_f)
        h_b = cell(gi_ref[pl.ds(rb, Bp), Hp3:2 * Hp3], h_b, whh_b, bhh_b)
        out_ref[pl.ds(rf, Bp), :] = h_f                  # fwd goes straight to output
        ob_ref[pl.ds(rb, Bp), :] = h_b
        return h_f, h_b

    h_f, h_b = lax.fori_loop(0, T, body, (h0_ref[0], h0_ref[1]), unroll=True)

    hN_ref[0] = h_f
    hN_ref[1] = h_b
    # single lane-dense combine pass (dropout == identity in inference mode)
    out_ref[...] = jnp.maximum(out_ref[...] + ob_ref[...], 0.0)


def encoder_rnn_forward(wave, hidden, params, *, batch_size, hidden_size):
    """Mirrors EncoderRNN.forward(wave, hidden)."""
    B, T, F = wave.shape
    H = hidden_size
    assert B == batch_size

    Bp = _round_up(B, 8)      # sublane multiple
    Fp = _round_up(F, 128)    # lane multiple
    Hp = _round_up(H, 128)    # each gate -> one full 128-lane block
    Hp3 = 3 * Hp
    f32 = jnp.float32

    # (B, T, F) -> (T, B, F) -> zero-pad -> flatten to (T*Bp, Fp)
    wave_t = jnp.swapaxes(wave.astype(f32), 0, 1)
    wave_p = jnp.zeros((T, Bp, Fp), f32).at[:, :B, :F].set(wave_t)
    wave2d = wave_p.reshape(T * Bp, Fp)

    h0 = jnp.zeros((2, Bp, Hp), f32).at[:, :B, :H].set(hidden.astype(f32))

    def place_w(dst, w, in_dim, col_off):
        # w: (3H, in_dim) -> transposed & per-gate 128-lane padded into dst at col_off
        for g in range(3):
            dst = dst.at[:in_dim, col_off + g * Hp:col_off + g * Hp + H].set(
                w[g * H:(g + 1) * H, :].T)
        return dst

    def place_b(dst, b, col_off):
        for g in range(3):
            dst = dst.at[0, col_off + g * Hp:col_off + g * Hp + H].set(
                b[g * H:(g + 1) * H])
        return dst

    # fused input-projection weight/bias: [fwd gates | bwd gates]
    wih = jnp.zeros((Fp, 2 * Hp3), f32)
    wih = place_w(wih, params["w_ih_f"], F, 0)
    wih = place_w(wih, params["w_ih_b"], F, Hp3)
    bih = jnp.zeros((1, 2 * Hp3), f32)
    bih = place_b(bih, params["b_ih_f"], 0)
    bih = place_b(bih, params["b_ih_b"], Hp3)

    whh_f = place_w(jnp.zeros((Hp, Hp3), f32), params["w_hh_f"], H, 0)
    whh_b = place_w(jnp.zeros((Hp, Hp3), f32), params["w_hh_b"], H, 0)
    bhh_f = place_b(jnp.zeros((1, Hp3), f32), params["b_hh_f"], 0)
    bhh_b = place_b(jnp.zeros((1, Hp3), f32), params["b_hh_b"], 0)

    args = (wave2d, h0, wih, whh_f, whh_b, bih, bhh_f, bhh_b)

    vmem = pl.BlockSpec(memory_space=pltpu.MemorySpace.VMEM)
    out2d, h_n = pl.pallas_call(
        encoder_gru_kernel,
        out_shape=(
            jax.ShapeDtypeStruct((T * Bp, Hp), f32),
            jax.ShapeDtypeStruct((2, Bp, Hp), f32),
        ),
        in_specs=[vmem] * len(args),
        out_specs=(vmem, vmem),
        scratch_shapes=[
            pltpu.VMEM((T * Bp, 2 * Hp3), f32),   # fused input projections (fwd|bwd)
            pltpu.VMEM((T * Bp, Hp), f32),        # per-step bwd hidden
        ],
    )(*args)

    # strip padding, restore batch_first layout
    out = out2d.reshape(T, Bp, Hp)[:, :B, :H]
    out = jnp.swapaxes(out, 0, 1)                        # (B, T, H)
    hidden_out = h_n[:, :B, :H].reshape(1, 2, B, H)      # hidden.view(1, 2, B, H)
    # output.squeeze(0) is a no-op for batch_size > 1
    return out, hidden_out


# ------------------------- pure-JAX reference ---------------------------
def _ref_forward(wave, hidden, params, hidden_size):
    H = hidden_size
    wave_t = jnp.swapaxes(wave, 0, 1)  # (T, B, F)

    def make_step(w_ih, w_hh, b_ih, b_hh):
        def step(h, x_t):
            gi = x_t @ w_ih.T + b_ih
            gh = h @ w_hh.T + b_hh
            r = jax.nn.sigmoid(gi[:, :H] + gh[:, :H])
            z = jax.nn.sigmoid(gi[:, H:2 * H] + gh[:, H:2 * H])
            n = jnp.tanh(gi[:, 2 * H:] + r * gh[:, 2 * H:])
            h2 = (1.0 - z) * n + z * h
            return h2, h2
        return step

    hf, ys_f = lax.scan(make_step(params["w_ih_f"], params["w_hh_f"],
                                  params["b_ih_f"], params["b_hh_f"]),
                        hidden[0], wave_t)
    hb, ys_b = lax.scan(make_step(params["w_ih_b"], params["w_hh_b"],
                                  params["b_ih_b"], params["b_hh_b"]),
                        hidden[1], wave_t[::-1])
    ys_b = ys_b[::-1]
    out = jnp.maximum(ys_f + ys_b, 0.0)          # (T, B, H)
    out = jnp.swapaxes(out, 0, 1)                # (B, T, H)
    h_n = jnp.stack([hf, hb], axis=0)            # (2, B, H)
    return out, h_n.reshape(1, 2, wave.shape[0], H)


def init_params(key, input_size, hidden_size):
    """Deterministic init matching PyTorch GRU default U(-1/sqrt(H), 1/sqrt(H))."""
    k = 1.0 / jnp.sqrt(hidden_size)
    names_shapes = [
        ("w_ih_f", (3 * hidden_size, input_size)),
        ("w_hh_f", (3 * hidden_size, hidden_size)),
        ("b_ih_f", (3 * hidden_size,)),
        ("b_hh_f", (3 * hidden_size,)),
        ("w_ih_b", (3 * hidden_size, input_size)),
        ("w_hh_b", (3 * hidden_size, hidden_size)),
        ("b_ih_b", (3 * hidden_size,)),
        ("b_hh_b", (3 * hidden_size,)),
    ]
    keys = jax.random.split(key, len(names_shapes))
    return {
        name: jax.random.uniform(kk, shape, jnp.float32, minval=-k, maxval=k)
        for kk, (name, shape) in zip(keys, names_shapes)
    }


if __name__ == "__main__":
    INPUT_SIZE = 39       # fixed by the module (GRU input feature dim)
    BATCH = 4
    SEQ = 8
    HIDDEN = 32

    root = jax.random.PRNGKey(0)
    k_params, k_wave, k_hidden = jax.random.split(root, 3)

    params = init_params(k_params, INPUT_SIZE, HIDDEN)
    wave = jax.random.normal(k_wave, (BATCH, SEQ, INPUT_SIZE), jnp.float32)
    hidden = jax.random.normal(k_hidden, (2, BATCH, HIDDEN), jnp.float32)

    fwd = functools.partial(encoder_rnn_forward, batch_size=BATCH, hidden_size=HIDDEN)
    out, h_out = jax.jit(fwd)(wave, hidden, params)
    jax.block_until_ready((out, h_out))

    out_ref, h_ref = _ref_forward(wave, hidden, params, HIDDEN)
    assert out.shape == (BATCH, SEQ, HIDDEN)
    assert h_out.shape == (1, 2, BATCH, HIDDEN)
    assert jnp.allclose(out, out_ref, atol=2e-4, rtol=2e-4), \
        float(jnp.max(jnp.abs(out - out_ref)))
    assert jnp.allclose(h_out, h_ref, atol=2e-4, rtol=2e-4), \
        float(jnp.max(jnp.abs(h_out - h_ref)))

    print("KERNEL_OK")
</pallas_src>

<mosaic_0001>
module attributes {stable_mosaic.version = 11 : i64} {
  func.func @encoder_gru_kernel(%arg0: memref<64x128xf32, #tpu.memory_space<vmem>>, %arg1: memref<2x8x128xf32, #tpu.memory_space<vmem>>, %arg2: memref<128x768xf32, #tpu.memory_space<vmem>>, %arg3: memref<128x384xf32, #tpu.memory_space<vmem>>, %arg4: memref<128x384xf32, #tpu.memory_space<vmem>>, %arg5: memref<1x768xf32, #tpu.memory_space<vmem>>, %arg6: memref<1x384xf32, #tpu.memory_space<vmem>>, %arg7: memref<1x384xf32, #tpu.memory_space<vmem>>, %arg8: memref<64x128xf32, #tpu.memory_space<vmem>>, %arg9: memref<2x8x128xf32, #tpu.memory_space<vmem>>, %arg10: memref<64x768xf32, #tpu.memory_space<vmem>>, %arg11: memref<64x128xf32, #tpu.memory_space<vmem>>) attributes {dimension_semantics = [], scalar_prefetch = 0 : i64, scratch_operands = 2 : i64, tpu.core_type = #tpu.core_type<tc>} {
    %c0 = arith.constant 0 : index
    %c0_0 = arith.constant 0 : index
    %0 = vector.load %arg0[%c0, %c0_0] : memref<64x128xf32, #tpu.memory_space<vmem>>, vector<64x128xf32>
    %c0_1 = arith.constant 0 : index
    %c0_2 = arith.constant 0 : index
    %1 = vector.load %arg2[%c0_1, %c0_2] : memref<128x768xf32, #tpu.memory_space<vmem>>, vector<128x768xf32>
    %cst = arith.constant dense<0.000000e+00> : vector<64x768xf32>
    %2 = tpu.matmul %0, %1, %cst {dimension_numbers = #tpu.dot_dimension_numbers<[1], [0], [0], [1], [0, 0, 1, 1], [], []>} : vector<64x128xf32>, vector<128x768xf32>, vector<64x768xf32> -> vector<64x768xf32>
    %c0_3 = arith.constant 0 : index
    %c0_4 = arith.constant 0 : index
    %3 = vector.load %arg5[%c0_3, %c0_4] : memref<1x768xf32, #tpu.memory_space<vmem>>, vector<1x768xf32>
    %4 = vector.broadcast %3 : vector<1x768xf32> to vector<64x768xf32>
    %5 = arith.addf %2, %4 : vector<64x768xf32>
    %c0_5 = arith.constant 0 : index
    %c0_6 = arith.constant 0 : index
    %6 = vector.load %arg10[%c0_5, %c0_6] : memref<64x768xf32, #tpu.memory_space<vmem>>, vector<64x768xf32>
    tpu.vector_store %arg10[%c0_5, %c0_6], %5 {strides = array<i32>} : memref<64x768xf32, #tpu.memory_space<vmem>>, vector<64x768xf32>,
    %c0_7 = arith.constant 0 : index
    %c0_8 = arith.constant 0 : index
    %7 = vector.load %arg3[%c0_7, %c0_8] : memref<128x384xf32, #tpu.memory_space<vmem>>, vector<128x384xf32>
    %c0_9 = arith.constant 0 : index
    %c0_10 = arith.constant 0 : index
    %8 = vector.load %arg4[%c0_9, %c0_10] : memref<128x384xf32, #tpu.memory_space<vmem>>, vector<128x384xf32>
    %c0_11 = arith.constant 0 : index
    %c0_12 = arith.constant 0 : index
    %9 = vector.load %arg6[%c0_11, %c0_12] : memref<1x384xf32, #tpu.memory_space<vmem>>, vector<1x384xf32>
    %10 = vector.shape_cast %9 : vector<1x384xf32> to vector<1x384xf32>
    %11 = vector.broadcast %10 : vector<1x384xf32> to vector<8x384xf32>
    %c0_13 = arith.constant 0 : index
    %c0_14 = arith.constant 0 : index
    %12 = vector.load %arg7[%c0_13, %c0_14] : memref<1x384xf32, #tpu.memory_space<vmem>>, vector<1x384xf32>
    %13 = vector.shape_cast %12 : vector<1x384xf32> to vector<1x384xf32>
    %14 = vector.broadcast %13 : vector<1x384xf32> to vector<8x384xf32>
    %c0_15 = arith.constant 0 : index
    %c0_16 = arith.constant 0 : index
    %c0_17 = arith.constant 0 : index
    %15 = vector.load %arg1[%c0_15, %c0_16, %c0_17] : memref<2x8x128xf32, #tpu.memory_space<vmem>>, vector<1x8x128xf32>
    %16 = vector.shape_cast %15 : vector<1x8x128xf32> to vector<8x128xf32>
    %c1 = arith.constant 1 : index
    %c0_18 = arith.constant 0 : index
    %c0_19 = arith.constant 0 : index
    %17 = vector.load %arg1[%c1, %c0_18, %c0_19] : memref<2x8x128xf32, #tpu.memory_space<vmem>>, vector<1x8x128xf32>
    %18 = vector.shape_cast %17 : vector<1x8x128xf32> to vector<8x128xf32>
    %c0_i32 = arith.constant 0 : i32
    %c8_i32 = arith.constant 8 : i32
    %19 = arith.muli %c0_i32, %c8_i32 : i32
    %20 = tpu.assume_multiple %19, 8 : i32
    %c7_i32 = arith.constant 7 : i32
    %21 = arith.subi %c7_i32, %c0_i32 : i32
    %c8_i32_20 = arith.constant 8 : i32
    %22 = arith.muli %21, %c8_i32_20 : i32
    %23 = tpu.assume_multiple %22, 8 : i32
    %24 = arith.index_cast %20 : i32 to index
    %c0_21 = arith.constant 0 : index
    %25 = vector.load %arg10[%24, %c0_21] : memref<64x768xf32, #tpu.memory_space<vmem>>, vector<8x384xf32>
    %cst_22 = arith.constant dense<0.000000e+00> : vector<8x384xf32>
    %26 = tpu.matmul %16, %7, %cst_22 {dimension_numbers = #tpu.dot_dimension_numbers<[1], [0], [0], [1], [0, 0, 1, 1], [], []>} : vector<8x128xf32>, vector<128x384xf32>, vector<8x384xf32> -> vector<8x384xf32>
    %27 = arith.addf %26, %11 : vector<8x384xf32>
    %28 = vector.extract_strided_slice %25 {offsets = [0, 0], sizes = [8, 128], strides = [1, 1]} : vector<8x384xf32> to vector<8x128xf32>
    %29 = vector.extract_strided_slice %27 {offsets = [0, 0], sizes = [8, 128], strides = [1, 1]} : vector<8x384xf32> to vector<8x128xf32>
    %30 = arith.addf %28, %29 : vector<8x128xf32>
    %31 = arith.negf %30 : vector<8x128xf32>
    %32 = math.exp %31 : vector<8x128xf32>
    %cst_23 = arith.constant 1.000000e+00 : f32
    %33 = vector.broadcast %cst_23 : f32 to vector<8x128xf32>
    %34 = arith.addf %33, %32 : vector<8x128xf32>
    %35 = arith.divf %33, %34 : vector<8x128xf32>
    %36 = vector.extract_strided_slice %25 {offsets = [0, 128], sizes = [8, 128], strides = [1, 1]} : vector<8x384xf32> to vector<8x128xf32>
    %37 = vector.extract_strided_slice %27 {offsets = [0, 128], sizes = [8, 128], strides = [1, 1]} : vector<8x384xf32> to vector<8x128xf32>
    %38 = arith.addf %36, %37 : vector<8x128xf32>
    %39 = arith.negf %38 : vector<8x128xf32>
    %40 = math.exp %39 : vector<8x128xf32>
    %cst_24 = arith.constant 1.000000e+00 : f32
    %41 = vector.broadcast %cst_24 : f32 to vector<8x128xf32>
    %42 = arith.addf %41, %40 : vector<8x128xf32>
    %43 = arith.divf %41, %42 : vector<8x128xf32>
    %44 = vector.extract_strided_slice %25 {offsets = [0, 256], sizes = [8, 128], strides = [1, 1]} : vector<8x384xf32> to vector<8x128xf32>
    %45 = vector.extract_strided_slice %27 {offsets = [0, 256], sizes = [8, 128], strides = [1, 1]} : vector<8x384xf32> to vector<8x128xf32>
    %46 = arith.mulf %35, %45 : vector<8x128xf32>
    %47 = arith.addf %44, %46 : vector<8x128xf32>
    %48 = math.tanh %47 : vector<8x128xf32>
    %cst_25 = arith.constant 1.000000e+00 : f32
    %49 = vector.broadcast %cst_25 : f32 to vector<8x128xf32>
    %50 = arith.subf %49, %43 : vector<8x128xf32>
    %51 = arith.mulf %50, %48 : vector<8x128xf32>
    %52 = arith.mulf %43, %16 : vector<8x128xf32>
    %53 = arith.addf %51, %52 : vector<8x128xf32>
    %54 = arith.index_cast %23 : i32 to index
    %c384 = arith.constant 384 : index
    %55 = vector.load %arg10[%54, %c384] : memref<64x768xf32, #tpu.memory_space<vmem>>, vector<8x384xf32>
    %cst_26 = arith.constant dense<0.000000e+00> : vector<8x384xf32>
    %56 = tpu.matmul %18, %8, %cst_26 {dimension_numbers = #tpu.dot_dimension_numbers<[1], [0], [0], [1], [0, 0, 1, 1], [], []>} : vector<8x128xf32>, vector<128x384xf32>, vector<8x384xf32> -> vector<8x384xf32>
    %57 = arith.addf %56, %14 : vector<8x384xf32>
    %58 = vector.extract_strided_slice %55 {offsets = [0, 0], sizes = [8, 128], strides = [1, 1]} : vector<8x384xf32> to vector<8x128xf32>
    %59 = vector.extract_strided_slice %57 {offsets = [0, 0], sizes = [8, 128], strides = [1, 1]} : vector<8x384xf32> to vector<8x128xf32>
    %60 = arith.addf %58, %59 : vector<8x128xf32>
    %61 = arith.negf %60 : vector<8x128xf32>
    %62 = math.exp %61 : vector<8x128xf32>
    %cst_27 = arith.constant 1.000000e+00 : f32
    %63 = vector.broadcast %cst_27 : f32 to vector<8x128xf32>
    %64 = arith.addf %63, %62 : vector<8x128xf32>
    %65 = arith.divf %63, %64 : vector<8x128xf32>
    %66 = vector.extract_strided_slice %55 {offsets = [0, 128], sizes = [8, 128], strides = [1, 1]} : vector<8x384xf32> to vector<8x128xf32>
    %67 = vector.extract_strided_slice %57 {offsets = [0, 128], sizes = [8, 128], strides = [1, 1]} : vector<8x384xf32> to vector<8x128xf32>
    %68 = arith.addf %66, %67 : vector<8x128xf32>
    %69 = arith.negf %68 : vector<8x128xf32>
    %70 = math.exp %69 : vector<8x128xf32>
    %cst_28 = arith.constant 1.000000e+00 : f32
    %71 = vector.broadcast %cst_28 : f32 to vector<8x128xf32>
    %72 = arith.addf %71, %70 : vector<8x128xf32>
    %73 = arith.divf %71, %72 : vector<8x128xf32>
    %74 = vector.extract_strided_slice %55 {offsets = [0, 256], sizes = [8, 128], strides = [1, 1]} : vector<8x384xf32> to vector<8x128xf32>
    %75 = vector.extract_strided_slice %57 {offsets = [0, 256], sizes = [8, 128], strides = [1, 1]} : vector<8x384xf32> to vector<8x128xf32>
    %76 = arith.mulf %65, %75 : vector<8x128xf32>
    %77 = arith.addf %74, %76 : vector<8x128xf32>
    %78 = math.tanh %77 : vector<8x128xf32>
    %cst_29 = arith.constant 1.000000e+00 : f32
    %79 = vector.broadcast %cst_29 : f32 to vector<8x128xf32>
    %80 = arith.subf %79, %73 : vector<8x128xf32>
    %81 = arith.mulf %80, %78 : vector<8x128xf32>
    %82 = arith.mulf %73, %18 : vector<8x128xf32>
    %83 = arith.addf %81, %82 : vector<8x128xf32>
    %84 = arith.index_cast %20 : i32 to index
    %c0_30 = arith.constant 0 : index
    %85 = vector.load %arg8[%84, %c0_30] : memref<64x128xf32, #tpu.memory_space<vmem>>, vector<8x128xf32>
    tpu.vector_store %arg8[%84, %c0_30], %53 {strides = array<i32>} : memref<64x128xf32, #tpu.memory_space<vmem>>, vector<8x128xf32>,
    %86 = arith.index_cast %23 : i32 to index
    %c0_31 = arith.constant 0 : index
    %87 = vector.load %arg11[%86, %c0_31] : memref<64x128xf32, #tpu.memory_space<vmem>>, vector<8x128xf32>
    tpu.vector_store %arg11[%86, %c0_31], %83 {strides = array<i32>} : memref<64x128xf32, #tpu.memory_space<vmem>>, vector<8x128xf32>,
    %c1_i32 = arith.constant 1 : i32
    %c8_i32_32 = arith.constant 8 : i32
    %88 = arith.muli %c1_i32, %c8_i32_32 : i32
    %89 = tpu.assume_multiple %88, 8 : i32
    %c7_i32_33 = arith.constant 7 : i32
    %90 = arith.subi %c7_i32_33, %c1_i32 : i32
    %c8_i32_34 = arith.constant 8 : i32
    %91 = arith.muli %90, %c8_i32_34 : i32
    %92 = tpu.assume_multiple %91, 8 : i32
    %93 = arith.index_cast %89 : i32 to index
    %c0_35 = arith.constant 0 : index
    %94 = vector.load %arg10[%93, %c0_35] : memref<64x768xf32, #tpu.memory_space<vmem>>, vector<8x384xf32>
    %cst_36 = arith.constant dense<0.000000e+00> : vector<8x384xf32>
    %95 = tpu.matmul %53, %7, %cst_36 {dimension_numbers = #tpu.dot_dimension_numbers<[1], [0], [0], [1], [0, 0, 1, 1], [], []>} : vector<8x128xf32>, vector<128x384xf32>, vector<8x384xf32> -> vector<8x384xf32>
    %96 = arith.addf %95, %11 : vector<8x384xf32>
    %97 = vector.extract_strided_slice %94 {offsets = [0, 0], sizes = [8, 128], strides = [1, 1]} : vector<8x384xf32> to vector<8x128xf32>
    %98 = vector.extract_strided_slice %96 {offsets = [0, 0], sizes = [8, 128], strides = [1, 1]} : vector<8x384xf32> to vector<8x128xf32>
    %99 = arith.addf %97, %98 : vector<8x128xf32>
    %100 = arith.negf %99 : vector<8x128xf32>
    %101 = math.exp %100 : vector<8x128xf32>
    %cst_37 = arith.constant 1.000000e+00 : f32
    %102 = vector.broadcast %cst_37 : f32 to vector<8x128xf32>
    %103 = arith.addf %102, %101 : vector<8x128xf32>
    %104 = arith.divf %102, %103 : vector<8x128xf32>
    %105 = vector.extract_strided_slice %94 {offsets = [0, 128], sizes = [8, 128], strides = [1, 1]} : vector<8x384xf32> to vector<8x128xf32>
    %106 = vector.extract_strided_slice %96 {offsets = [0, 128], sizes = [8, 128], strides = [1, 1]} : vector<8x384xf32> to vector<8x128xf32>
    %107 = arith.addf %105, %106 : vector<8x128xf32>
    %108 = arith.negf %107 : vector<8x128xf32>
    %109 = math.exp %108 : vector<8x128xf32>
    %cst_38 = arith.constant 1.000000e+00 : f32
    %110 = vector.broadcast %cst_38 : f32 to vector<8x128xf32>
    %111 = arith.addf %110, %109 : vector<8x128xf32>
    %112 = arith.divf %110, %111 : vector<8x128xf32>
    %113 = vector.extract_strided_slice %94 {offsets = [0, 256], sizes = [8, 128], strides = [1, 1]} : vector<8x384xf32> to vector<8x128xf32>
    %114 = vector.extract_strided_slice %96 {offsets = [0, 256], sizes = [8, 128], strides = [1, 1]} : vector<8x384xf32> to vector<8x128xf32>
    %115 = arith.mulf %104, %114 : vector<8x128xf32>
    %116 = arith.addf %113, %115 : vector<8x128xf32>
    %117 = math.tanh %116 : vector<8x128xf32>
    %cst_39 = arith.constant 1.000000e+00 : f32
    %118 = vector.broadcast %cst_39 : f32 to vector<8x128xf32>
    %119 = arith.subf %118, %112 : vector<8x128xf32>
    %120 = arith.mulf %119, %117 : vector<8x128xf32>
    %121 = arith.mulf %112, %53 : vector<8x128xf32>
    %122 = arith.addf %120, %121 : vector<8x128xf32>
    %123 = arith.index_cast %92 : i32 to index
    %c384_40 = arith.constant 384 : index
    %124 = vector.load %arg10[%123, %c384_40] : memref<64x768xf32, #tpu.memory_space<vmem>>, vector<8x384xf32>
    %cst_41 = arith.constant dense<0.000000e+00> : vector<8x384xf32>
    %125 = tpu.matmul %83, %8, %cst_41 {dimension_numbers = #tpu.dot_dimension_numbers<[1], [0], [0], [1], [0, 0, 1, 1], [], []>} : vector<8x128xf32>, vector<128x384xf32>, vector<8x384xf32> -> vector<8x384xf32>
    %126 = arith.addf %125, %14 : vector<8x384xf32>
    %127 = vector.extract_strided_slice %124 {offsets = [0, 0], sizes = [8, 128], strides = [1, 1]} : vector<8x384xf32> to vector<8x128xf32>
    %128 = vector.extract_strided_slice %126 {offsets = [0, 0], sizes = [8, 128], strides = [1, 1]} : vector<8x384xf32> to vector<8x128xf32>
    %129 = arith.addf %127, %128 : vector<8x128xf32>
    %130 = arith.negf %129 : vector<8x128xf32>
    %131 = math.exp %130 : vector<8x128xf32>
    %cst_42 = arith.constant 1.000000e+00 : f32
    %132 = vector.broadcast %cst_42 : f32 to vector<8x128xf32>
    %133 = arith.addf %132, %131 : vector<8x128xf32>
    %134 = arith.divf %132, %133 : vector<8x128xf32>
    %135 = vector.extract_strided_slice %124 {offsets = [0, 128], sizes = [8, 128], strides = [1, 1]} : vector<8x384xf32> to vector<8x128xf32>
    %136 = vector.extract_strided_slice %126 {offsets = [0, 128], sizes = [8, 128], strides = [1, 1]} : vector<8x384xf32> to vector<8x128xf32>
    %137 = arith.addf %135, %136 : vector<8x128xf32>
    %138 = arith.negf %137 : vector<8x128xf32>
    %139 = math.exp %138 : vector<8x128xf32>
    %cst_43 = arith.constant 1.000000e+00 : f32
    %140 = vector.broadcast %cst_43 : f32 to vector<8x128xf32>
    %141 = arith.addf %140, %139 : vector<8x128xf32>
    %142 = arith.divf %140, %141 : vector<8x128xf32>
    %143 = vector.extract_strided_slice %124 {offsets = [0, 256], sizes = [8, 128], strides = [1, 1]} : vector<8x384xf32> to vector<8x128xf32>
    %144 = vector.extract_strided_slice %126 {offsets = [0, 256], sizes = [8, 128], strides = [1, 1]} : vector<8x384xf32> to vector<8x128xf32>
    %145 = arith.mulf %134, %144 : vector<8x128xf32>
    %146 = arith.addf %143, %145 : vector<8x128xf32>
    %147 = math.tanh %146 : vector<8x128xf32>
    %cst_44 = arith.constant 1.000000e+00 : f32
    %148 = vector.broadcast %cst_44 : f32 to vector<8x128xf32>
    %149 = arith.subf %148, %142 : vector<8x128xf32>
    %150 = arith.mulf %149, %147 : vector<8x128xf32>
    %151 = arith.mulf %142, %83 : vector<8x128xf32>
    %152 = arith.addf %150, %151 : vector<8x128xf32>
    %153 = arith.index_cast %89 : i32 to index
    %c0_45 = arith.constant 0 : index
    %154 = vector.load %arg8[%153, %c0_45] : memref<64x128xf32, #tpu.memory_space<vmem>>, vector<8x128xf32>
    tpu.vector_store %arg8[%153, %c0_45], %122 {strides = array<i32>} : memref<64x128xf32, #tpu.memory_space<vmem>>, vector<8x128xf32>,
    %155 = arith.index_cast %92 : i32 to index
    %c0_46 = arith.constant 0 : index
    %156 = vector.load %arg11[%155, %c0_46] : memref<64x128xf32, #tpu.memory_space<vmem>>, vector<8x128xf32>
    tpu.vector_store %arg11[%155, %c0_46], %152 {strides = array<i32>} : memref<64x128xf32, #tpu.memory_space<vmem>>, vector<8x128xf32>,
    %c2_i32 = arith.constant 2 : i32
    %c8_i32_47 = arith.constant 8 : i32
    %157 = arith.muli %c2_i32, %c8_i32_47 : i32
    %158 = tpu.assume_multiple %157, 8 : i32
    %c7_i32_48 = arith.constant 7 : i32
    %159 = arith.subi %c7_i32_48, %c2_i32 : i32
    %c8_i32_49 = arith.constant 8 : i32
    %160 = arith.muli %159, %c8_i32_49 : i32
    %161 = tpu.assume_multiple %160, 8 : i32
    %162 = arith.index_cast %158 : i32 to index
    %c0_50 = arith.constant 0 : index
    %163 = vector.load %arg10[%162, %c0_50] : memref<64x768xf32, #tpu.memory_space<vmem>>, vector<8x384xf32>
    %cst_51 = arith.constant dense<0.000000e+00> : vector<8x384xf32>
    %164 = tpu.matmul %122, %7, %cst_51 {dimension_numbers = #tpu.dot_dimension_numbers<[1], [0], [0], [1], [0, 0, 1, 1], [], []>} : vector<8x128xf32>, vector<128x384xf32>, vector<8x384xf32> -> vector<8x384xf32>
    %165 = arith.addf %164, %11 : vector<8x384xf32>
    %166 = vector.extract_strided_slice %163 {offsets = [0, 0], sizes = [8, 128], strides = [1, 1]} : vector<8x384xf32> to vector<8x128xf32>
    %167 = vector.extract_strided_slice %165 {offsets = [0, 0], sizes = [8, 128], strides = [1, 1]} : vector<8x384xf32> to vector<8x128xf32>
    %168 = arith.addf %166, %167 : vector<8x128xf32>
    %169 = arith.negf %168 : vector<8x128xf32>
    %170 = math.exp %169 : vector<8x128xf32>
    %cst_52 = arith.constant 1.000000e+00 : f32
    %171 = vector.broadcast %cst_52 : f32 to vector<8x128xf32>
    %172 = arith.addf %171, %170 : vector<8x128xf32>
    %173 = arith.divf %171, %172 : vector<8x128xf32>
    %174 = vector.extract_strided_slice %163 {offsets = [0, 128], sizes = [8, 128], strides = [1, 1]} : vector<8x384xf32> to vector<8x128xf32>
    %175 = vector.extract_strided_slice %165 {offsets = [0, 128], sizes = [8, 128], strides = [1, 1]} : vector<8x384xf32> to vector<8x128xf32>
    %176 = arith.addf %174, %175 : vector<8x128xf32>
    %177 = arith.negf %176 : vector<8x128xf32>
    %178 = math.exp %177 : vector<8x128xf32>
    %cst_53 = arith.constant 1.000000e+00 : f32
    %179 = vector.broadcast %cst_53 : f32 to vector<8x128xf32>
    %180 = arith.addf %179, %178 : vector<8x128xf32>
    %181 = arith.divf %179, %180 : vector<8x128xf32>
    %182 = vector.extract_strided_slice %163 {offsets = [0, 256], sizes = [8, 128], strides = [1, 1]} : vector<8x384xf32> to vector<8x128xf32>
    %183 = vector.extract_strided_slice %165 {offsets = [0, 256], sizes = [8, 128], strides = [1, 1]} : vector<8x384xf32> to vector<8x128xf32>
    %184 = arith.mulf %173, %183 : vector<8x128xf32>
    %185 = arith.addf %182, %184 : vector<8x128xf32>
    %186 = math.tanh %185 : vector<8x128xf32>
    %cst_54 = arith.constant 1.000000e+00 : f32
    %187 = vector.broadcast %cst_54 : f32 to vector<8x128xf32>
    %188 = arith.subf %187, %181 : vector<8x128xf32>
    %189 = arith.mulf %188, %186 : vector<8x128xf32>
    %190 = arith.mulf %181, %122 : vector<8x128xf32>
    %191 = arith.addf %189, %190 : vector<8x128xf32>
    %192 = arith.index_cast %161 : i32 to index
    %c384_55 = arith.constant 384 : index
    %193 = vector.load %arg10[%192, %c384_55] : memref<64x768xf32, #tpu.memory_space<vmem>>, vector<8x384xf32>
    %cst_56 = arith.constant dense<0.000000e+00> : vector<8x384xf32>
    %194 = tpu.matmul %152, %8, %cst_56 {dimension_numbers = #tpu.dot_dimension_numbers<[1], [0], [0], [1], [0, 0, 1, 1], [], []>} : vector<8x128xf32>, vector<128x384xf32>, vector<8x384xf32> -> vector<8x384xf32>
    %195 = arith.addf %194, %14 : vector<8x384xf32>
    %196 = vector.extract_strided_slice %193 {offsets = [0, 0], sizes = [8, 128], strides = [1, 1]} : vector<8x384xf32> to vector<8x128xf32>
    %197 = vector.extract_strided_slice %195 {offsets = [0, 0], sizes = [8, 128], strides = [1, 1]} : vector<8x384xf32> to vector<8x128xf32>
    %198 = arith.addf %196, %197 : vector<8x128xf32>
    %199 = arith.negf %198 : vector<8x128xf32>
    %200 = math.exp %199 : vector<8x128xf32>
    %cst_57 = arith.constant 1.000000e+00 : f32
    %201 = vector.broadcast %cst_57 : f32 to vector<8x128xf32>
    %202 = arith.addf %201, %200 : vector<8x128xf32>
    %203 = arith.divf %201, %202 : vector<8x128xf32>
    %204 = vector.extract_strided_slice %193 {offsets = [0, 128], sizes = [8, 128], strides = [1, 1]} : vector<8x384xf32> to vector<8x128xf32>
    %205 = vector.extract_strided_slice %195 {offsets = [0, 128], sizes = [8, 128], strides = [1, 1]} : vector<8x384xf32> to vector<8x128xf32>
    %206 = arith.addf %204, %205 : vector<8x128xf32>
    %207 = arith.negf %206 : vector<8x128xf32>
    %208 = math.exp %207 : vector<8x128xf32>
    %cst_58 = arith.constant 1.000000e+00 : f32
    %209 = vector.broadcast %cst_58 : f32 to vector<8x128xf32>
    %210 = arith.addf %209, %208 : vector<8x128xf32>
    %211 = arith.divf %209, %210 : vector<8x128xf32>
    %212 = vector.extract_strided_slice %193 {offsets = [0, 256], sizes = [8, 128], strides = [1, 1]} : vector<8x384xf32> to vector<8x128xf32>
    %213 = vector.extract_strided_slice %195 {offsets = [0, 256], sizes = [8, 128], strides = [1, 1]} : vector<8x384xf32> to vector<8x128xf32>
    %214 = arith.mulf %203, %213 : vector<8x128xf32>
    %215 = arith.addf %212, %214 : vector<8x128xf32>
    %216 = math.tanh %215 : vector<8x128xf32>
    %cst_59 = arith.constant 1.000000e+00 : f32
    %217 = vector.broadcast %cst_59 : f32 to vector<8x128xf32>
    %218 = arith.subf %217, %211 : vector<8x128xf32>
    %219 = arith.mulf %218, %216 : vector<8x128xf32>
    %220 = arith.mulf %211, %152 : vector<8x128xf32>
    %221 = arith.addf %219, %220 : vector<8x128xf32>
    %222 = arith.index_cast %158 : i32 to index
    %c0_60 = arith.constant 0 : index
    %223 = vector.load %arg8[%222, %c0_60] : memref<64x128xf32, #tpu.memory_space<vmem>>, vector<8x128xf32>
    tpu.vector_store %arg8[%222, %c0_60], %191 {strides = array<i32>} : memref<64x128xf32, #tpu.memory_space<vmem>>, vector<8x128xf32>,
    %224 = arith.index_cast %161 : i32 to index
    %c0_61 = arith.constant 0 : index
    %225 = vector.load %arg11[%224, %c0_61] : memref<64x128xf32, #tpu.memory_space<vmem>>, vector<8x128xf32>
    tpu.vector_store %arg11[%224, %c0_61], %221 {strides = array<i32>} : memref<64x128xf32, #tpu.memory_space<vmem>>, vector<8x128xf32>,
    %c3_i32 = arith.constant 3 : i32
    %c8_i32_62 = arith.constant 8 : i32
    %226 = arith.muli %c3_i32, %c8_i32_62 : i32
    %227 = tpu.assume_multiple %226, 8 : i32
    %c7_i32_63 = arith.constant 7 : i32
    %228 = arith.subi %c7_i32_63, %c3_i32 : i32
    %c8_i32_64 = arith.constant 8 : i32
    %229 = arith.muli %228, %c8_i32_64 : i32
    %230 = tpu.assume_multiple %229, 8 : i32
    %231 = arith.index_cast %227 : i32 to index
    %c0_65 = arith.constant 0 : index
    %232 = vector.load %arg10[%231, %c0_65] : memref<64x768xf32, #tpu.memory_space<vmem>>, vector<8x384xf32>
    %cst_66 = arith.constant dense<0.000000e+00> : vector<8x384xf32>
    %233 = tpu.matmul %191, %7, %cst_66 {dimension_numbers = #tpu.dot_dimension_numbers<[1], [0], [0], [1], [0, 0, 1, 1], [], []>} : vector<8x128xf32>, vector<128x384xf32>, vector<8x384xf32> -> vector<8x384xf32>
    %234 = arith.addf %233, %11 : vector<8x384xf32>
    %235 = vector.extract_strided_slice %232 {offsets = [0, 0], sizes = [8, 128], strides = [1, 1]} : vector<8x384xf32> to vector<8x128xf32>
    %236 = vector.extract_strided_slice %234 {offsets = [0, 0], sizes = [8, 128], strides = [1, 1]} : vector<8x384xf32> to vector<8x128xf32>
    %237 = arith.addf %235, %236 : vector<8x128xf32>
    %238 = arith.negf %237 : vector<8x128xf32>
    %239 = math.exp %238 : vector<8x128xf32>
    %cst_67 = arith.constant 1.000000e+00 : f32
    %240 = vector.broadcast %cst_67 : f32 to vector<8x128xf32>
    %241 = arith.addf %240, %239 : vector<8x128xf32>
    %242 = arith.divf %240, %241 : vector<8x128xf32>
    %243 = vector.extract_strided_slice %232 {offsets = [0, 128], sizes = [8, 128], strides = [1, 1]} : vector<8x384xf32> to vector<8x128xf32>
    %244 = vector.extract_strided_slice %234 {offsets = [0, 128], sizes = [8, 128], strides = [1, 1]} : vector<8x384xf32> to vector<8x128xf32>
    %245 = arith.addf %243, %244 : vector<8x128xf32>
    %246 = arith.negf %245 : vector<8x128xf32>
    %247 = math.exp %246 : vector<8x128xf32>
    %cst_68 = arith.constant 1.000000e+00 : f32
    %248 = vector.broadcast %cst_68 : f32 to vector<8x128xf32>
    %249 = arith.addf %248, %247 : vector<8x128xf32>
    %250 = arith.divf %248, %249 : vector<8x128xf32>
    %251 = vector.extract_strided_slice %232 {offsets = [0, 256], sizes = [8, 128], strides = [1, 1]} : vector<8x384xf32> to vector<8x128xf32>
    %252 = vector.extract_strided_slice %234 {offsets = [0, 256], sizes = [8, 128], strides = [1, 1]} : vector<8x384xf32> to vector<8x128xf32>
    %253 = arith.mulf %242, %252 : vector<8x128xf32>
    %254 = arith.addf %251, %253 : vector<8x128xf32>
    %255 = math.tanh %254 : vector<8x128xf32>
    %cst_69 = arith.constant 1.000000e+00 : f32
    %256 = vector.broadcast %cst_69 : f32 to vector<8x128xf32>
    %257 = arith.subf %256, %250 : vector<8x128xf32>
    %258 = arith.mulf %257, %255 : vector<8x128xf32>
    %259 = arith.mulf %250, %191 : vector<8x128xf32>
    %260 = arith.addf %258, %259 : vector<8x128xf32>
    %261 = arith.index_cast %230 : i32 to index
    %c384_70 = arith.constant 384 : index
    %262 = vector.load %arg10[%261, %c384_70] : memref<64x768xf32, #tpu.memory_space<vmem>>, vector<8x384xf32>
    %cst_71 = arith.constant dense<0.000000e+00> : vector<8x384xf32>
    %263 = tpu.matmul %221, %8, %cst_71 {dimension_numbers = #tpu.dot_dimension_numbers<[1], [0], [0], [1], [0, 0, 1, 1], [], []>} : vector<8x128xf32>, vector<128x384xf32>, vector<8x384xf32> -> vector<8x384xf32>
    %264 = arith.addf %263, %14 : vector<8x384xf32>
    %265 = vector.extract_strided_slice %262 {offsets = [0, 0], sizes = [8, 128], strides = [1, 1]} : vector<8x384xf32> to vector<8x128xf32>
    %266 = vector.extract_strided_slice %264 {offsets = [0, 0], sizes = [8, 128], strides = [1, 1]} : vector<8x384xf32> to vector<8x128xf32>
    %267 = arith.addf %265, %266 : vector<8x128xf32>
    %268 = arith.negf %267 : vector<8x128xf32>
    %269 = math.exp %268 : vector<8x128xf32>
    %cst_72 = arith.constant 1.000000e+00 : f32
    %270 = vector.broadcast %cst_72 : f32 to vector<8x128xf32>
    %271 = arith.addf %270, %269 : vector<8x128xf32>
    %272 = arith.divf %270, %271 : vector<8x128xf32>
    %273 = vector.extract_strided_slice %262 {offsets = [0, 128], sizes = [8, 128], strides = [1, 1]} : vector<8x384xf32> to vector<8x128xf32>
    %274 = vector.extract_strided_slice %264 {offsets = [0, 128], sizes = [8, 128], strides = [1, 1]} : vector<8x384xf32> to vector<8x128xf32>
    %275 = arith.addf %273, %274 : vector<8x128xf32>
    %276 = arith.negf %275 : vector<8x128xf32>
    %277 = math.exp %276 : vector<8x128xf32>
    %cst_73 = arith.constant 1.000000e+00 : f32
    %278 = vector.broadcast %cst_73 : f32 to vector<8x128xf32>
    %279 = arith.addf %278, %277 : vector<8x128xf32>
    %280 = arith.divf %278, %279 : vector<8x128xf32>
    %281 = vector.extract_strided_slice %262 {offsets = [0, 256], sizes = [8, 128], strides = [1, 1]} : vector<8x384xf32> to vector<8x128xf32>
    %282 = vector.extract_strided_slice %264 {offsets = [0, 256], sizes = [8, 128], strides = [1, 1]} : vector<8x384xf32> to vector<8x128xf32>
    %283 = arith.mulf %272, %282 : vector<8x128xf32>
    %284 = arith.addf %281, %283 : vector<8x128xf32>
    %285 = math.tanh %284 : vector<8x128xf32>
    %cst_74 = arith.constant 1.000000e+00 : f32
    %286 = vector.broadcast %cst_74 : f32 to vector<8x128xf32>
    %287 = arith.subf %286, %280 : vector<8x128xf32>
    %288 = arith.mulf %287, %285 : vector<8x128xf32>
    %289 = arith.mulf %280, %221 : vector<8x128xf32>
    %290 = arith.addf %288, %289 : vector<8x128xf32>
    %291 = arith.index_cast %227 : i32 to index
    %c0_75 = arith.constant 0 : index
    %292 = vector.load %arg8[%291, %c0_75] : memref<64x128xf32, #tpu.memory_space<vmem>>, vector<8x128xf32>
    tpu.vector_store %arg8[%291, %c0_75], %260 {strides = array<i32>} : memref<64x128xf32, #tpu.memory_space<vmem>>, vector<8x128xf32>,
    %293 = arith.index_cast %230 : i32 to index
    %c0_76 = arith.constant 0 : index
    %294 = vector.load %arg11[%293, %c0_76] : memref<64x128xf32, #tpu.memory_space<vmem>>, vector<8x128xf32>
    tpu.vector_store %arg11[%293, %c0_76], %290 {strides = array<i32>} : memref<64x128xf32, #tpu.memory_space<vmem>>, vector<8x128xf32>,
    %c4_i32 = arith.constant 4 : i32
    %c8_i32_77 = arith.constant 8 : i32
    %295 = arith.muli %c4_i32, %c8_i32_77 : i32
    %296 = tpu.assume_multiple %295, 8 : i32
    %c7_i32_78 = arith.constant 7 : i32
    %297 = arith.subi %c7_i32_78, %c4_i32 : i32
    %c8_i32_79 = arith.constant 8 : i32
    %298 = arith.muli %297, %c8_i32_79 : i32
    %299 = tpu.assume_multiple %298, 8 : i32
    %300 = arith.index_cast %296 : i32 to index
    %c0_80 = arith.constant 0 : index
    %301 = vector.load %arg10[%300, %c0_80] : memref<64x768xf32, #tpu.memory_space<vmem>>, vector<8x384xf32>
    %cst_81 = arith.constant dense<0.000000e+00> : vector<8x384xf32>
    %302 = tpu.matmul %260, %7, %cst_81 {dimension_numbers = #tpu.dot_dimension_numbers<[1], [0], [0], [1], [0, 0, 1, 1], [], []>} : vector<8x128xf32>, vector<128x384xf32>, vector<8x384xf32> -> vector<8x384xf32>
    %303 = arith.addf %302, %11 : vector<8x384xf32>
    %304 = vector.extract_strided_slice %301 {offsets = [0, 0], sizes = [8, 128], strides = [1, 1]} : vector<8x384xf32> to vector<8x128xf32>
    %305 = vector.extract_strided_slice %303 {offsets = [0, 0], sizes = [8, 128], strides = [1, 1]} : vector<8x384xf32> to vector<8x128xf32>
    %306 = arith.addf %304, %305 : vector<8x128xf32>
    %307 = arith.negf %306 : vector<8x128xf32>
    %308 = math.exp %307 : vector<8x128xf32>
    %cst_82 = arith.constant 1.000000e+00 : f32
    %309 = vector.broadcast %cst_82 : f32 to vector<8x128xf32>
    %310 = arith.addf %309, %308 : vector<8x128xf32>
    %311 = arith.divf %309, %310 : vector<8x128xf32>
    %312 = vector.extract_strided_slice %301 {offsets = [0, 128], sizes = [8, 128], strides = [1, 1]} : vector<8x384xf32> to vector<8x128xf32>
    %313 = vector.extract_strided_slice %303 {offsets = [0, 128], sizes = [8, 128], strides = [1, 1]} : vector<8x384xf32> to vector<8x128xf32>
    %314 = arith.addf %312, %313 : vector<8x128xf32>
    %315 = arith.negf %314 : vector<8x128xf32>
    %316 = math.exp %315 : vector<8x128xf32>
    %cst_83 = arith.constant 1.000000e+00 : f32
    %317 = vector.broadcast %cst_83 : f32 to vector<8x128xf32>
    %318 = arith.addf %317, %316 : vector<8x128xf32>
    %319 = arith.divf %317, %318 : vector<8x128xf32>
    %320 = vector.extract_strided_slice %301 {offsets = [0, 256], sizes = [8, 128], strides = [1, 1]} : vector<8x384xf32> to vector<8x128xf32>
    %321 = vector.extract_strided_slice %303 {offsets = [0, 256], sizes = [8, 128], strides = [1, 1]} : vector<8x384xf32> to vector<8x128xf32>
    %322 = arith.mulf %311, %321 : vector<8x128xf32>
    %323 = arith.addf %320, %322 : vector<8x128xf32>
    %324 = math.tanh %323 : vector<8x128xf32>
    %cst_84 = arith.constant 1.000000e+00 : f32
    %325 = vector.broadcast %cst_84 : f32 to vector<8x128xf32>
    %326 = arith.subf %325, %319 : vector<8x128xf32>
    %327 = arith.mulf %326, %324 : vector<8x128xf32>
    %328 = arith.mulf %319, %260 : vector<8x128xf32>
    %329 = arith.addf %327, %328 : vector<8x128xf32>
    %330 = arith.index_cast %299 : i32 to index
    %c384_85 = arith.constant 384 : index
    %331 = vector.load %arg10[%330, %c384_85] : memref<64x768xf32, #tpu.memory_space<vmem>>, vector<8x384xf32>
    %cst_86 = arith.constant dense<0.000000e+00> : vector<8x384xf32>
    %332 = tpu.matmul %290, %8, %cst_86 {dimension_numbers = #tpu.dot_dimension_numbers<[1], [0], [0], [1], [0, 0, 1, 1], [], []>} : vector<8x128xf32>, vector<128x384xf32>, vector<8x384xf32> -> vector<8x384xf32>
    %333 = arith.addf %332, %14 : vector<8x384xf32>
    %334 = vector.extract_strided_slice %331 {offsets = [0, 0], sizes = [8, 128], strides = [1, 1]} : vector<8x384xf32> to vector<8x128xf32>
    %335 = vector.extract_strided_slice %333 {offsets = [0, 0], sizes = [8, 128], strides = [1, 1]} : vector<8x384xf32> to vector<8x128xf32>
    %336 = arith.addf %334, %335 : vector<8x128xf32>
    %337 = arith.negf %336 : vector<8x128xf32>
    %338 = math.exp %337 : vector<8x128xf32>
    %cst_87 = arith.constant 1.000000e+00 : f32
    %339 = vector.broadcast %cst_87 : f32 to vector<8x128xf32>
    %340 = arith.addf %339, %338 : vector<8x128xf32>
    %341 = arith.divf %339, %340 : vector<8x128xf32>
    %342 = vector.extract_strided_slice %331 {offsets = [0, 128], sizes = [8, 128], strides = [1, 1]} : vector<8x384xf32> to vector<8x128xf32>
    %343 = vector.extract_strided_slice %333 {offsets = [0, 128], sizes = [8, 128], strides = [1, 1]} : vector<8x384xf32> to vector<8x128xf32>
    %344 = arith.addf %342, %343 : vector<8x128xf32>
    %345 = arith.negf %344 : vector<8x128xf32>
    %346 = math.exp %345 : vector<8x128xf32>
    %cst_88 = arith.constant 1.000000e+00 : f32
    %347 = vector.broadcast %cst_88 : f32 to vector<8x128xf32>
    %348 = arith.addf %347, %346 : vector<8x128xf32>
    %349 = arith.divf %347, %348 : vector<8x128xf32>
    %350 = vector.extract_strided_slice %331 {offsets = [0, 256], sizes = [8, 128], strides = [1, 1]} : vector<8x384xf32> to vector<8x128xf32>
    %351 = vector.extract_strided_slice %333 {offsets = [0, 256], sizes = [8, 128], strides = [1, 1]} : vector<8x384xf32> to vector<8x128xf32>
    %352 = arith.mulf %341, %351 : vector<8x128xf32>
    %353 = arith.addf %350, %352 : vector<8x128xf32>
    %354 = math.tanh %353 : vector<8x128xf32>
    %cst_89 = arith.constant 1.000000e+00 : f32
    %355 = vector.broadcast %cst_89 : f32 to vector<8x128xf32>
    %356 = arith.subf %355, %349 : vector<8x128xf32>
    %357 = arith.mulf %356, %354 : vector<8x128xf32>
    %358 = arith.mulf %349, %290 : vector<8x128xf32>
    %359 = arith.addf %357, %358 : vector<8x128xf32>
    %360 = arith.index_cast %296 : i32 to index
    %c0_90 = arith.constant 0 : index
    %361 = vector.load %arg8[%360, %c0_90] : memref<64x128xf32, #tpu.memory_space<vmem>>, vector<8x128xf32>
    tpu.vector_store %arg8[%360, %c0_90], %329 {strides = array<i32>} : memref<64x128xf32, #tpu.memory_space<vmem>>, vector<8x128xf32>,
    %362 = arith.index_cast %299 : i32 to index
    %c0_91 = arith.constant 0 : index
    %363 = vector.load %arg11[%362, %c0_91] : memref<64x128xf32, #tpu.memory_space<vmem>>, vector<8x128xf32>
    tpu.vector_store %arg11[%362, %c0_91], %359 {strides = array<i32>} : memref<64x128xf32, #tpu.memory_space<vmem>>, vector<8x128xf32>,
    %c5_i32 = arith.constant 5 : i32
    %c8_i32_92 = arith.constant 8 : i32
    %364 = arith.muli %c5_i32, %c8_i32_92 : i32
    %365 = tpu.assume_multiple %364, 8 : i32
    %c7_i32_93 = arith.constant 7 : i32
    %366 = arith.subi %c7_i32_93, %c5_i32 : i32
    %c8_i32_94 = arith.constant 8 : i32
    %367 = arith.muli %366, %c8_i32_94 : i32
    %368 = tpu.assume_multiple %367, 8 : i32
    %369 = arith.index_cast %365 : i32 to index
    %c0_95 = arith.constant 0 : index
    %370 = vector.load %arg10[%369, %c0_95] : memref<64x768xf32, #tpu.memory_space<vmem>>, vector<8x384xf32>
    %cst_96 = arith.constant dense<0.000000e+00> : vector<8x384xf32>
    %371 = tpu.matmul %329, %7, %cst_96 {dimension_numbers = #tpu.dot_dimension_numbers<[1], [0], [0], [1], [0, 0, 1, 1], [], []>} : vector<8x128xf32>, vector<128x384xf32>, vector<8x384xf32> -> vector<8x384xf32>
    %372 = arith.addf %371, %11 : vector<8x384xf32>
    %373 = vector.extract_strided_slice %370 {offsets = [0, 0], sizes = [8, 128], strides = [1, 1]} : vector<8x384xf32> to vector<8x128xf32>
    %374 = vector.extract_strided_slice %372 {offsets = [0, 0], sizes = [8, 128], strides = [1, 1]} : vector<8x384xf32> to vector<8x128xf32>
    %375 = arith.addf %373, %374 : vector<8x128xf32>
    %376 = arith.negf %375 : vector<8x128xf32>
    %377 = math.exp %376 : vector<8x128xf32>
    %cst_97 = arith.constant 1.000000e+00 : f32
    %378 = vector.broadcast %cst_97 : f32 to vector<8x128xf32>
    %379 = arith.addf %378, %377 : vector<8x128xf32>
    %380 = arith.divf %378, %379 : vector<8x128xf32>
    %381 = vector.extract_strided_slice %370 {offsets = [0, 128], sizes = [8, 128], strides = [1, 1]} : vector<8x384xf32> to vector<8x128xf32>
    %382 = vector.extract_strided_slice %372 {offsets = [0, 128], sizes = [8, 128], strides = [1, 1]} : vector<8x384xf32> to vector<8x128xf32>
    %383 = arith.addf %381, %382 : vector<8x128xf32>
    %384 = arith.negf %383 : vector<8x128xf32>
    %385 = math.exp %384 : vector<8x128xf32>
    %cst_98 = arith.constant 1.000000e+00 : f32
    %386 = vector.broadcast %cst_98 : f32 to vector<8x128xf32>
    %387 = arith.addf %386, %385 : vector<8x128xf32>
    %388 = arith.divf %386, %387 : vector<8x128xf32>
    %389 = vector.extract_strided_slice %370 {offsets = [0, 256], sizes = [8, 128], strides = [1, 1]} : vector<8x384xf32> to vector<8x128xf32>
    %390 = vector.extract_strided_slice %372 {offsets = [0, 256], sizes = [8, 128], strides = [1, 1]} : vector<8x384xf32> to vector<8x128xf32>
    %391 = arith.mulf %380, %390 : vector<8x128xf32>
    %392 = arith.addf %389, %391 : vector<8x128xf32>
    %393 = math.tanh %392 : vector<8x128xf32>
    %cst_99 = arith.constant 1.000000e+00 : f32
    %394 = vector.broadcast %cst_99 : f32 to vector<8x128xf32>
    %395 = arith.subf %394, %388 : vector<8x128xf32>
    %396 = arith.mulf %395, %393 : vector<8x128xf32>
    %397 = arith.mulf %388, %329 : vector<8x128xf32>
    %398 = arith.addf %396, %397 : vector<8x128xf32>
    %399 = arith.index_cast %368 : i32 to index
    %c384_100 = arith.constant 384 : index
    %400 = vector.load %arg10[%399, %c384_100] : memref<64x768xf32, #tpu.memory_space<vmem>>, vector<8x384xf32>
    %cst_101 = arith.constant dense<0.000000e+00> : vector<8x384xf32>
    %401 = tpu.matmul %359, %8, %cst_101 {dimension_numbers = #tpu.dot_dimension_numbers<[1], [0], [0], [1], [0, 0, 1, 1], [], []>} : vector<8x128xf32>, vector<128x384xf32>, vector<8x384xf32> -> vector<8x384xf32>
    %402 = arith.addf %401, %14 : vector<8x384xf32>
    %403 = vector.extract_strided_slice %400 {offsets = [0, 0], sizes = [8, 128], strides = [1, 1]} : vector<8x384xf32> to vector<8x128xf32>
    %404 = vector.extract_strided_slice %402 {offsets = [0, 0], sizes = [8, 128], strides = [1, 1]} : vector<8x384xf32> to vector<8x128xf32>
    %405 = arith.addf %403, %404 : vector<8x128xf32>
    %406 = arith.negf %405 : vector<8x128xf32>
    %407 = math.exp %406 : vector<8x128xf32>
    %cst_102 = arith.constant 1.000000e+00 : f32
    %408 = vector.broadcast %cst_102 : f32 to vector<8x128xf32>
    %409 = arith.addf %408, %407 : vector<8x128xf32>
    %410 = arith.divf %408, %409 : vector<8x128xf32>
    %411 = vector.extract_strided_slice %400 {offsets = [0, 128], sizes = [8, 128], strides = [1, 1]} : vector<8x384xf32> to vector<8x128xf32>
    %412 = vector.extract_strided_slice %402 {offsets = [0, 128], sizes = [8, 128], strides = [1, 1]} : vector<8x384xf32> to vector<8x128xf32>
    %413 = arith.addf %411, %412 : vector<8x128xf32>
    %414 = arith.negf %413 : vector<8x128xf32>
    %415 = math.exp %414 : vector<8x128xf32>
    %cst_103 = arith.constant 1.000000e+00 : f32
    %416 = vector.broadcast %cst_103 : f32 to vector<8x128xf32>
    %417 = arith.addf %416, %415 : vector<8x128xf32>
    %418 = arith.divf %416, %417 : vector<8x128xf32>
    %419 = vector.extract_strided_slice %400 {offsets = [0, 256], sizes = [8, 128], strides = [1, 1]} : vector<8x384xf32> to vector<8x128xf32>
    %420 = vector.extract_strided_slice %402 {offsets = [0, 256], sizes = [8, 128], strides = [1, 1]} : vector<8x384xf32> to vector<8x128xf32>
    %421 = arith.mulf %410, %420 : vector<8x128xf32>
    %422 = arith.addf %419, %421 : vector<8x128xf32>
    %423 = math.tanh %422 : vector<8x128xf32>
    %cst_104 = arith.constant 1.000000e+00 : f32
    %424 = vector.broadcast %cst_104 : f32 to vector<8x128xf32>
    %425 = arith.subf %424, %418 : vector<8x128xf32>
    %426 = arith.mulf %425, %423 : vector<8x128xf32>
    %427 = arith.mulf %418, %359 : vector<8x128xf32>
    %428 = arith.addf %426, %427 : vector<8x128xf32>
    %429 = arith.index_cast %365 : i32 to index
    %c0_105 = arith.constant 0 : index
    %430 = vector.load %arg8[%429, %c0_105] : memref<64x128xf32, #tpu.memory_space<vmem>>, vector<8x128xf32>
    tpu.vector_store %arg8[%429, %c0_105], %398 {strides = array<i32>} : memref<64x128xf32, #tpu.memory_space<vmem>>, vector<8x128xf32>,
    %431 = arith.index_cast %368 : i32 to index
    %c0_106 = arith.constant 0 : index
    %432 = vector.load %arg11[%431, %c0_106] : memref<64x128xf32, #tpu.memory_space<vmem>>, vector<8x128xf32>
    tpu.vector_store %arg11[%431, %c0_106], %428 {strides = array<i32>} : memref<64x128xf32, #tpu.memory_space<vmem>>, vector<8x128xf32>,
    %c6_i32 = arith.constant 6 : i32
    %c8_i32_107 = arith.constant 8 : i32
    %433 = arith.muli %c6_i32, %c8_i32_107 : i32
    %434 = tpu.assume_multiple %433, 8 : i32
    %c7_i32_108 = arith.constant 7 : i32
    %435 = arith.subi %c7_i32_108, %c6_i32 : i32
    %c8_i32_109 = arith.constant 8 : i32
    %436 = arith.muli %435, %c8_i32_109 : i32
    %437 = tpu.assume_multiple %436, 8 : i32
    %438 = arith.index_cast %434 : i32 to index
    %c0_110 = arith.constant 0 : index
    %439 = vector.load %arg10[%438, %c0_110] : memref<64x768xf32, #tpu.memory_space<vmem>>, vector<8x384xf32>
    %cst_111 = arith.constant dense<0.000000e+00> : vector<8x384xf32>
    %440 = tpu.matmul %398, %7, %cst_111 {dimension_numbers = #tpu.dot_dimension_numbers<[1], [0], [0], [1], [0, 0, 1, 1], [], []>} : vector<8x128xf32>, vector<128x384xf32>, vector<8x384xf32> -> vector<8x384xf32>
    %441 = arith.addf %440, %11 : vector<8x384xf32>
    %442 = vector.extract_strided_slice %439 {offsets = [0, 0], sizes = [8, 128], strides = [1, 1]} : vector<8x384xf32> to vector<8x128xf32>
    %443 = vector.extract_strided_slice %441 {offsets = [0, 0], sizes = [8, 128], strides = [1, 1]} : vector<8x384xf32> to vector<8x128xf32>
    %444 = arith.addf %442, %443 : vector<8x128xf32>
    %445 = arith.negf %444 : vector<8x128xf32>
    %446 = math.exp %445 : vector<8x128xf32>
    %cst_112 = arith.constant 1.000000e+00 : f32
    %447 = vector.broadcast %cst_112 : f32 to vector<8x128xf32>
    %448 = arith.addf %447, %446 : vector<8x128xf32>
    %449 = arith.divf %447, %448 : vector<8x128xf32>
    %450 = vector.extract_strided_slice %439 {offsets = [0, 128], sizes = [8, 128], strides = [1, 1]} : vector<8x384xf32> to vector<8x128xf32>
    %451 = vector.extract_strided_slice %441 {offsets = [0, 128], sizes = [8, 128], strides = [1, 1]} : vector<8x384xf32> to vector<8x128xf32>
    %452 = arith.addf %450, %451 : vector<8x128xf32>
    %453 = arith.negf %452 : vector<8x128xf32>
    %454 = math.exp %453 : vector<8x128xf32>
    %cst_113 = arith.constant 1.000000e+00 : f32
    %455 = vector.broadcast %cst_113 : f32 to vector<8x128xf32>
    %456 = arith.addf %455, %454 : vector<8x128xf32>
    %457 = arith.divf %455, %456 : vector<8x128xf32>
    %458 = vector.extract_strided_slice %439 {offsets = [0, 256], sizes = [8, 128], strides = [1, 1]} : vector<8x384xf32> to vector<8x128xf32>
    %459 = vector.extract_strided_slice %441 {offsets = [0, 256], sizes = [8, 128], strides = [1, 1]} : vector<8x384xf32> to vector<8x128xf32>
    %460 = arith.mulf %449, %459 : vector<8x128xf32>
    %461 = arith.addf %458, %460 : vector<8x128xf32>
    %462 = math.tanh %461 : vector<8x128xf32>
    %cst_114 = arith.constant 1.000000e+00 : f32
    %463 = vector.broadcast %cst_114 : f32 to vector<8x128xf32>
    %464 = arith.subf %463, %457 : vector<8x128xf32>
    %465 = arith.mulf %464, %462 : vector<8x128xf32>
    %466 = arith.mulf %457, %398 : vector<8x128xf32>
    %467 = arith.addf %465, %466 : vector<8x128xf32>
    %468 = arith.index_cast %437 : i32 to index
    %c384_115 = arith.constant 384 : index
    %469 = vector.load %arg10[%468, %c384_115] : memref<64x768xf32, #tpu.memory_space<vmem>>, vector<8x384xf32>
    %cst_116 = arith.constant dense<0.000000e+00> : vector<8x384xf32>
    %470 = tpu.matmul %428, %8, %cst_116 {dimension_numbers = #tpu.dot_dimension_numbers<[1], [0], [0], [1], [0, 0, 1, 1], [], []>} : vector<8x128xf32>, vector<128x384xf32>, vector<8x384xf32> -> vector<8x384xf32>
    %471 = arith.addf %470, %14 : vector<8x384xf32>
    %472 = vector.extract_strided_slice %469 {offsets = [0, 0], sizes = [8, 128], strides = [1, 1]} : vector<8x384xf32> to vector<8x128xf32>
    %473 = vector.extract_strided_slice %471 {offsets = [0, 0], sizes = [8, 128], strides = [1, 1]} : vector<8x384xf32> to vector<8x128xf32>
    %474 = arith.addf %472, %473 : vector<8x128xf32>
    %475 = arith.negf %474 : vector<8x128xf32>
    %476 = math.exp %475 : vector<8x128xf32>
    %cst_117 = arith.constant 1.000000e+00 : f32
    %477 = vector.broadcast %cst_117 : f32 to vector<8x128xf32>
    %478 = arith.addf %477, %476 : vector<8x128xf32>
    %479 = arith.divf %477, %478 : vector<8x128xf32>
    %480 = vector.extract_strided_slice %469 {offsets = [0, 128], sizes = [8, 128], strides = [1, 1]} : vector<8x384xf32> to vector<8x128xf32>
    %481 = vector.extract_strided_slice %471 {offsets = [0, 128], sizes = [8, 128], strides = [1, 1]} : vector<8x384xf32> to vector<8x128xf32>
    %482 = arith.addf %480, %481 : vector<8x128xf32>
    %483 = arith.negf %482 : vector<8x128xf32>
    %484 = math.exp %483 : vector<8x128xf32>
    %cst_118 = arith.constant 1.000000e+00 : f32
    %485 = vector.broadcast %cst_118 : f32 to vector<8x128xf32>
    %486 = arith.addf %485, %484 : vector<8x128xf32>
    %487 = arith.divf %485, %486 : vector<8x128xf32>
    %488 = vector.extract_strided_slice %469 {offsets = [0, 256], sizes = [8, 128], strides = [1, 1]} : vector<8x384xf32> to vector<8x128xf32>
    %489 = vector.extract_strided_slice %471 {offsets = [0, 256], sizes = [8, 128], strides = [1, 1]} : vector<8x384xf32> to vector<8x128xf32>
    %490 = arith.mulf %479, %489 : vector<8x128xf32>
    %491 = arith.addf %488, %490 : vector<8x128xf32>
    %492 = math.tanh %491 : vector<8x128xf32>
    %cst_119 = arith.constant 1.000000e+00 : f32
    %493 = vector.broadcast %cst_119 : f32 to vector<8x128xf32>
    %494 = arith.subf %493, %487 : vector<8x128xf32>
    %495 = arith.mulf %494, %492 : vector<8x128xf32>
    %496 = arith.mulf %487, %428 : vector<8x128xf32>
    %497 = arith.addf %495, %496 : vector<8x128xf32>
    %498 = arith.index_cast %434 : i32 to index
    %c0_120 = arith.constant 0 : index
    %499 = vector.load %arg8[%498, %c0_120] : memref<64x128xf32, #tpu.memory_space<vmem>>, vector<8x128xf32>
    tpu.vector_store %arg8[%498, %c0_120], %467 {strides = array<i32>} : memref<64x128xf32, #tpu.memory_space<vmem>>, vector<8x128xf32>,
    %500 = arith.index_cast %437 : i32 to index
    %c0_121 = arith.constant 0 : index
    %501 = vector.load %arg11[%500, %c0_121] : memref<64x128xf32, #tpu.memory_space<vmem>>, vector<8x128xf32>
    tpu.vector_store %arg11[%500, %c0_121], %497 {strides = array<i32>} : memref<64x128xf32, #tpu.memory_space<vmem>>, vector<8x128xf32>,
    %c7_i32_122 = arith.constant 7 : i32
    %c8_i32_123 = arith.constant 8 : i32
    %502 = arith.muli %c7_i32_122, %c8_i32_123 : i32
    %503 = tpu.assume_multiple %502, 8 : i32
    %c7_i32_124 = arith.constant 7 : i32
    %504 = arith.subi %c7_i32_124, %c7_i32_122 : i32
    %c8_i32_125 = arith.constant 8 : i32
    %505 = arith.muli %504, %c8_i32_125 : i32
    %506 = tpu.assume_multiple %505, 8 : i32
    %507 = arith.index_cast %503 : i32 to index
    %c0_126 = arith.constant 0 : index
    %508 = vector.load %arg10[%507, %c0_126] : memref<64x768xf32, #tpu.memory_space<vmem>>, vector<8x384xf32>
    %cst_127 = arith.constant dense<0.000000e+00> : vector<8x384xf32>
    %509 = tpu.matmul %467, %7, %cst_127 {dimension_numbers = #tpu.dot_dimension_numbers<[1], [0], [0], [1], [0, 0, 1, 1], [], []>} : vector<8x128xf32>, vector<128x384xf32>, vector<8x384xf32> -> vector<8x384xf32>
    %510 = arith.addf %509, %11 : vector<8x384xf32>
    %511 = vector.extract_strided_slice %508 {offsets = [0, 0], sizes = [8, 128], strides = [1, 1]} : vector<8x384xf32> to vector<8x128xf32>
    %512 = vector.extract_strided_slice %510 {offsets = [0, 0], sizes = [8, 128], strides = [1, 1]} : vector<8x384xf32> to vector<8x128xf32>
    %513 = arith.addf %511, %512 : vector<8x128xf32>
    %514 = arith.negf %513 : vector<8x128xf32>
    %515 = math.exp %514 : vector<8x128xf32>
    %cst_128 = arith.constant 1.000000e+00 : f32
    %516 = vector.broadcast %cst_128 : f32 to vector<8x128xf32>
    %517 = arith.addf %516, %515 : vector<8x128xf32>
    %518 = arith.divf %516, %517 : vector<8x128xf32>
    %519 = vector.extract_strided_slice %508 {offsets = [0, 128], sizes = [8, 128], strides = [1, 1]} : vector<8x384xf32> to vector<8x128xf32>
    %520 = vector.extract_strided_slice %510 {offsets = [0, 128], sizes = [8, 128], strides = [1, 1]} : vector<8x384xf32> to vector<8x128xf32>
    %521 = arith.addf %519, %520 : vector<8x128xf32>
    %522 = arith.negf %521 : vector<8x128xf32>
    %523 = math.exp %522 : vector<8x128xf32>
    %cst_129 = arith.constant 1.000000e+00 : f32
    %524 = vector.broadcast %cst_129 : f32 to vector<8x128xf32>
    %525 = arith.addf %524, %523 : vector<8x128xf32>
    %526 = arith.divf %524, %525 : vector<8x128xf32>
    %527 = vector.extract_strided_slice %508 {offsets = [0, 256], sizes = [8, 128], strides = [1, 1]} : vector<8x384xf32> to vector<8x128xf32>
    %528 = vector.extract_strided_slice %510 {offsets = [0, 256], sizes = [8, 128], strides = [1, 1]} : vector<8x384xf32> to vector<8x128xf32>
    %529 = arith.mulf %518, %528 : vector<8x128xf32>
    %530 = arith.addf %527, %529 : vector<8x128xf32>
    %531 = math.tanh %530 : vector<8x128xf32>
    %cst_130 = arith.constant 1.000000e+00 : f32
    %532 = vector.broadcast %cst_130 : f32 to vector<8x128xf32>
    %533 = arith.subf %532, %526 : vector<8x128xf32>
    %534 = arith.mulf %533, %531 : vector<8x128xf32>
    %535 = arith.mulf %526, %467 : vector<8x128xf32>
    %536 = arith.addf %534, %535 : vector<8x128xf32>
    %537 = arith.index_cast %506 : i32 to index
    %c384_131 = arith.constant 384 : index
    %538 = vector.load %arg10[%537, %c384_131] : memref<64x768xf32, #tpu.memory_space<vmem>>, vector<8x384xf32>
    %cst_132 = arith.constant dense<0.000000e+00> : vector<8x384xf32>
    %539 = tpu.matmul %497, %8, %cst_132 {dimension_numbers = #tpu.dot_dimension_numbers<[1], [0], [0], [1], [0, 0, 1, 1], [], []>} : vector<8x128xf32>, vector<128x384xf32>, vector<8x384xf32> -> vector<8x384xf32>
    %540 = arith.addf %539, %14 : vector<8x384xf32>
    %541 = vector.extract_strided_slice %538 {offsets = [0, 0], sizes = [8, 128], strides = [1, 1]} : vector<8x384xf32> to vector<8x128xf32>
    %542 = vector.extract_strided_slice %540 {offsets = [0, 0], sizes = [8, 128], strides = [1, 1]} : vector<8x384xf32> to vector<8x128xf32>
    %543 = arith.addf %541, %542 : vector<8x128xf32>
    %544 = arith.negf %543 : vector<8x128xf32>
    %545 = math.exp %544 : vector<8x128xf32>
    %cst_133 = arith.constant 1.000000e+00 : f32
    %546 = vector.broadcast %cst_133 : f32 to vector<8x128xf32>
    %547 = arith.addf %546, %545 : vector<8x128xf32>
    %548 = arith.divf %546, %547 : vector<8x128xf32>
    %549 = vector.extract_strided_slice %538 {offsets = [0, 128], sizes = [8, 128], strides = [1, 1]} : vector<8x384xf32> to vector<8x128xf32>
    %550 = vector.extract_strided_slice %540 {offsets = [0, 128], sizes = [8, 128], strides = [1, 1]} : vector<8x384xf32> to vector<8x128xf32>
    %551 = arith.addf %549, %550 : vector<8x128xf32>
    %552 = arith.negf %551 : vector<8x128xf32>
    %553 = math.exp %552 : vector<8x128xf32>
    %cst_134 = arith.constant 1.000000e+00 : f32
    %554 = vector.broadcast %cst_134 : f32 to vector<8x128xf32>
    %555 = arith.addf %554, %553 : vector<8x128xf32>
    %556 = arith.divf %554, %555 : vector<8x128xf32>
    %557 = vector.extract_strided_slice %538 {offsets = [0, 256], sizes = [8, 128], strides = [1, 1]} : vector<8x384xf32> to vector<8x128xf32>
    %558 = vector.extract_strided_slice %540 {offsets = [0, 256], sizes = [8, 128], strides = [1, 1]} : vector<8x384xf32> to vector<8x128xf32>
    %559 = arith.mulf %548, %558 : vector<8x128xf32>
    %560 = arith.addf %557, %559 : vector<8x128xf32>
    %561 = math.tanh %560 : vector<8x128xf32>
    %cst_135 = arith.constant 1.000000e+00 : f32
    %562 = vector.broadcast %cst_135 : f32 to vector<8x128xf32>
    %563 = arith.subf %562, %556 : vector<8x128xf32>
    %564 = arith.mulf %563, %561 : vector<8x128xf32>
    %565 = arith.mulf %556, %497 : vector<8x128xf32>
    %566 = arith.addf %564, %565 : vector<8x128xf32>
    %567 = arith.index_cast %503 : i32 to index
    %c0_136 = arith.constant 0 : index
    %568 = vector.load %arg8[%567, %c0_136] : memref<64x128xf32, #tpu.memory_space<vmem>>, vector<8x128xf32>
    tpu.vector_store %arg8[%567, %c0_136], %536 {strides = array<i32>} : memref<64x128xf32, #tpu.memory_space<vmem>>, vector<8x128xf32>,
    %569 = arith.index_cast %506 : i32 to index
    %c0_137 = arith.constant 0 : index
    %570 = vector.load %arg11[%569, %c0_137] : memref<64x128xf32, #tpu.memory_space<vmem>>, vector<8x128xf32>
    tpu.vector_store %arg11[%569, %c0_137], %566 {strides = array<i32>} : memref<64x128xf32, #tpu.memory_space<vmem>>, vector<8x128xf32>,
    %c8_i32_138 = arith.constant 8 : i32
    %c0_139 = arith.constant 0 : index
    %c0_140 = arith.constant 0 : index
    %c0_141 = arith.constant 0 : index
    %571 = vector.load %arg9[%c0_139, %c0_140, %c0_141] : memref<2x8x128xf32, #tpu.memory_space<vmem>>, vector<1x8x128xf32>
    %572 = vector.shape_cast %571 : vector<1x8x128xf32> to vector<8x128xf32>
    %573 = vector.shape_cast %536 : vector<8x128xf32> to vector<1x8x128xf32>
    tpu.vector_store %arg9[%c0_139, %c0_140, %c0_141], %573 {strides = array<i32>} : memref<2x8x128xf32, #tpu.memory_space<vmem>>, vector<1x8x128xf32>,
    %c1_142 = arith.constant 1 : index
    %c0_143 = arith.constant 0 : index
    %c0_144 = arith.constant 0 : index
    %574 = vector.load %arg9[%c1_142, %c0_143, %c0_144] : memref<2x8x128xf32, #tpu.memory_space<vmem>>, vector<1x8x128xf32>
    %575 = vector.shape_cast %574 : vector<1x8x128xf32> to vector<8x128xf32>
    %576 = vector.shape_cast %566 : vector<8x128xf32> to vector<1x8x128xf32>
    tpu.vector_store %arg9[%c1_142, %c0_143, %c0_144], %576 {strides = array<i32>} : memref<2x8x128xf32, #tpu.memory_space<vmem>>, vector<1x8x128xf32>,
    %c0_145 = arith.constant 0 : index
    %c0_146 = arith.constant 0 : index
    %577 = vector.load %arg8[%c0_145, %c0_146] : memref<64x128xf32, #tpu.memory_space<vmem>>, vector<64x128xf32>
    %c0_147 = arith.constant 0 : index
    %c0_148 = arith.constant 0 : index
    %578 = vector.load %arg11[%c0_147, %c0_148] : memref<64x128xf32, #tpu.memory_space<vmem>>, vector<64x128xf32>
    %579 = arith.addf %577, %578 : vector<64x128xf32>
    %cst_149 = arith.constant 0.000000e+00 : f32
    %580 = vector.broadcast %cst_149 : f32 to vector<64x128xf32>
    %581 = arith.maximumf %579, %580 : vector<64x128xf32>
    %c0_150 = arith.constant 0 : index
    %c0_151 = arith.constant 0 : index
    %582 = vector.load %arg8[%c0_150, %c0_151] : memref<64x128xf32, #tpu.memory_space<vmem>>, vector<64x128xf32>
    tpu.vector_store %arg8[%c0_150, %c0_151], %581 {strides = array<i32>} : memref<64x128xf32, #tpu.memory_space<vmem>>, vector<64x128xf32>,
    return
  }
}

</mosaic_0001>

<bundles_post_ra>
// kernel: encoder_rnn_forward.1
= control target key start
LH: loop header
LB: loop body
LE: loop exit
PB: predicated region body
PF: predicated region fallthrough
CT: control target
= control target key end

     0   :  { %v7250_v3 = vmov 0.0   ;;  %vm5517_vm0 = vmmov 0   ;;  %s7240_s2 = inlined_call_operand.vmem [shape: f32[128,768], index: 2, kind: input, shape index: {}]   ;;  %s7241_s3 = inlined_call_operand.vmem [shape: f32[128,384], index: 3, kind: input, shape index: {}]   ;;  %s7242_s0 = inlined_call_operand.vmem [shape: f32[64,128], index: 0, kind: input, shape index: {}]   ;;  %s7243_s4 = inlined_call_operand.vmem [shape: f32[128,384], index: 4, kind: input, shape index: {}]   ;;  %s7244_s1 = inlined_call_operand.vmem [shape: f32[2,8,128], index: 1, kind: input, shape index: {}]   ;;  %s7245_s5 = inlined_call_operand.vmem [shape: f32[1,768], index: 5, kind: input, shape index: {}]   ;;  %s7246_s6 = inlined_call_operand.vmem [shape: f32[1,384], index: 6, kind: input, shape index: {}]   ;;  %s7247_s7 = inlined_call_operand.vmem [shape: f32[1,384], index: 7, kind: input, shape index: {}]   ;;  %s7248_s8 = inlined_call_operand.vmem [shape: f32[64,128], index: 8, kind: output, shape index: {0}]   ;;  %s7249_s9 = inlined_call_operand.vmem [shape: f32[2,8,128], index: 9, kind: output, shape index: {1}]  }
   0x1   :  { %v40_v0 = vld [vmem:[%s7240_s2 + $0x8] sm:$0xff]  ;;  %v46_v1 = vld [vmem:[%s7240_s2 + $0x38] sm:$0xff]  ;;  %231 = vmatprep.mubr.f32.mxu0 %v7250_v3  ;;  %344 = vmatprep.mubr.f32.mxu1 %v7250_v3  ;;  %v39_v6 = vld [vmem:[%s7240_s2] sm:$0xff] }
   0x2   :  { %v42_v2 = vld [vmem:[%s7240_s2 + $0x18] sm:$0xff]  ;;  %v4312_v4 = vpack.c.bf16 %v46_v1, %v40_v0  ;;  %v48_v5 = vld [vmem:[%s7240_s2 + $0x48] sm:$0xff]  ;;  %v45_v7 = vld [vmem:[%s7240_s2 + $0x30] sm:$0xff] }
   0x3   :  { %v4344_v8 = vpack.c.bf16 %v48_v5, %v42_v2  ;;  %v4314_v9 = vpack.c.bf16 %v45_v7, %v39_v6  ;;  %v41_v10 = vld [vmem:[%s7240_s2 + $0x10] sm:$0xff]  ;;  %v47_v11 = vld [vmem:[%s7240_s2 + $0x40] sm:$0xff]  ;;  %v52_v12 = vld [vmem:[%s7240_s2 + $0x68] sm:$0xff] }
   0x4   :  { %4313 = vmatprep.subr.bf16.mxu0 %v4312_v4  ;;  %v4346_v13 = vpack.c.bf16 %v47_v11, %v41_v10  ;;  %v58_v14 = vld [vmem:[%s7240_s2 + $0x98] sm:$0xff]  ;;  %v60_v16 = vld [vmem:[%s7240_s2 + $0xa8] sm:$0xff]  ;;  %v51_v19 = vld [vmem:[%s7240_s2 + $0x60] sm:$0xff] }
   0x5   :  { %v54_v15 = vld [vmem:[%s7240_s2 + $0x78] sm:$0xff]  ;;  %4345 = vmatprep.subr.bf16.mxu1 %v4344_v8  ;;  %4315 = vmatpush1.bf16.msra.mxu0 %v4314_v9  ;;  %v4316_v17 = vpack.c.bf16 %v58_v14, %v52_v12  ;;  %v57_v20 = vld [vmem:[%s7240_s2 + $0x90] sm:$0xff]  ;;  %v59_v23 = vld [vmem:[%s7240_s2 + $0xa0] sm:$0xff] }
   0x6   :  { %v4348_v18 = vpack.c.bf16 %v60_v16, %v54_v15  ;;  %v53_v21 = vld [vmem:[%s7240_s2 + $0x70] sm:$0xff]  ;;  %4347 = vmatpush1.bf16.msra.mxu1 %v4346_v13  ;;  %v4318_v22 = vpack.c.bf16 %v57_v20, %v51_v19  ;;  %v64_v24 = vld [vmem:[%s7240_s2 + $0xc8] sm:$0xff]  ;;  %v70_v25 = vld [vmem:[%s7240_s2 + $0xf8] sm:$0xff] }
   0x7   :  { %4317 = vmatprep.subr.bf16.mxu0 %v4316_v17  ;;  %v4350_v26 = vpack.c.bf16 %v59_v23, %v53_v21  ;;  %v4320_v27 = vpack.c.bf16 %v70_v25, %v64_v24  ;;  %v66_v28 = vld [vmem:[%s7240_s2 + $0xd8] sm:$0xff]  ;;  %v72_v29 = vld [vmem:[%s7240_s2 + $0x108] sm:$0xff]  ;;  %v63_v30 = vld [vmem:[%s7240_s2 + $0xc0] sm:$0xff] }
   0x8   :  { %4349 = vmatprep.subr.bf16.mxu1 %v4348_v18  ;;  %v4352_v31 = vpack.c.bf16 %v72_v29, %v66_v28  ;;  %v69_v32 = vld [vmem:[%s7240_s2 + $0xf0] sm:$0xff]  ;;  %v71_v34 = vld [vmem:[%s7240_s2 + $0x100] sm:$0xff]  ;;  %v76_v36 = vld [vmem:[%s7240_s2 + $0x128] sm:$0xff] }
   0x9   :  { %v65_v33 = vld [vmem:[%s7240_s2 + $0xd0] sm:$0xff]  ;;  %4319 = vmatpush1.bf16.msra.mxu0 %v4318_v22  ;;  %v4322_v35 = vpack.c.bf16 %v69_v32, %v63_v30  ;;  %v82_v37 = vld [vmem:[%s7240_s2 + $0x158] sm:$0xff]  ;;  %v84_v41 = vld [vmem:[%s7240_s2 + $0x168] sm:$0xff] }
   0xa   :  { %v78_v38 = vld [vmem:[%s7240_s2 + $0x138] sm:$0xff]  ;;  %4351 = vmatpush1.bf16.msra.mxu1 %v4350_v26  ;;  %4321 = vmatprep.subr.bf16.mxu0 %v4320_v27  ;;  %v4354_v39 = vpack.c.bf16 %v71_v34, %v65_v33  ;;  %v4324_v40 = vpack.c.bf16 %v82_v37, %v76_v36  ;;  %v75_v42 = vld [vmem:[%s7240_s2 + $0x120] sm:$0xff]  ;;  %v81_v43 = vld [vmem:[%s7240_s2 + $0x150] sm:$0xff] }
   0xb   :  { %4353 = vmatprep.subr.bf16.mxu1 %v4352_v31  ;;  %v4356_v44 = vpack.c.bf16 %v84_v41, %v78_v38  ;;  %v77_v45 = vld [vmem:[%s7240_s2 + $0x130] sm:$0xff]  ;;  %v83_v46 = vld [vmem:[%s7240_s2 + $0x160] sm:$0xff]  ;;  %v88_v47 = vld [vmem:[%s7240_s2 + $0x188] sm:$0xff]  ;;  %v4326_v51 = vpack.c.bf16 %v81_v43, %v75_v42 }
   0xc   :  { %v94_v48 = vld [vmem:[%s7240_s2 + $0x1b8] sm:$0xff]  ;;  %v96_v50 = vld [vmem:[%s7240_s2 + $0x1c8] sm:$0xff]  ;;  %v4358_v52 = vpack.c.bf16 %v83_v46, %v77_v45  ;;  %v87_v54 = vld [vmem:[%s7240_s2 + $0x180] sm:$0xff] }
   0xd   :  { %v90_v49 = vld [vmem:[%s7240_s2 + $0x198] sm:$0xff]  ;;  %4323 = vmatpush1.bf16.msra.mxu0 %v4322_v35  ;;  %v4328_v53 = vpack.c.bf16 %v94_v48, %v88_v47  ;;  %v93_v55 = vld [vmem:[%s7240_s2 + $0x1b0] sm:$0xff]  ;;  %v95_v58 = vld [vmem:[%s7240_s2 + $0x1c0] sm:$0xff]  ;;  %v7252_v48 = vmov 0.0|0.0  }
   0xe   :  { %4355 = vmatpush1.bf16.msra.mxu1 %v4354_v39  ;;  %4325 = vmatprep.subr.bf16.mxu0 %v4324_v40  ;;  %v89_v56 = vld [vmem:[%s7240_s2 + $0x190] sm:$0xff]  ;;  %v4360_v57 = vpack.c.bf16 %v96_v50, %v90_v49  ;;  %v100_v59 = vld [vmem:[%s7240_s2 + $0x1e8] sm:$0xff]  ;;  %v106_v60 = vld [vmem:[%s7240_s2 + $0x218] sm:$0xff]  ;;  %v4330_v63 = vpack.c.bf16 %v93_v55, %v87_v54 }
   0xf   :  { %4357 = vmatprep.subr.bf16.mxu1 %v4356_v44  ;;  %v102_v61 = vld [vmem:[%s7240_s2 + $0x1f8] sm:$0xff]  ;;  %v108_v62 = vld [vmem:[%s7240_s2 + $0x228] sm:$0xff]  ;;  %v4362_v0 = vpack.c.bf16 %v95_v58, %v89_v56  ;;  %v4332_v1 = vpack.c.bf16 %v106_v60, %v100_v59  ;;  %v99_v2 = vld [vmem:[%s7240_s2 + $0x1e0] sm:$0xff] }
  0x10   :  { %v105_v4 = vld [vmem:[%s7240_s2 + $0x210] sm:$0xff]  ;;  %v4364_v6 = vpack.c.bf16 %v108_v62, %v102_v61  ;;  %v107_v7 = vld [vmem:[%s7240_s2 + $0x220] sm:$0xff]  ;;  %v112_v8 = vld [vmem:[%s7240_s2 + $0x248] sm:$0xff] }
  0x11   :  { %4327 = vmatpush1.bf16.msra.mxu0 %v4326_v51  ;;  %v101_v5 = vld [vmem:[%s7240_s2 + $0x1f0] sm:$0xff]  ;;  %v118_v9 = vld [vmem:[%s7240_s2 + $0x278] sm:$0xff]  ;;  %v120_v11 = vld [vmem:[%s7240_s2 + $0x288] sm:$0xff]  ;;  %v4334_v12 = vpack.c.bf16 %v105_v4, %v99_v2 }
  0x12   :  { %4359 = vmatpush1.bf16.msra.mxu1 %v4358_v52  ;;  %4329 = vmatprep.subr.bf16.mxu0 %v4328_v53  ;;  %v114_v10 = vld [vmem:[%s7240_s2 + $0x258] sm:$0xff]  ;;  %v4366_v13 = vpack.c.bf16 %v107_v7, %v101_v5  ;;  %v4336_v14 = vpack.c.bf16 %v118_v9, %v112_v8  ;;  %v111_v15 = vld [vmem:[%s7240_s2 + $0x240] sm:$0xff]  ;;  %v117_v16 = vld [vmem:[%s7240_s2 + $0x270] sm:$0xff] }
  0x13   :  { %4361 = vmatprep.subr.bf16.mxu1 %v4360_v57  ;;  %v113_v17 = vld [vmem:[%s7240_s2 + $0x250] sm:$0xff]  ;;  %v4368_v18 = vpack.c.bf16 %v120_v11, %v114_v10  ;;  %v119_v19 = vld [vmem:[%s7240_s2 + $0x280] sm:$0xff]  ;;  %v124_v20 = vld [vmem:[%s7240_s2 + $0x2a8] sm:$0xff]  ;;  %v4338_v24 = vpack.c.bf16 %v117_v16, %v111_v15 }
  0x14   :  { %v130_v21 = vld [vmem:[%s7240_s2 + $0x2d8] sm:$0xff]  ;;  %v132_v23 = vld [vmem:[%s7240_s2 + $0x2e8] sm:$0xff]  ;;  %v4370_v25 = vpack.c.bf16 %v119_v19, %v113_v17  ;;  %v123_v27 = vld [vmem:[%s7240_s2 + $0x2a0] sm:$0xff] }
  0x15   :  { %4331 = vmatpush1.bf16.msra.mxu0 %v4330_v63  ;;  %v126_v22 = vld [vmem:[%s7240_s2 + $0x2b8] sm:$0xff]  ;;  %v4340_v26 = vpack.c.bf16 %v130_v21, %v124_v20  ;;  %v129_v28 = vld [vmem:[%s7240_s2 + $0x2d0] sm:$0xff]  ;;  %v131_v31 = vld [vmem:[%s7240_s2 + $0x2e0] sm:$0xff] }
  0x16   :  { %4363 = vmatpush1.bf16.msra.mxu1 %v4362_v0  ;;  %4333 = vmatprep.subr.bf16.mxu0 %v4332_v1  ;;  %v125_v29 = vld [vmem:[%s7240_s2 + $0x2b0] sm:$0xff]  ;;  %v4372_v30 = vpack.c.bf16 %v132_v23, %v126_v22  ;;  %v44_v32 = vld [vmem:[%s7240_s2 + $0x28] sm:$0xff]  ;;  %v50_v33 = vld [vmem:[%s7240_s2 + $0x58] sm:$0xff]  ;;  %v4342_v34 = vpack.c.bf16 %v129_v28, %v123_v27 }
  0x17   :  { %4365 = vmatprep.subr.bf16.mxu1 %v4364_v6  ;;  %v4374_v35 = vpack.c.bf16 %v131_v31, %v125_v29  ;;  %v4376_v36 = vpack.c.bf16 %v50_v33, %v44_v32  ;;  %v43_v37 = vld [vmem:[%s7240_s2 + $0x20] sm:$0xff]  ;;  %v49_v38 = vld [vmem:[%s7240_s2 + $0x50] sm:$0xff]  ;;  %v559_v40 = vld [vmem:[%s7241_s3 + $0x28] sm:$0xff] }
  0x18   :  { %v556_v39 = vld [vmem:[%s7241_s3 + $0x10] sm:$0xff]  ;;  %v56_v41 = vld [vmem:[%s7240_s2 + $0x88] sm:$0xff]  ;;  %v62_v42 = vld [vmem:[%s7240_s2 + $0xb8] sm:$0xff]  ;;  %v4378_v44 = vpack.c.bf16 %v49_v38, %v43_v37 }
  0x19   :  { %4335 = vmatpush1.bf16.msra.mxu0 %v4334_v12  ;;  %v5789_v43 = vld [vmem:[%s7242_s0] sm:$0xff]  ;;  %v5791_v45 = vpack.c.bf16 %v559_v40, %v556_v39  ;;  %v61_v47 = vld [vmem:[%s7240_s2 + $0xb0] sm:$0xff]  ;;  %v4380_v49 = vpack.c.bf16 %v62_v42, %v56_v41  ;;  %v565_v51 = vld [vmem:[%s7241_s3 + $0x58] sm:$0xff] }
  0x1a   :  { %4367 = vmatpush1.bf16.msra.mxu1 %v4366_v13  ;;  %4337 = vmatprep.subr.bf16.mxu0 %v4336_v14  ;;  %v55_v46 = vld [vmem:[%s7240_s2 + $0x80] sm:$0xff]  ;;  %v68_v52 = vld [vmem:[%s7240_s2 + $0xe8] sm:$0xff]  ;;  %v74_v53 = vld [vmem:[%s7240_s2 + $0x118] sm:$0xff] }
  0x1b   :  { %4369 = vmatprep.subr.bf16.mxu1 %v4368_v18  ;;  %v562_v50 = vld [vmem:[%s7241_s3 + $0x40] sm:$0xff]  ;;  %v5817_v54 = vld [vmem:[%s7242_s0 + $0x8] sm:$0xff]  ;;  %v4382_v55 = vpack.c.bf16 %v61_v47, %v55_v46  ;;  %v73_v58 = vld [vmem:[%s7240_s2 + $0x110] sm:$0xff]  ;;  %v4384_v59 = vpack.c.bf16 %v74_v53, %v68_v52 }
  0x1c   :  { %v5821_v56 = vpack.c.bf16 %v565_v51, %v562_v50  ;;  %v67_v57 = vld [vmem:[%s7240_s2 + $0xe0] sm:$0xff]  ;;  %v568_v60 = vld [vmem:[%s7241_s3 + $0x70] sm:$0xff]  ;;  %v571_v61 = vld [vmem:[%s7241_s3 + $0x88] sm:$0xff] }
  0x1d   :  { %4339 = vmatpush1.bf16.msra.mxu0 %v4338_v24  ;;  %v80_v62 = vld [vmem:[%s7240_s2 + $0x148] sm:$0xff]  ;;  %v86_v63 = vld [vmem:[%s7240_s2 + $0x178] sm:$0xff]  ;;  %v5848_v0 = vld [vmem:[%s7242_s0 + $0x10] sm:$0xff]  ;;  %v4386_v1 = vpack.c.bf16 %v73_v58, %v67_v57  ;;  %v5852_v2 = vpack.c.bf16 %v571_v61, %v568_v60 }
  0x1e   :  { %4371 = vmatpush1.bf16.msra.mxu1 %v4370_v25  ;;  %4341 = vmatprep.subr.bf16.mxu0 %v4340_v26  ;;  %v79_v4 = vld [vmem:[%s7240_s2 + $0x140] sm:$0xff]  ;;  %v85_v5 = vld [vmem:[%s7240_s2 + $0x170] sm:$0xff]  ;;  %v4388_v6 = vpack.c.bf16 %v86_v63, %v80_v62  ;;  %v577_v8 = vld [vmem:[%s7241_s3 + $0xb8] sm:$0xff] }
  0x1f   :  { %4373 = vmatprep.subr.bf16.mxu1 %v4372_v30  ;;  %7300 = vst [vmem:[#allocation4_spill] sm:$0xff] %v5852_v2  ;;  %v574_v7 = vld [vmem:[%s7241_s3 + $0xa0] sm:$0xff]  ;;  %v92_v9 = vld [vmem:[%s7240_s2 + $0x1a8] sm:$0xff]  ;;  %v98_v10 = vld [vmem:[%s7240_s2 + $0x1d8] sm:$0xff]  ;;  %v4390_v12 = vpack.c.bf16 %v85_v5, %v79_v4 }
  0x20   :  { %v5879_v11 = vld [vmem:[%s7242_s0 + $0x18] sm:$0xff]  ;;  %v5883_v13 = vpack.c.bf16 %v577_v8, %v574_v7  ;;  %v91_v14 = vld [vmem:[%s7240_s2 + $0x1a0] sm:$0xff]  ;;  %v97_v15 = vld [vmem:[%s7240_s2 + $0x1d0] sm:$0xff]  ;;  %v4392_v16 = vpack.c.bf16 %v98_v10, %v92_v9 }
  0x21   :  { %4343 = vmatpush1.bf16.msra.mxu0 %v4342_v34  ;;  %v580_v17 = vld [vmem:[%s7241_s3 + $0xd0] sm:$0xff]  ;;  %v583_v18 = vld [vmem:[%s7241_s3 + $0xe8] sm:$0xff]  ;;  %v110_v20 = vld [vmem:[%s7240_s2 + $0x238] sm:$0xff]  ;;  %v4394_v22 = vpack.c.bf16 %v97_v15, %v91_v14 }
  0x22   :  { %4375 = vmatpush1.bf16.msra.mxu1 %v4374_v35  ;;  %4377 = vmatprep.subr.bf16.mxu0 %v4376_v36  ;;  %7301 = vst [vmem:[#allocation5_spill] sm:$0xff] %v5883_v13  ;;  %v104_v19 = vld [vmem:[%s7240_s2 + $0x208] sm:$0xff]  ;;  %v5910_v21 = vld [vmem:[%s7242_s0 + $0x20] sm:$0xff]  ;;  %v5914_v23 = vpack.c.bf16 %v583_v18, %v580_v17  ;;  %v109_v25 = vld [vmem:[%s7240_s2 + $0x230] sm:$0xff] }
  0x23   :  { %4440 = vmatprep.subr.bf16.mxu1 %v7252_v48  ;;  %v103_v24 = vld [vmem:[%s7240_s2 + $0x200] sm:$0xff]  ;;  %v4396_v26 = vpack.c.bf16 %v110_v20, %v104_v19  ;;  %v589_v28 = vld [vmem:[%s7241_s3 + $0x118] sm:$0xff]  ;;  %v116_v29 = vld [vmem:[%s7240_s2 + $0x268] sm:$0xff] }
  0x24   :  { %232 = vmatmul.mubr.f32.vlgmr.msra.gmra.mrb[0].mxu0 %v5789_v43  ;;  %7302 = vst [vmem:[#allocation6_spill] sm:$0xff] %v5914_v23  ;;  %v586_v27 = vld [vmem:[%s7241_s3 + $0x100] sm:$0xff]  ;;  %v122_v30 = vld [vmem:[%s7240_s2 + $0x298] sm:$0xff]  ;;  %v5941_v31 = vld [vmem:[%s7242_s0 + $0x28] sm:$0xff]  ;;  %v4398_v32 = vpack.c.bf16 %v109_v25, %v103_v24 }
  0x25   :  { %345 = vmatmul.mubr.f32.vlgmr.msra.gmra.mrb[0].mxu1 %v5789_v43  ;;  %4379 = vmatpush1.bf16.msra.mxu0 %v4378_v44  ;;  %v5945_v33 = vpack.c.bf16 %v589_v28, %v586_v27  ;;  %v115_v34 = vld [vmem:[%s7240_s2 + $0x260] sm:$0xff]  ;;  %v121_v35 = vld [vmem:[%s7240_s2 + $0x290] sm:$0xff]  ;;  %v4400_v36 = vpack.c.bf16 %v122_v30, %v116_v29  ;;  %v595_v38 = vld [vmem:[%s7241_s3 + $0x148] sm:$0xff] }
  0x26   :  { %4442 = vmatpush3.bf16.msra.mxu1 %v5791_v45  ;;  %237 = vmatprep.mubr.f32.mxu0 %v7250_v3  ;;  %v592_v37 = vld [vmem:[%s7241_s3 + $0x130] sm:$0xff]  ;;  %v128_v39 = vld [vmem:[%s7240_s2 + $0x2c8] sm:$0xff]  ;;  %v134_v40 = vld [vmem:[%s7240_s2 + $0x2f8] sm:$0xff]  ;;  %v4402_v42 = vpack.c.bf16 %v121_v35, %v115_v34 }
  0x27   :  { %350 = vmatprep.mubr.f32.mxu1 %v7250_v3  ;;  %4381 = vmatprep.subr.bf16.mxu0 %v4380_v49  ;;  %7303 = vst [vmem:[#allocation7_spill] sm:$0xff] %v5945_v33  ;;  %v5972_v41 = vld [vmem:[%s7242_s0 + $0x30] sm:$0xff]  ;;  %v5976_v44 = vpack.c.bf16 %v595_v38, %v592_v37  ;;  %v127_v46 = vld [vmem:[%s7240_s2 + $0x2c0] sm:$0xff]  ;;  %v4404_v49 = vpack.c.bf16 %v134_v40, %v128_v39  ;;  %v601_v51 = vld [vmem:[%s7241_s3 + $0x178] sm:$0xff] }
  0x28   :  { %238 = vmatmul.mubr.f32.gmra.mrb[2].mxu0 %v5817_v54  ;;  %4443 = vmatprep.subr.bf16.mxu1 %v7252_v48  ;;  %v133_v47 = vld [vmem:[%s7240_s2 + $0x2f0] sm:$0xff]  ;;  %v598_v50 = vld [vmem:[%s7241_s3 + $0x160] sm:$0xff]  ;;  %v555_v52 = vld [vmem:[%s7241_s3 + $0x8] sm:$0xff] }
  0x29   :  { %351 = vmatmul.mubr.f32.gmra.mrb[2].mxu1 %v5817_v54  ;;  %4383 = vmatpush1.bf16.msra.mxu0 %v4382_v55  ;;  %7304 = vst [vmem:[#allocation8_spill] sm:$0xff] %v5976_v44  ;;  %v558_v53 = vld [vmem:[%s7241_s3 + $0x20] sm:$0xff]  ;;  %v6003_v55 = vld [vmem:[%s7242_s0 + $0x38] sm:$0xff]  ;;  %v4406_v57 = vpack.c.bf16 %v133_v47, %v127_v46  ;;  %v603_v58 = vld [vmem:[%s7243_s4 + $0x8] sm:$0xff]  ;;  %v6013_v60 = vpack.c.bf16 %v601_v51, %v598_v50 }
  0x2a   :  { %4445 = vmatpush3.bf16.msra.mxu1 %v5821_v56  ;;  %243 = vmatprep.mubr.f32.mxu0 %v7250_v3  ;;  %v554_v61 = vld [vmem:[%s7241_s3] sm:$0xff]  ;;  %v557_v62 = vld [vmem:[%s7241_s3 + $0x18] sm:$0xff]  ;;  %v6022_v63 = vpack.c.bf16 %v558_v53, %v555_v52  ;;  %v564_v7 = vld [vmem:[%s7241_s3 + $0x50] sm:$0xff] }
  0x2b   :  { %356 = vmatprep.mubr.f32.mxu1 %v7250_v3  ;;  %4385 = vmatprep.subr.bf16.mxu0 %v4384_v59  ;;  %v606_v59 = vld [vmem:[%s7243_s4 + $0x20] sm:$0xff]  ;;  %7305 = vst [vmem:[#allocation9_spill] sm:$0xff] %v6013_v60  ;;  %v605_v4 = vld [vmem:[%s7243_s4 + $0x18] sm:$0xff]  ;;  %v612_v9 = vld [vmem:[%s7243_s4 + $0x50] sm:$0xff]  ;;  %v6047_v10 = vpack.c.bf16 %v557_v62, %v554_v61 }
  0x2c   :  { %244 = vmatmul.mubr.f32.gmra.mrb[4].mxu0 %v5848_v0  ;;  %4446 = vmatprep.subr.bf16.mxu1 %v7252_v48  ;;  %v561_v5 = vld [vmem:[%s7241_s3 + $0x38] sm:$0xff]  ;;  %v560_v15 = vld [vmem:[%s7241_s3 + $0x30] sm:$0xff]  ;;  %v611_v20 = vld [vmem:[%s7243_s4 + $0x48] sm:$0xff] }
  0x2d   :  { %357 = vmatmul.mubr.f32.gmra.mrb[4].mxu1 %v5848_v0  ;;  %4387 = vmatpush1.bf16.msra.mxu0 %v4386_v1  ;;  %v602_v1 = vld [vmem:[%s7243_s4] sm:$0xff]  ;;  %v609_v8 = vld [vmem:[%s7243_s4 + $0x38] sm:$0xff]  ;;  %v608_v17 = vld [vmem:[%s7243_s4 + $0x30] sm:$0xff]  ;;  %v6070_v18 = vpack.c.bf16 %v564_v7, %v561_v5 }
  0x2e   :  { %4448 = vmatpush3.bf16.msra.mxu1 %v5852_v2  ;;  %249 = vmatprep.mubr.f32.mxu0 %v7250_v3  ;;  %v6056_v14 = vpack.c.bf16 %v605_v4, %v602_v1  ;;  %v6072_v19 = vpack.c.bf16 %v612_v9, %v609_v8  ;;  %v570_v24 = vld [vmem:[%s7241_s3 + $0x80] sm:$0xff]  ;;  %v615_v25 = vld [vmem:[%s7243_s4 + $0x68] sm:$0xff]  ;;  %v569_v30 = vld [vmem:[%s7241_s3 + $0x78] sm:$0xff] }
  0x2f   :  { %362 = vmatprep.mubr.f32.mxu1 %v7250_v3  ;;  %4389 = vmatprep.subr.bf16.mxu0 %v4388_v6  ;;  %v6035_v6 = vpack.c.bf16 %v606_v59, %v603_v58  ;;  %v566_v29 = vld [vmem:[%s7241_s3 + $0x60] sm:$0xff]  ;;  %v617_v35 = vld [vmem:[%s7243_s4 + $0x78] sm:$0xff]  ;;  %v576_v37 = vld [vmem:[%s7241_s3 + $0xb0] sm:$0xff] }
  0x30   :  { %250 = vmatmul.mubr.f32.gmra.mrb[6].mxu0 %v5879_v11  ;;  %4449 = vmatprep.subr.bf16.mxu1 %v7252_v48  ;;  %v621_v38 = vld [vmem:[%s7243_s4 + $0x98] sm:$0xff]  ;;  %v624_v39 = vld [vmem:[%s7243_s4 + $0xb0] sm:$0xff]  ;;  %v6133_v40 = vpack.c.bf16 %v569_v30, %v566_v29  ;;  %v575_v47 = vld [vmem:[%s7241_s3 + $0xa8] sm:$0xff] }
  0x31   :  { %363 = vmatmul.mubr.f32.gmra.mrb[6].mxu1 %v5879_v11  ;;  %4391 = vmatpush1.bf16.msra.mxu0 %v4390_v12  ;;  %7306 = vst [vmem:[#allocation10_spill] sm:$0xff] %v6035_v6  ;;  %v6052_v12 = vld [vmem:[%s7244_s1] sm:$0xff]  ;;  %v572_v46 = vld [vmem:[%s7241_s3 + $0x90] sm:$0xff]  ;;  %v6151_v50 = vpack.c.bf16 %v624_v39, %v621_v38  ;;  %v623_v51 = vld [vmem:[%s7243_s4 + $0xa8] sm:$0xff] }
  0x32   :  { %4451 = vmatpush3.bf16.msra.mxu1 %v5883_v13  ;;  %255 = vmatprep.mubr.f32.mxu0 %v7250_v3  ;;  %7307 = vst [vmem:[#allocation11_spill] sm:$0xff] %v6133_v40  ;;  %v579_v52 = vld [vmem:[%s7241_s3 + $0xc8] sm:$0xff]  ;;  %v582_v53 = vld [vmem:[%s7241_s3 + $0xe0] sm:$0xff]  ;;  %v6171_v59 = vpack.c.bf16 %v575_v47, %v572_v46  ;;  %v581_v1 = vld [vmem:[%s7241_s3 + $0xd8] sm:$0xff] }
  0x33   :  { %368 = vmatprep.mubr.f32.mxu1 %v7250_v3  ;;  %4393 = vmatprep.subr.bf16.mxu0 %v4392_v16  ;;  %v563_v16 = vld [vmem:[%s7241_s3 + $0x48] sm:$0xff]  ;;  %v630_v58 = vld [vmem:[%s7243_s4 + $0xe0] sm:$0xff]  ;;  %v629_v7 = vld [vmem:[%s7243_s4 + $0xd8] sm:$0xff] }
  0x34   :  { %256 = vmatmul.mubr.f32.gmra.mrb[8].mxu0 %v5910_v21  ;;  %4452 = vmatprep.subr.bf16.mxu1 %v7252_v48  ;;  %v6093_v27 = vpack.c.bf16 %v563_v16, %v560_v15  ;;  %7309 = vst [vmem:[#allocation13_spill] sm:$0xff] %v6171_v59  ;;  %v578_v62 = vld [vmem:[%s7241_s3 + $0xc0] sm:$0xff]  ;;  %v585_v8 = vld [vmem:[%s7241_s3 + $0xf8] sm:$0xff]  ;;  %v588_v9 = vld [vmem:[%s7241_s3 + $0x110] sm:$0xff] }
  0x35   :  { %369 = vmatmul.mubr.f32.gmra.mrb[8].mxu1 %v5910_v21  ;;  %4395 = vmatpush1.bf16.msra.mxu0 %v4394_v22  ;;  %v567_v22 = vld [vmem:[%s7241_s3 + $0x68] sm:$0xff]  ;;  %v626_v4 = vld [vmem:[%s7243_s4 + $0xc0] sm:$0xff]  ;;  %v633_v15 = vld [vmem:[%s7243_s4 + $0xf8] sm:$0xff] }
  0x36   :  { %4454 = vmatpush3.bf16.msra.mxu1 %v5914_v23  ;;  %261 = vmatprep.mubr.f32.mxu0 %v7250_v3  ;;  %v6099_v28 = vpack.c.bf16 %v570_v24, %v567_v22  ;;  %v636_v16 = vld [vmem:[%s7243_s4 + $0x110] sm:$0xff]  ;;  %v587_v24 = vld [vmem:[%s7241_s3 + $0x108] sm:$0xff]  ;;  %v590_v39 = vld [vmem:[%s7241_s3 + $0x120] sm:$0xff] }
  0x37   :  { %374 = vmatprep.mubr.f32.mxu1 %v7250_v3  ;;  %4397 = vmatprep.subr.bf16.mxu0 %v4396_v26  ;;  %v618_v26 = vld [vmem:[%s7243_s4 + $0x80] sm:$0xff]  ;;  %v584_v22 = vld [vmem:[%s7241_s3 + $0xf0] sm:$0xff]  ;;  %v635_v29 = vld [vmem:[%s7243_s4 + $0x108] sm:$0xff] }
  0x38   :  { %262 = vmatmul.mubr.f32.gmra.mrb[10].mxu0 %v5941_v31  ;;  %4455 = vmatprep.subr.bf16.mxu1 %v7252_v48  ;;  %v6112_v34 = vpack.c.bf16 %v618_v26, %v615_v25  ;;  %v632_v25 = vld [vmem:[%s7243_s4 + $0xf0] sm:$0xff]  ;;  %v6227_v26 = vpack.c.bf16 %v636_v16, %v633_v15  ;;  %v591_v30 = vld [vmem:[%s7241_s3 + $0x128] sm:$0xff]  ;;  %v593_v46 = vld [vmem:[%s7241_s3 + $0x138] sm:$0xff] }
  0x39   :  { %375 = vmatmul.mubr.f32.gmra.mrb[10].mxu1 %v5941_v31  ;;  %4399 = vmatpush1.bf16.msra.mxu0 %v4398_v32  ;;  %v614_v32 = vld [vmem:[%s7243_s4 + $0x60] sm:$0xff]  ;;  %v6251_v38 = vpack.c.bf16 %v635_v29, %v632_v25  ;;  %v647_v15 = vld [vmem:[%s7243_s4 + $0x168] sm:$0xff] }
  0x3a   :  { %4457 = vmatpush3.bf16.msra.mxu1 %v5945_v33  ;;  %267 = vmatprep.mubr.f32.mxu0 %v7250_v3  ;;  %v638_v47 = vld [vmem:[%s7243_s4 + $0x120] sm:$0xff]  ;;  %v6333_v29 = vld [vmem:[%s7244_s1 + $0x8] sm:$0xff] }
  0x3b   :  { %380 = vmatprep.mubr.f32.mxu1 %v7250_v3  ;;  %4401 = vmatprep.subr.bf16.mxu0 %v4400_v36  ;;  %v573_v36 = vld [vmem:[%s7241_s3 + $0x98] sm:$0xff] }
  0x3c   :  { %268 = vmatmul.mubr.f32.gmra.mrb[12].mxu0 %v5972_v41  ;;  %4458 = vmatprep.subr.bf16.mxu1 %v7252_v48 }
  0x3d   :  { %381 = vmatmul.mubr.f32.gmra.mrb[12].mxu1 %v5972_v41  ;;  %4403 = vmatpush1.bf16.msra.mxu0 %v4402_v42  ;;  %v6139_v42 = vpack.c.bf16 %v576_v37, %v573_v36  ;;  %v642_v36 = vld [vmem:[%s7243_s4 + $0x140] sm:$0xff]  ;;  %v6247_v37 = vpack.c.bf16 %v587_v24, %v584_v22  ;;  %v604_v24 = vld [vmem:[%s7243_s4 + $0x10] sm:$0xff] }
  0x3e   :  { %4460 = vmatpush3.bf16.msra.mxu1 %v5976_v44  ;;  %273 = vmatprep.mubr.f32.mxu0 %v7250_v3 }
  0x3f   :  { %386 = vmatprep.mubr.f32.mxu1 %v7250_v3  ;;  %4405 = vmatprep.subr.bf16.mxu0 %v4404_v49  ;;  %7308 = vst [vmem:[#allocation12_spill] sm:$0xff] %v6139_v42  ;;  %v620_v49 = vld [vmem:[%s7243_s4 + $0x90] sm:$0xff]  ;;  %7313 = vst [vmem:[#allocation17_spill] sm:$0xff] %v6247_v37 }
  0x40   :  { %274 = vmatmul.mubr.f32.gmra.mrb[14].mxu0 %v6003_v55  ;;  %4461 = vmatprep.subr.bf16.mxu1 %v7252_v48  ;;  %v6175_v61 = vpack.c.bf16 %v623_v51, %v620_v49  ;;  %v641_v51 = vld [vmem:[%s7243_s4 + $0x138] sm:$0xff] }
  0x41   :  { %387 = vmatmul.mubr.f32.gmra.mrb[14].mxu1 %v6003_v55  ;;  %4407 = vmatpush1.bf16.msra.mxu0 %v4406_v57  ;;  %v627_v57 = vld [vmem:[%s7243_s4 + $0xc8] sm:$0xff] }
  0x42   :  { %4463 = vmatpush3.bf16.msra.mxu1 %v6013_v60  ;;  %457 = vmatprep.mubr.f32.mxu0 %v7250_v3  ;;  %v6189_v5 = vpack.c.bf16 %v630_v58, %v627_v57  ;;  %v645_v57 = vld [vmem:[%s7243_s4 + $0x158] sm:$0xff]  ;;  %v648_v58 = vld [vmem:[%s7243_s4 + $0x170] sm:$0xff] }
  0x43   :  { %4409 = vmatprep.subr.bf16.mxu0 %v6022_v63  ;;  %3784 = vmatprep.mubr.msk.f32.mxu1 %vm5517_vm0, %v7250_v3 }
  0x44   :  { %458 = vmatmul.mubr.f32.vlgmr.msra.gmra.mrb[16].mxu0 %v5789_v43  ;;  %4465 = vmatprep.subr.bf16.mxu1 %v6035_v6  ;;  %v6097_v43 = vpack.c.bf16 %v611_v20, %v608_v17  ;;  %v6209_v17 = vpack.c.bf16 %v581_v1, %v578_v62  ;;  %v6213_v20 = vpack.c.bf16 %v629_v7, %v626_v4  ;;  %v596_v4 = vld [vmem:[%s7241_s3 + $0x150] sm:$0xff]  ;;  %v599_v7 = vld [vmem:[%s7241_s3 + $0x168] sm:$0xff] }
  0x45   :  { %4411 = vmatpush1.bf16.msra.mxu0 %v6047_v10  ;;  %3785 = vmatmul.mubr.f32.vlgmr.msra.gmra.mrb[16].mxu1 %v6052_v12  ;;  %v6285_v62 = vpack.c.bf16 %v593_v46, %v590_v39  ;;  %v6289_v1 = vpack.c.bf16 %v641_v51, %v638_v47  ;;  %v6311_v16 = vpack.c.bf16 %v599_v7, %v596_v4  ;;  %v622_v46 = vld [vmem:[%s7243_s4 + $0xa0] sm:$0xff]  ;;  %v625_v47 = vld [vmem:[%s7243_s4 + $0xb8] sm:$0xff] }
  0x46   :  { %4467 = vmatpush1.bf16.msra.mxu1 %v6056_v14  ;;  %463 = vmatprep.mubr.f32.mxu0 %v7250_v3  ;;  %7311 = vst [vmem:[#allocation15_spill] sm:$0xff] %v6209_v17  ;;  %v6374_v51 = vpack.c.bf16 %v625_v47, %v622_v46  ;;  %v637_v4 = vld [vmem:[%s7243_s4 + $0x118] sm:$0xff]  ;;  %v6455_v47 = vld [vmem:[%s7245_s5] sm:$0x3f] }
  0x47   :  { %4413 = vmatprep.subr.bf16.mxu0 %v6070_v18  ;;  %4469 = vmatprep.subr.bf16.mxu1 %v6072_v19  ;;  %7315 = vst [vmem:[#allocation19_spill] sm:$0xff] %v6285_v62  ;;  %7317 = vst [vmem:[#allocation21_spill] sm:$0xff] %v6311_v16 }
  0x48   :  { %464 = vmatmul.mubr.f32.gmra.mrb[18].mxu0 %v5817_v54  ;;  %925 = vmatprep.mubr.f32.mxu1 %v7250_v3  ;;  %v6137_v54 = vpack.c.bf16 %v617_v35, %v614_v32  ;;  %v594_v32 = vld [vmem:[%s7241_s3 + $0x140] sm:$0xff]  ;;  %v639_v35 = vld [vmem:[%s7243_s4 + $0x128] sm:$0xff] }
  0x49   :  { %4415 = vmatpush1.bf16.msra.mxu0 %v6093_v27  ;;  %469 = vmatprep.mubr.f32.mxu0 %v7250_v3  ;;  %v6265_v49 = vpack.c.bf16 %v642_v36, %v639_v35  ;;  %v616_v35 = vld [vmem:[%s7243_s4 + $0x70] sm:$0xff]  ;;  %v619_v36 = vld [vmem:[%s7243_s4 + $0x88] sm:$0xff] }
  0x4a   :  { %4471 = vmatpush1.bf16.msra.mxu1 %v6097_v43  ;;  %4417 = vmatprep.subr.bf16.mxu0 %v6099_v28  ;;  %v6362_v39 = vpack.c.bf16 %v619_v36, %v616_v35  ;;  %v137_v35 = vlaneseq }
  0x4b   :  { %4473 = vmatprep.subr.bf16.mxu1 %v6112_v34 }
  0x4c   :  { %470 = vmatmul.mubr.f32.gmra.mrb[20].mxu0 %v5848_v0  ;;  %v6177_v0 = vpack.c.bf16 %v582_v53, %v579_v52  ;;  %v597_v52 = vld [vmem:[%s7241_s3 + $0x158] sm:$0xff]  ;;  %v600_v53 = vld [vmem:[%s7241_s3 + $0x170] sm:$0xff]  ;;  %v6449_v36 = vshrl.u32 %v137_v35, 7 }
  0x4d   :  { %4419 = vmatpush1.bf16.msra.mxu0 %v6133_v40  ;;  %475 = vmatprep.mubr.f32.mxu0 %v7250_v3 }
  0x4e   :  { %4475 = vmatpush1.bf16.msra.mxu1 %v6137_v54  ;;  %4421 = vmatprep.subr.bf16.mxu0 %v6139_v42  ;;  %7310 = vst [vmem:[#allocation14_spill] sm:$0xff] %v6177_v0  ;;  %v151_v46 = vsub.s32 3, %v6449_v36 }
  0x4f   :  { %4477 = vmatprep.subr.bf16.mxu1 %v6151_v50 }
  0x50   :  { %476 = vmatmul.mubr.f32.gmra.mrb[22].mxu0 %v5879_v11  ;;  %v6215_v11 = vpack.c.bf16 %v588_v9, %v585_v8  ;;  %v6300_v8 = vpack.c.bf16 %v648_v58, %v645_v57  ;;  %v644_v9 = vld [vmem:[%s7243_s4 + $0x150] sm:$0xff]  ;;  %v634_v58 = vld [vmem:[%s7243_s4 + $0x100] sm:$0xff] }
  0x51   :  { %4423 = vmatpush1.bf16.msra.mxu0 %v6171_v59  ;;  %481 = vmatprep.mubr.f32.mxu0 %v7250_v3  ;;  %v6315_v22 = vpack.c.bf16 %v647_v15, %v644_v9  ;;  %v6398_v7 = vpack.c.bf16 %v637_v4, %v634_v58  ;;  %v640_v9 = vld [vmem:[%s7243_s4 + $0x130] sm:$0xff]  ;;  %v643_v15 = vld [vmem:[%s7243_s4 + $0x148] sm:$0xff] }
  0x52   :  { %4479 = vmatpush1.bf16.msra.mxu1 %v6175_v61  ;;  %4425 = vmatprep.subr.bf16.mxu0 %v6177_v0  ;;  %7312 = vst [vmem:[#allocation16_spill] sm:$0xff] %v6215_v11 }
  0x53   :  { %4481 = vmatprep.subr.bf16.mxu1 %v6189_v5 }
  0x54   :  { %482 = vmatmul.mubr.f32.gmra.mrb[24].mxu0 %v5910_v21  ;;  %v6253_v21 = vpack.c.bf16 %v594_v32, %v591_v30  ;;  %v610_v30 = vld [vmem:[%s7243_s4 + $0x40] sm:$0xff] }
  0x55   :  { %4427 = vmatpush1.bf16.msra.mxu0 %v6209_v17  ;;  %487 = vmatprep.mubr.f32.mxu0 %v7250_v3 }
  0x56   :  { %4483 = vmatpush1.bf16.msra.mxu1 %v6213_v20  ;;  %4429 = vmatprep.subr.bf16.mxu0 %v6215_v11  ;;  %7314 = vst [vmem:[#allocation18_spill] sm:$0xff] %v6253_v21 }
  0x57   :  { %4485 = vmatprep.subr.bf16.mxu1 %v6227_v26 }
  0x58   :  { %488 = vmatmul.mubr.f32.gmra.mrb[26].mxu0 %v5941_v31  ;;  %v6291_v31 = vpack.c.bf16 %v600_v53, %v597_v52  ;;  %v628_v52 = vld [vmem:[%s7243_s4 + $0xd0] sm:$0xff]  ;;  %v631_v53 = vld [vmem:[%s7243_s4 + $0xe8] sm:$0xff] }
  0x59   :  { %4431 = vmatpush1.bf16.msra.mxu0 %v6247_v37  ;;  %493 = vmatprep.mubr.f32.mxu0 %v7250_v3  ;;  %v6386_v57 = vpack.c.bf16 %v631_v53, %v628_v52  ;;  %v6458_v52 = vrot.slane %v6455_v47, %v151_v46  ;;  %v6461_v53 = vsub.s32 2, %v6449_v36 }
  0x5a   :  { %4487 = vmatpush1.bf16.msra.mxu1 %v6251_v38  ;;  %4433 = vmatprep.subr.bf16.mxu0 %v6253_v21  ;;  %7316 = vst [vmem:[#allocation20_spill] sm:$0xff] %v6291_v31 }
  0x5b   :  { %4489 = vmatprep.subr.bf16.mxu1 %v6265_v49 }
  0x5c   :  { %494 = vmatmul.mubr.f32.gmra.mrb[28].mxu0 %v5972_v41  ;;  %v607_v41 = vld [vmem:[%s7243_s4 + $0x28] sm:$0xff] }
  0x5d   :  { %4435 = vmatpush1.bf16.msra.mxu0 %v6285_v62  ;;  %499 = vmatprep.mubr.f32.mxu0 %v7250_v3  ;;  %v6327_v25 = vpack.c.bf16 %v607_v41, %v604_v24  ;;  %v6410_v24 = vpack.c.bf16 %v643_v15, %v640_v9  ;;  %v646_v41 = vld [vmem:[%s7243_s4 + $0x160] sm:$0xff]  ;;  %v6470_v15 = vrot.slane %v6455_v47, %v6461_v53 }
  0x5e   :  { %4491 = vmatpush1.bf16.msra.mxu1 %v6289_v1  ;;  %4437 = vmatprep.subr.bf16.mxu0 %v6291_v31 }
  0x5f   :  { %4493 = vmatprep.subr.bf16.mxu1 %v6300_v8 }
  0x60   :  { %500 = vmatmul.mubr.f32.gmra.mrb[30].mxu0 %v6003_v55  ;;  %v613_v55 = vld [vmem:[%s7243_s4 + $0x58] sm:$0xff] }
  0x61   :  { %4439 = vmatpush1.bf16.msra.mxu0 %v6311_v16  ;;  %757 = vmatprep.mubr.f32.mxu0 %v7250_v3  ;;  %v6346_v32 = vpack.c.bf16 %v613_v55, %v610_v30  ;;  %v649_v30 = vld [vmem:[%s7243_s4 + $0x178] sm:$0xff] }
  0x62   :  { %4495 = vmatpush1.bf16.msra.mxu1 %v6315_v22  ;;  %4496 = vmatprep.subr.bf16.mxu0 %v7252_v48  ;;  %v6422_v55 = vpack.c.bf16 %v649_v30, %v646_v41 }
  0x63   :  { %4552 = vmatprep.subr.bf16.mxu1 %v7252_v48 }
  0x64   :  { %758 = vmatmul.mubr.f32.vlgmr.msra.gmra.mrb[0].mxu0 %v6052_v12 }
  0x65   :  { %926 = vmatmul.mubr.f32.vlgmr.msra.gmra.mrb[18].mxu1 %v6333_v29  ;;  %4498 = vmatpush3.bf16.msra.mxu0 %v6327_v25 }
  0x66   :  { %4499 = vmatprep.subr.bf16.mxu0 %v7252_v48  ;;  %3819 = vmatprep.mubr.msk.f32.mxu0 %vm5517_vm0, %v7250_v3 }
  0x67   :  { %4554 = vmatpush3.bf16.msra.mxu1 %v5791_v45  ;;  %3854 = vmatprep.mubr.msk.f32.mxu1 %vm5517_vm0, %v7250_v3 }
  0x68   :  { %4555 = vmatprep.subr.bf16.mxu1 %v7252_v48 }
  0x69   :  { %4501 = vmatpush3.bf16.msra.mxu0 %v6346_v32 }
  0x6a   :  { %4502 = vmatprep.subr.bf16.mxu0 %v7252_v48 }
  0x6b   :  { %4557 = vmatpush3.bf16.msra.mxu1 %v5821_v56 }
  0x6c   :  { %4558 = vmatprep.subr.bf16.mxu1 %v7252_v48 }
  0x6d   :  { %4504 = vmatpush3.bf16.msra.mxu0 %v6362_v39 }
  0x6e   :  { %4505 = vmatprep.subr.bf16.mxu0 %v7252_v48 }
  0x6f   :  { %4560 = vmatpush3.bf16.msra.mxu1 %v5852_v2 }
  0x70   :  { %4561 = vmatprep.subr.bf16.mxu1 %v7252_v48 }
  0x71   :  { %4507 = vmatpush3.bf16.msra.mxu0 %v6374_v51 }
  0x72   :  { %4508 = vmatprep.subr.bf16.mxu0 %v7252_v48 }
  0x73   :  { %4563 = vmatpush3.bf16.msra.mxu1 %v5883_v13 }
  0x74   :  { %4564 = vmatprep.subr.bf16.mxu1 %v7252_v48 }
  0x75   :  { %4510 = vmatpush3.bf16.msra.mxu0 %v6386_v57 }
  0x76   :  { %4511 = vmatprep.subr.bf16.mxu0 %v7252_v48 }
  0x77   :  { %4566 = vmatpush3.bf16.msra.mxu1 %v5914_v23 }
  0x78   :  { %4567 = vmatprep.subr.bf16.mxu1 %v7252_v48 }
  0x79   :  { %4513 = vmatpush3.bf16.msra.mxu0 %v6398_v7 }
  0x7a   :  { %4514 = vmatprep.subr.bf16.mxu0 %v7252_v48 }
  0x7b   :  { %4569 = vmatpush3.bf16.msra.mxu1 %v5945_v33 }
  0x7c   :  { %4570 = vmatprep.subr.bf16.mxu1 %v7252_v48 }
  0x7d   :  { %4516 = vmatpush3.bf16.msra.mxu0 %v6410_v24 }
  0x7e   :  { %4517 = vmatprep.subr.bf16.mxu0 %v7252_v48 }
  0x7f   :  { %4572 = vmatpush3.bf16.msra.mxu1 %v5976_v44 }
  0x80   :  { %4573 = vmatprep.subr.bf16.mxu1 %v7252_v48 }
  0x81   :  { %4519 = vmatpush3.bf16.msra.mxu0 %v6422_v55 }
  0x82   :  { %4521 = vmatprep.subr.bf16.mxu0 %v6022_v63 }
  0x83   :  { %4575 = vmatpush3.bf16.msra.mxu1 %v6013_v60 }
  0x84   :  { %3820 = vmatmul.mubr.f32.vlgmr.msra.gmra.mrb[32].mxu0 %v6333_v29  ;;  %4577 = vmatprep.subr.bf16.mxu1 %v6035_v6 }
  0x85   :  { %4523 = vmatpush1.bf16.msra.mxu0 %v6047_v10  ;;  %1096 = vmatprep.mubr.f32.mxu0 %v7250_v3 }
  0x86   :  { %4525 = vmatprep.subr.bf16.mxu0 %v6070_v18 }
  0x89   :  { %4527 = vmatpush1.bf16.msra.mxu0 %v6093_v27 }
  0x8a   :  { %4529 = vmatprep.subr.bf16.mxu0 %v6099_v28 }
  0x8d   :  { %4531 = vmatpush1.bf16.msra.mxu0 %v6133_v40 }
  0x8e   :  { %4533 = vmatprep.subr.bf16.mxu0 %v6139_v42 }
  0x91   :  { %4535 = vmatpush1.bf16.msra.mxu0 %v6171_v59 }
  0x92   :  { %4537 = vmatprep.subr.bf16.mxu0 %v6177_v0 }
  0x95   :  { %4539 = vmatpush1.bf16.msra.mxu0 %v6209_v17 }
  0x96   :  { %4541 = vmatprep.subr.bf16.mxu0 %v6215_v11 }
  0x99   :  { %4543 = vmatpush1.bf16.msra.mxu0 %v6247_v37 }
  0x9a   :  { %4545 = vmatprep.subr.bf16.mxu0 %v6253_v21 }
  0x9d   :  { %4547 = vmatpush1.bf16.msra.mxu0 %v6285_v62 }
  0x9e   :  { %4549 = vmatprep.subr.bf16.mxu0 %v6291_v31 }
  0xa1   :  { %4551 = vmatpush1.bf16.msra.mxu0 %v6311_v16 }
  0xa2   :  { %4608 = vmatprep.subr.bf16.mxu0 %v7252_v48 }
  0xf8   :  { %v6463_v58 = vpop.f32.mrb[0].mxu1 }
  0xf9   :  { %v348_v4 = vpop.f32.mrb[1].mxu1 }
  0xfa   :  { %v6466_v9 = vadd.f32 %v348_v4, %v6458_v52 }
  0xfc   :  { %7318 = vst [vmem:[#allocation22_spill] sm:$0xff] %v6466_v9  ;;  %v352_v41 = vpop.f32.mrb[2].mxu1 }
  0xfd   :  { %v6473_v30 = vadd.f32 %v352_v41, %v6470_v15  ;;  %v354_v35 = vpop.f32.mrb[3].mxu1 }
  0xfe   :  { %v6476_v46 = vadd.f32 %v354_v35, %v6458_v52 }
  0xff   :  { %7319 = vst [vmem:[#allocation23_spill] sm:$0xff] %v6473_v30 }
 0x100   :  { %7320 = vst [vmem:[#allocation24_spill] sm:$0xff] %v6476_v46  ;;  %v358_v3 = vpop.f32.mrb[4].mxu1 }
 0x101   :  { %v6479_v48 = vadd.f32 %v358_v3, %v6470_v15  ;;  %v360_v6 = vpop.f32.mrb[5].mxu1 }
 0x102   :  { %v6482_v4 = vadd.f32 %v360_v6, %v6458_v52 }
 0x103   :  { %7321 = vst [vmem:[#allocation25_spill] sm:$0xff] %v6479_v48 }
 0x104   :  { %7322 = vst [vmem:[#allocation26_spill] sm:$0xff] %v6482_v4  ;;  %v364_v9 = vpop.f32.mrb[6].mxu1 }
 0x105   :  { %v6485_v60 = vadd.f32 %v364_v9, %v6470_v15  ;;  %v366_v16 = vpop.f32.mrb[7].mxu1 }
 0x106   :  { %v6488_v41 = vadd.f32 %v366_v16, %v6458_v52 }
 0x107   :  { %7323 = vst [vmem:[#allocation27_spill] sm:$0xff] %v6485_v60  ;;  %v155_v60 = vsub.s32 4, %v6449_v36 }
 0x108   :  { %7324 = vst [vmem:[#allocation28_spill] sm:$0xff] %v6488_v41  ;;  %v370_v30 = vpop.f32.mrb[8].mxu1  ;;  %v159_v41 = vsub.s32 5, %v6449_v36 }
 0x109   :  { %v6491_v35 = vadd.f32 %v370_v30, %v6470_v15  ;;  %v372_v46 = vpop.f32.mrb[9].mxu1 }
 0x10a   :  { %v6494_v3 = vadd.f32 %v372_v46, %v6458_v52 }
 0x10b   :  { %7325 = vst [vmem:[#allocation29_spill] sm:$0xff] %v6491_v35 }
 0x10c   :  { %7326 = vst [vmem:[#allocation30_spill] sm:$0xff] %v6494_v3  ;;  %v376_v48 = vpop.f32.mrb[10].mxu1  ;;  %v156_v3 = vrot.slane %v6455_v47, %v155_v60 }
 0x10d   :  { %v6497_v6 = vadd.f32 %v376_v48, %v6470_v15  ;;  %v378_v4 = vpop.f32.mrb[11].mxu1 }
 0x10e   :  { %v6500_v9 = vadd.f32 %v378_v4, %v6458_v52 }
 0x10f   :  { %7327 = vst [vmem:[#allocation31_spill] sm:$0xff] %v6497_v6  ;;  %v6512_v6 = vrot.slane %v6455_v47, %v159_v41 }
 0x110   :  { %7328 = vst [vmem:[#allocation32_spill] sm:$0xff] %v6500_v9  ;;  %v382_v16 = vpop.f32.mrb[12].mxu1 }
 0x111   :  { %v6505_v30 = vadd.f32 %v382_v16, %v6470_v15  ;;  %v384_v35 = vpop.f32.mrb[13].mxu1 }
 0x112   :  { %v6508_v46 = vadd.f32 %v384_v35, %v6458_v52 }
 0x113   :  { %7329 = vst [vmem:[#allocation33_spill] sm:$0xff] %v6505_v30 }
 0x114   :  { %7330 = vst [vmem:[#allocation34_spill] sm:$0xff] %v6508_v46  ;;  %v388_v48 = vpop.f32.mrb[14].mxu1 }
 0x115   :  { %v6515_v4 = vadd.f32 %v388_v48, %v6470_v15  ;;  %v390_v9 = vpop.f32.mrb[15].mxu1 }
 0x116   :  { %v391_v13 = vadd.f32 %v390_v9, %v6458_v52 }
 0x117   :  { %7331 = vst [vmem:[#allocation35_spill] sm:$0xff] %v6515_v4  ;;  %v459_v31 = vpop.f32.mrb[16].mxu0 }
 0x118   :  { %v6517_v44 = vadd.f32 %v459_v31, %v156_v3  ;;  %v461_v62 = vpop.f32.mrb[17].mxu0  ;;  %v6519_v16 = vpop.f32.mrb[16].mxu1 }
 0x119   :  { %v6522_v30 = vadd.f32 %v461_v62, %v6512_v6  ;;  %v3786_v35 = vpop.f32.mrb[17].mxu1 }
 0x11a   :  { %7332 = vst [vmem:[#allocation36_spill] sm:$0xff] %v6517_v44 }
 0x11b   :  { %7333 = vst [vmem:[#allocation37_spill] sm:$0xff] %v6522_v30  ;;  %v465_v46 = vpop.f32.mrb[18].mxu0 }
 0x11c   :  { %v6524_v60 = vadd.f32 %v465_v46, %v156_v3  ;;  %v467_v21 = vpop.f32.mrb[19].mxu0 }
 0x11d   :  { %v6527_v41 = vadd.f32 %v467_v21, %v6512_v6 }
 0x11e   :  { %7334 = vst [vmem:[#allocation38_spill] sm:$0xff] %v6524_v60 }
 0x11f   :  { %7335 = vst [vmem:[#allocation39_spill] sm:$0xff] %v6527_v41  ;;  %v471_v48 = vpop.f32.mrb[20].mxu0 }
 0x120   :  { %v6529_v4 = vadd.f32 %v471_v48, %v156_v3  ;;  %v473_v33 = vpop.f32.mrb[21].mxu0 }
 0x121   :  { %v6532_v31 = vadd.f32 %v473_v33, %v6512_v6  ;;  %v139_v33 = vsub.s32 0, %v6449_v36 }
 0x122   :  { %7336 = vst [vmem:[#allocation40_spill] sm:$0xff] %v6529_v4 }
 0x123   :  { %7337 = vst [vmem:[#allocation41_spill] sm:$0xff] %v6532_v31  ;;  %v477_v44 = vpop.f32.mrb[22].mxu0 }
 0x124   :  { %v6534_v37 = vadd.f32 %v477_v44, %v156_v3  ;;  %v479_v62 = vpop.f32.mrb[23].mxu0 }
 0x125   :  { %v6537_v35 = vadd.f32 %v479_v62, %v6512_v6  ;;  %v650_v62 = vld [vmem:[%s7246_s6] sm:$0x7] }
 0x126   :  { %7338 = vst [vmem:[#allocation42_spill] sm:$0xff] %v6534_v37  ;;  %v140_v37 = vrot.slane %v6455_v47, %v139_v33 }
 0x127   :  { %7339 = vst [vmem:[#allocation43_spill] sm:$0xff] %v6537_v35  ;;  %v483_v46 = vpop.f32.mrb[24].mxu0 }
 0x128   :  { %v6539_v30 = vadd.f32 %v483_v46, %v156_v3  ;;  %v485_v60 = vpop.f32.mrb[25].mxu0  ;;  %v143_v46 = vsub.s32 1, %v6449_v36 }
 0x129   :  { %v6542_v21 = vadd.f32 %v485_v60, %v6512_v6 }
 0x12a   :  { %7340 = vst [vmem:[#allocation44_spill] sm:$0xff] %v6539_v30 }
 0x12b   :  { %7341 = vst [vmem:[#allocation45_spill] sm:$0xff] %v6542_v21  ;;  %v489_v48 = vpop.f32.mrb[26].mxu0 }
 0x12c   :  { %v6544_v41 = vadd.f32 %v489_v48, %v156_v3  ;;  %v491_v4 = vpop.f32.mrb[27].mxu0  ;;  %v655_v48 = vrot.slane %v650_v62, %v139_v33 }
 0x12d   :  { %v6548_v44 = vadd.f32 %v491_v4, %v6512_v6  ;;  %v667_v4 = vld [vmem:[%s7247_s7] sm:$0x7] }
 0x12e   :  { %7342 = vst [vmem:[#allocation46_spill] sm:$0xff] %v6544_v41  ;;  %v659_v41 = vrot.slane %v650_v62, %v143_v46  ;;  %v6564_v23 = vadd.f32 %v655_v48, %v140_v37  ;;  %v6566_v36 = vrot.slane %v667_v4, %v139_v33 }
 0x12f   :  { %7343 = vst [vmem:[#allocation47_spill] sm:$0xff] %v6548_v44  ;;  %v495_v31 = vpop.f32.mrb[28].mxu0  ;;  %v144_v44 = vrot.slane %v6455_v47, %v143_v46 }
 0x130   :  { %v6554_v35 = vadd.f32 %v495_v31, %v156_v3  ;;  %v497_v60 = vpop.f32.mrb[29].mxu0  ;;  %7346 = vst [vmem:[#allocation50_spill] sm:$0xff] %v6564_v23  ;;  %v6568_v31 = vrot.slane %v667_v4, %v143_v46 }
 0x131   :  { %v6558_v21 = vadd.f32 %v497_v60, %v6512_v6  ;;  %v6570_v17 = vadd.f32 %v659_v41, %v144_v44 }
 0x132   :  { %7344 = vst [vmem:[#allocation48_spill] sm:$0xff] %v6554_v35 }
 0x133   :  { %7345 = vst [vmem:[#allocation49_spill] sm:$0xff] %v6558_v21  ;;  %v501_v30 = vpop.f32.mrb[30].mxu0  ;;  %7347 = vst [vmem:[#allocation51_spill] sm:$0xff] %v6570_v17 }
 0x134   :  { %v503_v11 = vpop.f32.mrb[31].mxu0  ;;  %v502_v42 = vadd.f32 %v501_v30, %v156_v3  ;;  %v6578_v30 = vrot.slane %v650_v62, %v6461_v53 }
 0x136   :  { %7348 = vst [vmem:[#allocation52_spill] sm:$0xff] %v6578_v30 }
 0x137   :  { %v759_v35 = vpop.f32.mrb[0].mxu0 }
 0x138   :  { %v5305_v60 = vadd.f32 %v6564_v23, %v759_v35  ;;  %v927_v21 = vpop.f32.mrb[18].mxu1  ;;  %v761_v0 = vpop.f32.mrb[1].mxu0 }
 0x139   :  { %v928_v59 = vadd.f32 %v927_v21, %v6566_v36  ;;  %v929_v47 = vpop.f32.mrb[19].mxu1  ;;  %v5307_v46 = vadd.f32 %v6570_v17, %v761_v0  ;;  %v347_v0 = vadd.f32 %v6463_v58, %v6470_v15 }
 0x13a   :  { %v3440_v2 = vmul.f32 -1.442695, %v5305_v60  ;;  %v930_v37 = vadd.f32 %v929_v47, %v6568_v31 }
 0x13b   :  { %v1002_v33 = vadd.f32 %v928_v59, %v391_v13  ;;  %v3441_v44 = vmul.f32 -1.442695, %v5307_v46  ;;  %v504_v46 = vadd.f32 %v503_v11, %v6512_v6 }
 0x13c   :  { %5355 = vpow2.f32 %v3440_v2  ;;  %v1009_v48 = vadd.f32 %v930_v37, %v502_v42  ;;  %v831_v2 = vadd.f32 %v6519_v16, %v6578_v30 }
 0x13d   :  { %v3442_v41 = vmul.f32 -1.442695, %v1002_v33 }
 0x13e   :  { %v3443_v35 = vmul.f32 -1.442695, %v1009_v48 }
 0x13f   :  { %5357 = vpow2.f32 %v3442_v41 }
 0x140   :  { %5359 = vpow2.f32 %v3441_v44 }
 0x141   :  { %5361 = vpow2.f32 %v3443_v35 }
 0x146   :  { %v5356_v23 = vpop.eup %5355 }
 0x147   :  { %v838_v40 = vadd.f32 1.0, %v5356_v23  ;;  %v6585_v23 = vrot.slane %v667_v4, %v6461_v53 }
 0x149   :  { %v5358_v52 = vpop.eup %5357  ;;  %5363 = vrcp.f32 %v838_v40 }
 0x14a   :  { %v1006_v9 = vadd.f32 1.0, %v5358_v52  ;;  %v5360_v3 = vpop.eup %5359 }
 0x14b   :  { %v845_v13 = vadd.f32 1.0, %v5360_v3  ;;  %v5362_v59 = vpop.eup %5361  ;;  %v7350_v3 = vmov 0.0  }
 0x14c   :  { %5365 = vrcp.f32 %v1006_v9  ;;  %v1013_v60 = vadd.f32 1.0, %v5362_v59  ;;  %v7353_v59 = vld [vmem:[#allocation4_spill] sm:$0xff] }
 0x14d   :  { %5367 = vrcp.f32 %v845_v13 }
 0x153   :  { %v5364_v42 = vpop.eup %5363 }
 0x154   :  { %v848_v21 = vmul.f32 %v5364_v42, %v831_v2  ;;  %v7354_v2 = vld [vmem:[#allocation12_spill] sm:$0xff]  ;;  %v7355_v42 = vld [vmem:[#allocation13_spill] sm:$0xff] }
 0x156   :  { %v849_v40 = vadd.f32 %v848_v21, %v347_v0  ;;  %v5366_v33 = vpop.eup %5365  ;;  %v7356_v0 = vld [vmem:[#allocation5_spill] sm:$0xff]  ;;  %v7357_v21 = vld [vmem:[#allocation14_spill] sm:$0xff] }
 0x157   :  { %v998_v47 = vpop.f32.mrb[32].mxu0  ;;  %v5368_v41 = vpop.eup %5367 }
 0x158   :  { %5369 = vtanh.f32 %v849_v40  ;;  %v999_v62 = vadd.f32 %v998_v47, %v6585_v23  ;;  %v3821_v37 = vpop.f32.mrb[33].mxu0  ;;  %v851_v58 = vsub.f32 1.0, %v5368_v41  ;;  %v853_v53 = vmul.f32 %v5368_v41, %v6052_v12  ;;  %v7358_v40 = vld [vmem:[#allocation15_spill] sm:$0xff]  ;;  %v7360_v47 = vld [vmem:[#allocation16_spill] sm:$0xff]  ;;  %v7367_v41 = vld [vmem:[#allocation21_spill] sm:$0xff] }
 0x159   :  { %5371 = vrcp.f32 %v1013_v60  ;;  %v7349_v12 = vmov 0.0|0.0   ;;  %v7359_v60 = vld [vmem:[#allocation6_spill] sm:$0xff]  ;;  %v7362_v37 = vld [vmem:[#allocation7_spill] sm:$0xff] }
 0x15a   :  { %v1016_v16 = vmul.f32 %v5366_v33, %v999_v62  ;;  %v7361_v62 = vld [vmem:[#allocation17_spill] sm:$0xff]  ;;  %v7363_v33 = vld [vmem:[#allocation18_spill] sm:$0xff] }
 0x15c   :  { %v1017_v48 = vadd.f32 %v1016_v16, %v504_v46  ;;  %v7364_v46 = vld [vmem:[#allocation19_spill] sm:$0xff]  ;;  %v7365_v16 = vld [vmem:[#allocation8_spill] sm:$0xff] }
 0x15e   :  { %5373 = vtanh.f32 %v1017_v48  ;;  %v7366_v48 = vld [vmem:[#allocation20_spill] sm:$0xff] }
 0x162   :  { %v5370_v15 = vpop.eup %5369 }
 0x163   :  { %v852_v44 = vmul.f32 %v5370_v15, %v851_v58  ;;  %v5372_v4 = vpop.eup %5371  ;;  %v7368_v58 = vld [vmem:[#allocation9_spill] sm:$0xff]  ;;  %v7369_v15 = vld [vmem:[#allocation10_spill] sm:$0xff] }
 0x164   :  { %v1019_v11 = vsub.f32 1.0, %v5372_v4  ;;  %v1021_v9 = vmul.f32 %v5372_v4, %v6333_v29  ;;  %v7352_v29 = vld [vmem:[#allocation11_spill] sm:$0xff]  ;;  %v7370_v4 = vld [vmem:[#allocation50_spill] sm:$0xff] }
 0x165   :  { %v6590_v35 = vadd.f32 %v853_v53, %v852_v44 }
 0x167   :  { %1023 = vst [vmem:[%s7248_s8] sm:$0xff] %v6590_v35  ;;  %1097 = vmatmul.mubr.f32.vlgmr.msra.gmra.mrb[2].mxu0 %v6590_v35  ;;  %3855 = vmatmul.mubr.f32.vlgmr.msra.gmra.mrb[20].mxu1 %v6590_v35 }
 0x168   :  { %v5374_v6 = vpop.eup %5373  ;;  %4579 = vmatpush1.bf16.msra.mxu1 %v6056_v14  ;;  %4610 = vmatpush3.bf16.msra.mxu0 %v6327_v25 }
 0x169   :  { %4581 = vmatprep.subr.bf16.mxu1 %v6072_v19  ;;  %4611 = vmatprep.subr.bf16.mxu0 %v7349_v12  ;;  %v1020_v52 = vmul.f32 %v5374_v6, %v1019_v11 }
 0x16a   :  { %1264 = vmatprep.mubr.f32.mxu1 %v7350_v3  ;;  %3889 = vmatprep.mubr.msk.f32.mxu0 %vm5517_vm0, %v7350_v3 }
 0x16b   :  { %v6606_v13 = vadd.f32 %v1021_v9, %v1020_v52 }
 0x16c   :  { %4583 = vmatpush1.bf16.msra.mxu1 %v6097_v43  ;;  %4613 = vmatpush3.bf16.msra.mxu0 %v6346_v32 }
 0x16d   :  { %7351 = vst [vmem:[#allocation53_spill] sm:$0xff] %v6606_v13  ;;  %4585 = vmatprep.subr.bf16.mxu1 %v6112_v34  ;;  %4614 = vmatprep.subr.bf16.mxu0 %v7349_v12 }
 0x170   :  { %4587 = vmatpush1.bf16.msra.mxu1 %v6137_v54  ;;  %4616 = vmatpush3.bf16.msra.mxu0 %v6362_v39 }
 0x171   :  { %4589 = vmatprep.subr.bf16.mxu1 %v6151_v50  ;;  %4617 = vmatprep.subr.bf16.mxu0 %v7349_v12 }
 0x174   :  { %4591 = vmatpush1.bf16.msra.mxu1 %v6175_v61  ;;  %4619 = vmatpush3.bf16.msra.mxu0 %v6374_v51 }
 0x175   :  { %4593 = vmatprep.subr.bf16.mxu1 %v6189_v5  ;;  %4620 = vmatprep.subr.bf16.mxu0 %v7349_v12 }
 0x178   :  { %4595 = vmatpush1.bf16.msra.mxu1 %v6213_v20  ;;  %4622 = vmatpush3.bf16.msra.mxu0 %v6386_v57 }
 0x179   :  { %4597 = vmatprep.subr.bf16.mxu1 %v6227_v26  ;;  %4623 = vmatprep.subr.bf16.mxu0 %v7349_v12 }
 0x17c   :  { %4599 = vmatpush1.bf16.msra.mxu1 %v6251_v38  ;;  %4625 = vmatpush3.bf16.msra.mxu0 %v6398_v7 }
 0x17d   :  { %4601 = vmatprep.subr.bf16.mxu1 %v6265_v49  ;;  %4626 = vmatprep.subr.bf16.mxu0 %v7349_v12 }
 0x180   :  { %4603 = vmatpush1.bf16.msra.mxu1 %v6289_v1  ;;  %4628 = vmatpush3.bf16.msra.mxu0 %v6410_v24 }
 0x181   :  { %4605 = vmatprep.subr.bf16.mxu1 %v6300_v8  ;;  %4629 = vmatprep.subr.bf16.mxu0 %v7349_v12 }
 0x184   :  { %4607 = vmatpush1.bf16.msra.mxu1 %v6315_v22  ;;  %4631 = vmatpush3.bf16.msra.mxu0 %v6422_v55 }
 0x185   :  { %4633 = vmatprep.subr.bf16.mxu0 %v6022_v63  ;;  %4664 = vmatprep.subr.bf16.mxu1 %v7349_v12 }
 0x187   :  { %1265 = vmatmul.mubr.f32.vlgmr.msra.gmra.mrb[22].mxu1 %v6606_v13  ;;  %3890 = vmatmul.mubr.f32.vlgmr.msra.gmra.mrb[34].mxu0 %v6606_v13 }
 0x188   :  { %4635 = vmatpush1.bf16.msra.mxu0 %v6047_v10  ;;  %4666 = vmatpush3.bf16.msra.mxu1 %v5791_v45 }
 0x189   :  { %4637 = vmatprep.subr.bf16.mxu0 %v6070_v18  ;;  %4667 = vmatprep.subr.bf16.mxu1 %v7349_v12 }
 0x18a   :  { %1436 = vmatprep.mubr.f32.mxu0 %v7350_v3  ;;  %3924 = vmatprep.mubr.msk.f32.mxu1 %vm5517_vm0, %v7350_v3 }
 0x18c   :  { %4639 = vmatpush1.bf16.msra.mxu0 %v6093_v27  ;;  %4669 = vmatpush3.bf16.msra.mxu1 %v5821_v56 }
 0x18d   :  { %4641 = vmatprep.subr.bf16.mxu0 %v6099_v28  ;;  %4670 = vmatprep.subr.bf16.mxu1 %v7349_v12 }
 0x190   :  { %4643 = vmatpush1.bf16.msra.mxu0 %v7352_v29  ;;  %4672 = vmatpush3.bf16.msra.mxu1 %v7353_v59 }
 0x191   :  { %4645 = vmatprep.subr.bf16.mxu0 %v7354_v2  ;;  %4673 = vmatprep.subr.bf16.mxu1 %v7349_v12 }
 0x194   :  { %4647 = vmatpush1.bf16.msra.mxu0 %v7355_v42  ;;  %4675 = vmatpush3.bf16.msra.mxu1 %v7356_v0 }
 0x195   :  { %4649 = vmatprep.subr.bf16.mxu0 %v7357_v21  ;;  %4676 = vmatprep.subr.bf16.mxu1 %v7349_v12 }
 0x198   :  { %4651 = vmatpush1.bf16.msra.mxu0 %v7358_v40  ;;  %4678 = vmatpush3.bf16.msra.mxu1 %v7359_v60 }
 0x199   :  { %4653 = vmatprep.subr.bf16.mxu0 %v7360_v47  ;;  %4679 = vmatprep.subr.bf16.mxu1 %v7349_v12  ;;  %v7371_v47 = vld [vmem:[#allocation23_spill] sm:$0xff] }
 0x19c   :  { %4655 = vmatpush1.bf16.msra.mxu0 %v7361_v62  ;;  %4681 = vmatpush3.bf16.msra.mxu1 %v7362_v37 }
 0x19d   :  { %4657 = vmatprep.subr.bf16.mxu0 %v7363_v33  ;;  %4682 = vmatprep.subr.bf16.mxu1 %v7349_v12 }
 0x1a0   :  { %4659 = vmatpush1.bf16.msra.mxu0 %v7364_v46  ;;  %4684 = vmatpush3.bf16.msra.mxu1 %v7365_v16 }
 0x1a1   :  { %4661 = vmatprep.subr.bf16.mxu0 %v7366_v48  ;;  %4685 = vmatprep.subr.bf16.mxu1 %v7349_v12 }
 0x1a4   :  { %4663 = vmatpush1.bf16.msra.mxu0 %v7367_v41  ;;  %4687 = vmatpush3.bf16.msra.mxu1 %v7368_v58 }
 0x1a5   :  { %4689 = vmatprep.subr.bf16.mxu1 %v7369_v15  ;;  %4720 = vmatprep.subr.bf16.mxu0 %v7349_v12 }
 0x23a   :  { %v1098_v44 = vpop.f32.mrb[2].mxu0  ;;  %v1169_v53 = vpop.f32.mrb[20].mxu1 }
 0x23b   :  { %v5309_v11 = vadd.f32 %v7370_v4, %v1098_v44  ;;  %v1100_v6 = vpop.f32.mrb[3].mxu0  ;;  %v3856_v52 = vpop.f32.mrb[21].mxu1  ;;  %v1170_v15 = vadd.f32 %v1169_v53, %v6578_v30 }
 0x23c   :  { %v5311_v16 = vadd.f32 %v6570_v17, %v1100_v6 }
 0x23d   :  { %v3444_v9 = vmul.f32 -1.442695, %v5309_v11 }
 0x23e   :  { %v3445_v48 = vmul.f32 -1.442695, %v5311_v16 }
 0x23f   :  { %5375 = vpow2.f32 %v3444_v9  ;;  %v7373_v9 = vld [vmem:[#allocation48_spill] sm:$0xff] }
 0x240   :  { %5377 = vpow2.f32 %v3445_v48 }
 0x249   :  { %v5376_v46 = vpop.eup %5375 }
 0x24a   :  { %v1177_v41 = vadd.f32 1.0, %v5376_v46  ;;  %v5378_v58 = vpop.eup %5377  ;;  %v7372_v46 = vld [vmem:[#allocation34_spill] sm:$0xff] }
 0x24b   :  { %v1184_v33 = vadd.f32 1.0, %v5378_v58 }
 0x24c   :  { %5379 = vrcp.f32 %v1177_v41 }
 0x24d   :  { %5381 = vrcp.f32 %v1184_v33 }
 0x256   :  { %v5380_v37 = vpop.eup %5379 }
 0x257   :  { %v1187_v62 = vmul.f32 %v5380_v37, %v1170_v15  ;;  %v5382_v53 = vpop.eup %5381 }
 0x258   :  { %v1190_v33 = vsub.f32 1.0, %v5382_v53 }
 0x259   :  { %v1188_v44 = vadd.f32 %v1187_v62, %v7371_v47  ;;  %v1192_v62 = vmul.f32 %v5382_v53, %v6590_v35 }
 0x25a   :  { %v1266_v4 = vpop.f32.mrb[22].mxu1  ;;  %v1337_v52 = vpop.f32.mrb[34].mxu0 }
 0x25b   :  { %5383 = vtanh.f32 %v1188_v44  ;;  %v1267_v11 = vadd.f32 %v1266_v4, %v6566_v36  ;;  %v1268_v6 = vpop.f32.mrb[23].mxu1  ;;  %v3891_v16 = vpop.f32.mrb[35].mxu0 }
 0x25c   :  { %v1269_v48 = vadd.f32 %v1268_v6, %v6568_v31  ;;  %v1338_v6 = vadd.f32 %v1337_v52, %v6585_v23 }
 0x25d   :  { %v1341_v41 = vadd.f32 %v1267_v11, %v7372_v46  ;;  %v7374_v46 = vld [vmem:[#allocation49_spill] sm:$0xff] }
 0x25e   :  { %v1348_v58 = vadd.f32 %v1269_v48, %v7373_v9 }
 0x25f   :  { %v3446_v17 = vmul.f32 -1.442695, %v1341_v41 }
 0x260   :  { %v3447_v37 = vmul.f32 -1.442695, %v1348_v58 }
 0x261   :  { %5385 = vpow2.f32 %v3446_v17 }
 0x262   :  { %5387 = vpow2.f32 %v3447_v37 }
 0x265   :  { %v5384_v15 = vpop.eup %5383 }
 0x266   :  { %v1191_v47 = vmul.f32 %v5384_v15, %v1190_v33  ;;  %v7376_v15 = vld [vmem:[#allocation16_spill] sm:$0xff] }
 0x268   :  { %v6682_v44 = vadd.f32 %v1192_v62, %v1191_v47  ;;  %v7377_v47 = vld [vmem:[#allocation17_spill] sm:$0xff]  ;;  %v7378_v62 = vld [vmem:[#allocation7_spill] sm:$0xff] }
 0x26a   :  { %3448 = vst [vmem:[%s7248_s8 + $0x8] sm:$0xff] %v6682_v44  ;;  %1437 = vmatmul.mubr.f32.vlgmr.msra.gmra.mrb[4].mxu0 %v6682_v44  ;;  %3925 = vmatmul.mubr.f32.vlgmr.msra.gmra.mrb[24].mxu1 %v6682_v44 }
 0x26b   :  { %v5386_v4 = vpop.eup %5385  ;;  %4691 = vmatpush1.bf16.msra.mxu1 %v6056_v14  ;;  %4722 = vmatpush3.bf16.msra.mxu0 %v6327_v25 }
 0x26c   :  { %v1345_v17 = vadd.f32 1.0, %v5386_v4  ;;  %4693 = vmatprep.subr.bf16.mxu1 %v6072_v19  ;;  %4723 = vmatprep.subr.bf16.mxu0 %v7349_v12  ;;  %v5388_v35 = vpop.eup %5387  ;;  %v7379_v4 = vld [vmem:[#allocation18_spill] sm:$0xff] }
 0x26d   :  { %1604 = vmatprep.mubr.f32.mxu1 %v7350_v3  ;;  %3959 = vmatprep.mubr.msk.f32.mxu0 %vm5517_vm0, %v7350_v3  ;;  %v1352_v11 = vadd.f32 1.0, %v5388_v35  ;;  %v7381_v35 = vld [vmem:[#allocation8_spill] sm:$0xff] }
 0x26e   :  { %5389 = vrcp.f32 %v1345_v17  ;;  %v7380_v17 = vld [vmem:[#allocation19_spill] sm:$0xff] }
 0x26f   :  { %4695 = vmatpush1.bf16.msra.mxu1 %v6097_v43  ;;  %4725 = vmatpush3.bf16.msra.mxu0 %v6346_v32  ;;  %5391 = vrcp.f32 %v1352_v11  ;;  %v7382_v11 = vld [vmem:[#allocation20_spill] sm:$0xff] }
 0x270   :  { %4697 = vmatprep.subr.bf16.mxu1 %v6112_v34  ;;  %4726 = vmatprep.subr.bf16.mxu0 %v7349_v12 }
 0x273   :  { %4699 = vmatpush1.bf16.msra.mxu1 %v6137_v54  ;;  %4728 = vmatpush3.bf16.msra.mxu0 %v6362_v39 }
 0x274   :  { %4701 = vmatprep.subr.bf16.mxu1 %v6151_v50  ;;  %4729 = vmatprep.subr.bf16.mxu0 %v7349_v12 }
 0x277   :  { %4703 = vmatpush1.bf16.msra.mxu1 %v6175_v61  ;;  %4731 = vmatpush3.bf16.msra.mxu0 %v6374_v51 }
 0x278   :  { %v5390_v16 = vpop.eup %5389  ;;  %4705 = vmatprep.subr.bf16.mxu1 %v6189_v5  ;;  %4732 = vmatprep.subr.bf16.mxu0 %v7349_v12 }
 0x279   :  { %v1355_v48 = vmul.f32 %v5390_v16, %v1338_v6  ;;  %v5392_v52 = vpop.eup %5391  ;;  %v7383_v6 = vld [vmem:[#allocation21_spill] sm:$0xff] }
 0x27a   :  { %v1358_v9 = vsub.f32 1.0, %v5392_v52  ;;  %v1360_v37 = vmul.f32 %v5392_v52, %v6606_v13  ;;  %v7384_v16 = vld [vmem:[#allocation9_spill] sm:$0xff]  ;;  %v7386_v52 = vld [vmem:[#allocation50_spill] sm:$0xff]  ;;  %v7387_v13 = vld [vmem:[#allocation51_spill] sm:$0xff] }
 0x27b   :  { %v1356_v41 = vadd.f32 %v1355_v48, %v7374_v46  ;;  %4707 = vmatpush1.bf16.msra.mxu1 %v6213_v20  ;;  %4734 = vmatpush3.bf16.msra.mxu0 %v6386_v57  ;;  %v7385_v48 = vld [vmem:[#allocation10_spill] sm:$0xff] }
 0x27c   :  { %4709 = vmatprep.subr.bf16.mxu1 %v6227_v26  ;;  %4735 = vmatprep.subr.bf16.mxu0 %v7349_v12 }
 0x27d   :  { %5393 = vtanh.f32 %v1356_v41 }
 0x27f   :  { %4711 = vmatpush1.bf16.msra.mxu1 %v6251_v38  ;;  %4737 = vmatpush3.bf16.msra.mxu0 %v6398_v7 }
 0x280   :  { %4713 = vmatprep.subr.bf16.mxu1 %v6265_v49  ;;  %4738 = vmatprep.subr.bf16.mxu0 %v7349_v12 }
 0x283   :  { %4715 = vmatpush1.bf16.msra.mxu1 %v6289_v1  ;;  %4740 = vmatpush3.bf16.msra.mxu0 %v6410_v24 }
 0x284   :  { %4717 = vmatprep.subr.bf16.mxu1 %v6300_v8  ;;  %4741 = vmatprep.subr.bf16.mxu0 %v7349_v12 }
 0x287   :  { %v5394_v58 = vpop.eup %5393  ;;  %4719 = vmatpush1.bf16.msra.mxu1 %v6315_v22  ;;  %4743 = vmatpush3.bf16.msra.mxu0 %v6422_v55 }
 0x288   :  { %v1359_v53 = vmul.f32 %v5394_v58, %v1358_v9  ;;  %4745 = vmatprep.subr.bf16.mxu0 %v6022_v63  ;;  %4776 = vmatprep.subr.bf16.mxu1 %v7349_v12 }
 0x28a   :  { %v6728_v33 = vadd.f32 %v1360_v37, %v1359_v53 }
 0x28c   :  { %7375 = vst [vmem:[#allocation11_spill] sm:$0xff] %v6728_v33  ;;  %1605 = vmatmul.mubr.f32.vlgmr.msra.gmra.mrb[26].mxu1 %v6728_v33  ;;  %3960 = vmatmul.mubr.f32.vlgmr.msra.gmra.mrb[36].mxu0 %v6728_v33 }
 0x28d   :  { %4747 = vmatpush1.bf16.msra.mxu0 %v6047_v10  ;;  %4778 = vmatpush3.bf16.msra.mxu1 %v5791_v45 }
 0x28e   :  { %4749 = vmatprep.subr.bf16.mxu0 %v6070_v18  ;;  %4779 = vmatprep.subr.bf16.mxu1 %v7349_v12 }
 0x28f   :  { %1776 = vmatprep.mubr.f32.mxu0 %v7350_v3  ;;  %3994 = vmatprep.mubr.msk.f32.mxu1 %vm5517_vm0, %v7350_v3 }
 0x291   :  { %4751 = vmatpush1.bf16.msra.mxu0 %v6093_v27  ;;  %4781 = vmatpush3.bf16.msra.mxu1 %v5821_v56 }
 0x292   :  { %4753 = vmatprep.subr.bf16.mxu0 %v6099_v28  ;;  %4782 = vmatprep.subr.bf16.mxu1 %v7349_v12 }
 0x295   :  { %4755 = vmatpush1.bf16.msra.mxu0 %v7352_v29  ;;  %4784 = vmatpush3.bf16.msra.mxu1 %v7353_v59 }
 0x296   :  { %4757 = vmatprep.subr.bf16.mxu0 %v7354_v2  ;;  %4785 = vmatprep.subr.bf16.mxu1 %v7349_v12 }
 0x299   :  { %4759 = vmatpush1.bf16.msra.mxu0 %v7355_v42  ;;  %4787 = vmatpush3.bf16.msra.mxu1 %v7356_v0 }
 0x29a   :  { %4761 = vmatprep.subr.bf16.mxu0 %v7357_v21  ;;  %4788 = vmatprep.subr.bf16.mxu1 %v7349_v12 }
 0x29d   :  { %4763 = vmatpush1.bf16.msra.mxu0 %v7358_v40  ;;  %4790 = vmatpush3.bf16.msra.mxu1 %v7359_v60 }
 0x29e   :  { %4765 = vmatprep.subr.bf16.mxu0 %v7376_v15  ;;  %4791 = vmatprep.subr.bf16.mxu1 %v7349_v12  ;;  %v7388_v15 = vld [vmem:[#allocation25_spill] sm:$0xff] }
 0x2a1   :  { %4767 = vmatpush1.bf16.msra.mxu0 %v7377_v47  ;;  %4793 = vmatpush3.bf16.msra.mxu1 %v7378_v62 }
 0x2a2   :  { %4769 = vmatprep.subr.bf16.mxu0 %v7379_v4  ;;  %4794 = vmatprep.subr.bf16.mxu1 %v7349_v12 }
 0x2a5   :  { %4771 = vmatpush1.bf16.msra.mxu0 %v7380_v17  ;;  %4796 = vmatpush3.bf16.msra.mxu1 %v7381_v35 }
 0x2a6   :  { %4773 = vmatprep.subr.bf16.mxu0 %v7382_v11  ;;  %4797 = vmatprep.subr.bf16.mxu1 %v7349_v12 }
 0x2a9   :  { %4775 = vmatpush1.bf16.msra.mxu0 %v7383_v6  ;;  %4799 = vmatpush3.bf16.msra.mxu1 %v7384_v16 }
 0x2aa   :  { %4801 = vmatprep.subr.bf16.mxu1 %v7385_v48  ;;  %4832 = vmatprep.subr.bf16.mxu0 %v7349_v12 }
 0x33d   :  { %v1438_v46 = vpop.f32.mrb[4].mxu0  ;;  %v1509_v41 = vpop.f32.mrb[24].mxu1 }
 0x33e   :  { %v5313_v9 = vadd.f32 %v7386_v52, %v1438_v46  ;;  %v1440_v58 = vpop.f32.mrb[5].mxu0  ;;  %v3926_v53 = vpop.f32.mrb[25].mxu1  ;;  %v1510_v48 = vadd.f32 %v1509_v41, %v6578_v30 }
 0x33f   :  { %v5315_v35 = vadd.f32 %v7387_v13, %v1440_v58  ;;  %v7390_v13 = vld [vmem:[#allocation46_spill] sm:$0xff] }
 0x340   :  { %v3449_v37 = vmul.f32 -1.442695, %v5313_v9 }
 0x341   :  { %v3450_v11 = vmul.f32 -1.442695, %v5315_v35 }
 0x342   :  { %5395 = vpow2.f32 %v3449_v37 }
 0x343   :  { %5397 = vpow2.f32 %v3450_v11 }
 0x34c   :  { %v5396_v17 = vpop.eup %5395 }
 0x34d   :  { %v1517_v6 = vadd.f32 1.0, %v5396_v17  ;;  %v5398_v16 = vpop.eup %5397  ;;  %v7389_v17 = vld [vmem:[#allocation32_spill] sm:$0xff] }
 0x34e   :  { %v1524_v4 = vadd.f32 1.0, %v5398_v16 }
 0x34f   :  { %5399 = vrcp.f32 %v1517_v6 }
 0x350   :  { %5401 = vrcp.f32 %v1524_v4 }
 0x359   :  { %v5400_v62 = vpop.eup %5399 }
 0x35a   :  { %v1527_v47 = vmul.f32 %v5400_v62, %v1510_v48  ;;  %v5402_v52 = vpop.eup %5401 }
 0x35b   :  { %v1530_v62 = vsub.f32 1.0, %v5402_v52 }
 0x35c   :  { %v1528_v46 = vadd.f32 %v1527_v47, %v7388_v15  ;;  %v1532_v47 = vmul.f32 %v5402_v52, %v6682_v44 }
 0x35e   :  { %5403 = vtanh.f32 %v1528_v46 }
 0x35f   :  { %v1606_v53 = vpop.f32.mrb[26].mxu1  ;;  %v1677_v9 = vpop.f32.mrb[36].mxu0 }
 0x360   :  { %v1607_v58 = vadd.f32 %v1606_v53, %v6566_v36  ;;  %v1608_v37 = vpop.f32.mrb[27].mxu1  ;;  %v3961_v35 = vpop.f32.mrb[37].mxu0 }
 0x361   :  { %v1609_v11 = vadd.f32 %v1608_v37, %v6568_v31 }
 0x362   :  { %v1681_v6 = vadd.f32 %v1607_v58, %v7389_v17  ;;  %v1678_v58 = vadd.f32 %v1677_v9, %v6585_v23 }
 0x363   :  { %v1688_v16 = vadd.f32 %v1609_v11, %v7390_v13  ;;  %v7392_v11 = vld [vmem:[#allocation47_spill] sm:$0xff] }
 0x364   :  { %v3451_v41 = vmul.f32 -1.442695, %v1681_v6 }
 0x365   :  { %v3452_v48 = vmul.f32 -1.442695, %v1688_v16 }
 0x366   :  { %5405 = vpow2.f32 %v3451_v41 }
 0x367   :  { %5407 = vpow2.f32 %v3452_v48  ;;  %v7394_v48 = vld [vmem:[#allocation16_spill] sm:$0xff] }
 0x368   :  { %v5404_v4 = vpop.eup %5403 }
 0x369   :  { %v1531_v15 = vmul.f32 %v5404_v4, %v1530_v62 }
 0x36b   :  { %v6776_v46 = vadd.f32 %v1532_v47, %v1531_v15  ;;  %v7395_v15 = vld [vmem:[#allocation17_spill] sm:$0xff]  ;;  %v7396_v47 = vld [vmem:[#allocation7_spill] sm:$0xff] }
 0x36d   :  { %7391 = vst [vmem:[#allocation4_spill] sm:$0xff] %v6776_v46  ;;  %1777 = vmatmul.mubr.f32.vlgmr.msra.gmra.mrb[6].mxu0 %v6776_v46  ;;  %3995 = vmatmul.mubr.f32.vlgmr.msra.gmra.mrb[28].mxu1 %v6776_v46 }
 0x36e   :  { %4803 = vmatpush1.bf16.msra.mxu1 %v6056_v14  ;;  %4834 = vmatpush3.bf16.msra.mxu0 %v6327_v25 }
 0x36f   :  { %4805 = vmatprep.subr.bf16.mxu1 %v6072_v19  ;;  %4835 = vmatprep.subr.bf16.mxu0 %v7349_v12 }
 0x370   :  { %v5406_v13 = vpop.eup %5405  ;;  %1944 = vmatprep.mubr.f32.mxu1 %v7350_v3  ;;  %4029 = vmatprep.mubr.msk.f32.mxu0 %vm5517_vm0, %v7350_v3 }
 0x371   :  { %v1685_v44 = vadd.f32 1.0, %v5406_v13  ;;  %v5408_v52 = vpop.eup %5407  ;;  %v7397_v13 = vld [vmem:[#allocation18_spill] sm:$0xff] }
 0x372   :  { %4807 = vmatpush1.bf16.msra.mxu1 %v6097_v43  ;;  %4837 = vmatpush3.bf16.msra.mxu0 %v6346_v32  ;;  %v1692_v53 = vadd.f32 1.0, %v5408_v52  ;;  %v7399_v52 = vld [vmem:[#allocation8_spill] sm:$0xff] }
 0x373   :  { %5409 = vrcp.f32 %v1685_v44  ;;  %4809 = vmatprep.subr.bf16.mxu1 %v6112_v34  ;;  %4838 = vmatprep.subr.bf16.mxu0 %v7349_v12  ;;  %v7398_v44 = vld [vmem:[#allocation19_spill] sm:$0xff] }
 0x374   :  { %5411 = vrcp.f32 %v1692_v53  ;;  %v7400_v53 = vld [vmem:[#allocation20_spill] sm:$0xff] }
 0x376   :  { %4811 = vmatpush1.bf16.msra.mxu1 %v6137_v54  ;;  %4840 = vmatpush3.bf16.msra.mxu0 %v6362_v39 }
 0x377   :  { %4813 = vmatprep.subr.bf16.mxu1 %v6151_v50  ;;  %4841 = vmatprep.subr.bf16.mxu0 %v7349_v12 }
 0x37a   :  { %4815 = vmatpush1.bf16.msra.mxu1 %v6175_v61  ;;  %4843 = vmatpush3.bf16.msra.mxu0 %v6374_v51 }
 0x37b   :  { %4817 = vmatprep.subr.bf16.mxu1 %v6189_v5  ;;  %4844 = vmatprep.subr.bf16.mxu0 %v7349_v12 }
 0x37d   :  { %v5410_v37 = vpop.eup %5409 }
 0x37e   :  { %v1695_v35 = vmul.f32 %v5410_v37, %v1678_v58  ;;  %4819 = vmatpush1.bf16.msra.mxu1 %v6213_v20  ;;  %4846 = vmatpush3.bf16.msra.mxu0 %v6386_v57  ;;  %v5412_v9 = vpop.eup %5411  ;;  %v7401_v58 = vld [vmem:[#allocation21_spill] sm:$0xff] }
 0x37f   :  { %4821 = vmatprep.subr.bf16.mxu1 %v6227_v26  ;;  %4847 = vmatprep.subr.bf16.mxu0 %v7349_v12  ;;  %v1698_v6 = vsub.f32 1.0, %v5412_v9  ;;  %v1700_v62 = vmul.f32 %v5412_v9, %v6728_v33  ;;  %v7402_v37 = vld [vmem:[#allocation9_spill] sm:$0xff]  ;;  %v7404_v9 = vld [vmem:[#allocation50_spill] sm:$0xff]  ;;  %v7405_v33 = vld [vmem:[#allocation51_spill] sm:$0xff] }
 0x380   :  { %v1696_v17 = vadd.f32 %v1695_v35, %v7392_v11  ;;  %v7403_v35 = vld [vmem:[#allocation10_spill] sm:$0xff] }
 0x382   :  { %5413 = vtanh.f32 %v1696_v17  ;;  %4823 = vmatpush1.bf16.msra.mxu1 %v6251_v38  ;;  %4849 = vmatpush3.bf16.msra.mxu0 %v6398_v7 }
 0x383   :  { %4825 = vmatprep.subr.bf16.mxu1 %v6265_v49  ;;  %4850 = vmatprep.subr.bf16.mxu0 %v7349_v12 }
 0x386   :  { %4827 = vmatpush1.bf16.msra.mxu1 %v6289_v1  ;;  %4852 = vmatpush3.bf16.msra.mxu0 %v6410_v24 }
 0x387   :  { %4829 = vmatprep.subr.bf16.mxu1 %v6300_v8  ;;  %4853 = vmatprep.subr.bf16.mxu0 %v7349_v12 }
 0x38a   :  { %4831 = vmatpush1.bf16.msra.mxu1 %v6315_v22  ;;  %4855 = vmatpush3.bf16.msra.mxu0 %v6422_v55 }
 0x38b   :  { %4857 = vmatprep.subr.bf16.mxu0 %v6022_v63  ;;  %4888 = vmatprep.subr.bf16.mxu1 %v7349_v12 }
 0x38c   :  { %v5414_v16 = vpop.eup %5413 }
 0x38d   :  { %v1699_v41 = vmul.f32 %v5414_v16, %v1698_v6 }
 0x38f   :  { %v6818_v4 = vadd.f32 %v1700_v62, %v1699_v41 }
 0x391   :  { %7393 = vst [vmem:[#allocation12_spill] sm:$0xff] %v6818_v4  ;;  %1945 = vmatmul.mubr.f32.vlgmr.msra.gmra.mrb[30].mxu1 %v6818_v4  ;;  %4030 = vmatmul.mubr.f32.vlgmr.msra.gmra.mrb[38].mxu0 %v6818_v4 }
 0x392   :  { %4859 = vmatpush1.bf16.msra.mxu0 %v6047_v10  ;;  %4890 = vmatpush3.bf16.msra.mxu1 %v5791_v45 }
 0x393   :  { %4861 = vmatprep.subr.bf16.mxu0 %v6070_v18  ;;  %4891 = vmatprep.subr.bf16.mxu1 %v7349_v12 }
 0x394   :  { %2113 = vmatprep.mubr.f32.mxu0 %v7350_v3  ;;  %4064 = vmatprep.mubr.msk.f32.mxu1 %vm5517_vm0, %v7350_v3 }
 0x396   :  { %4863 = vmatpush1.bf16.msra.mxu0 %v6093_v27  ;;  %4893 = vmatpush3.bf16.msra.mxu1 %v5821_v56 }
 0x397   :  { %4865 = vmatprep.subr.bf16.mxu0 %v6099_v28  ;;  %4894 = vmatprep.subr.bf16.mxu1 %v7349_v12 }
 0x39a   :  { %4867 = vmatpush1.bf16.msra.mxu0 %v7352_v29  ;;  %4896 = vmatpush3.bf16.msra.mxu1 %v7353_v59 }
 0x39b   :  { %4869 = vmatprep.subr.bf16.mxu0 %v7354_v2  ;;  %4897 = vmatprep.subr.bf16.mxu1 %v7349_v12 }
 0x39e   :  { %4871 = vmatpush1.bf16.msra.mxu0 %v7355_v42  ;;  %4899 = vmatpush3.bf16.msra.mxu1 %v7356_v0 }
 0x39f   :  { %4873 = vmatprep.subr.bf16.mxu0 %v7357_v21  ;;  %4900 = vmatprep.subr.bf16.mxu1 %v7349_v12 }
 0x3a2   :  { %4875 = vmatpush1.bf16.msra.mxu0 %v7358_v40  ;;  %4902 = vmatpush3.bf16.msra.mxu1 %v7359_v60 }
 0x3a3   :  { %4877 = vmatprep.subr.bf16.mxu0 %v7394_v48  ;;  %4903 = vmatprep.subr.bf16.mxu1 %v7349_v12  ;;  %v7406_v48 = vld [vmem:[#allocation27_spill] sm:$0xff] }
 0x3a6   :  { %4879 = vmatpush1.bf16.msra.mxu0 %v7395_v15  ;;  %4905 = vmatpush3.bf16.msra.mxu1 %v7396_v47 }
 0x3a7   :  { %4881 = vmatprep.subr.bf16.mxu0 %v7397_v13  ;;  %4906 = vmatprep.subr.bf16.mxu1 %v7349_v12 }
 0x3aa   :  { %4883 = vmatpush1.bf16.msra.mxu0 %v7398_v44  ;;  %4908 = vmatpush3.bf16.msra.mxu1 %v7399_v52 }
 0x3ab   :  { %4885 = vmatprep.subr.bf16.mxu0 %v7400_v53  ;;  %4909 = vmatprep.subr.bf16.mxu1 %v7349_v12 }
 0x3ae   :  { %4887 = vmatpush1.bf16.msra.mxu0 %v7401_v58  ;;  %4911 = vmatpush3.bf16.msra.mxu1 %v7402_v37 }
 0x3af   :  { %4913 = vmatprep.subr.bf16.mxu1 %v7403_v35  ;;  %4944 = vmatprep.subr.bf16.mxu0 %v7349_v12 }
 0x440   :  { %v1778_v11 = vpop.f32.mrb[6].mxu0  ;;  %v1849_v17 = vpop.f32.mrb[28].mxu1 }
 0x441   :  { %v5317_v6 = vadd.f32 %v7404_v9, %v1778_v11  ;;  %v1780_v16 = vpop.f32.mrb[7].mxu0  ;;  %v3996_v41 = vpop.f32.mrb[29].mxu1  ;;  %v1850_v35 = vadd.f32 %v1849_v17, %v6578_v30 }
 0x442   :  { %v5319_v52 = vadd.f32 %v7405_v33, %v1780_v16 }
 0x443   :  { %v3454_v62 = vmul.f32 -1.442695, %v5317_v6 }
 0x444   :  { %v3455_v53 = vmul.f32 -1.442695, %v5319_v52 }
 0x445   :  { %5415 = vpow2.f32 %v3454_v62 }
 0x446   :  { %5417 = vpow2.f32 %v3455_v53 }
 0x44f   :  { %v5416_v44 = vpop.eup %5415 }
 0x450   :  { %v1857_v58 = vadd.f32 1.0, %v5416_v44  ;;  %v5418_v37 = vpop.eup %5417 }
 0x451   :  { %v1864_v13 = vadd.f32 1.0, %v5418_v37  ;;  %v7408_v37 = vld [vmem:[#allocation44_spill] sm:$0xff] }
 0x452   :  { %5419 = vrcp.f32 %v1857_v58  ;;  %v7407_v58 = vld [vmem:[#allocation30_spill] sm:$0xff] }
 0x453   :  { %5421 = vrcp.f32 %v1864_v13 }
 0x45c   :  { %v5420_v47 = vpop.eup %5419 }
 0x45d   :  { %v1867_v15 = vmul.f32 %v5420_v47, %v1850_v35  ;;  %v5422_v44 = vpop.eup %5421 }
 0x45e   :  { %v1870_v30 = vsub.f32 1.0, %v5422_v44 }
 0x45f   :  { %v1868_v11 = vadd.f32 %v1867_v15, %v7406_v48  ;;  %v1872_v48 = vmul.f32 %v5422_v44, %v6776_v46  ;;  %v7421_v46 = vld [vmem:[#allocation51_spill] sm:$0xff] }
 0x461   :  { %5423 = vtanh.f32 %v1868_v11 }
 0x464   :  { %v1946_v41 = vpop.f32.mrb[30].mxu1  ;;  %v2017_v6 = vpop.f32.mrb[38].mxu0 }
 0x465   :  { %v1947_v16 = vadd.f32 %v1946_v41, %v6566_v36  ;;  %v1948_v62 = vpop.f32.mrb[31].mxu1  ;;  %v4031_v52 = vpop.f32.mrb[39].mxu0  ;;  %v2018_v41 = vadd.f32 %v2017_v6, %v6585_v23 }
 0x466   :  { %v1949_v53 = vadd.f32 %v1948_v62, %v6568_v31  ;;  %v7409_v52 = vld [vmem:[#allocation45_spill] sm:$0xff] }
 0x467   :  { %v2021_v33 = vadd.f32 %v1947_v16, %v7407_v58 }
 0x468   :  { %v2028_v9 = vadd.f32 %v1949_v53, %v7408_v37 }
 0x469   :  { %v3456_v17 = vmul.f32 -1.442695, %v2021_v33 }
 0x46a   :  { %v3457_v15 = vmul.f32 -1.442695, %v2028_v9 }
 0x46b   :  { %v5424_v47 = vpop.eup %5423  ;;  %5425 = vpow2.f32 %v3456_v17 }
 0x46c   :  { %v1871_v13 = vmul.f32 %v5424_v47, %v1870_v30  ;;  %5427 = vpow2.f32 %v3457_v15  ;;  %v7412_v15 = vld [vmem:[#allocation7_spill] sm:$0xff] }
 0x46e   :  { %v6866_v35 = vadd.f32 %v1872_v48, %v1871_v13  ;;  %v7410_v13 = vld [vmem:[#allocation16_spill] sm:$0xff]  ;;  %v7411_v48 = vld [vmem:[#allocation17_spill] sm:$0xff] }
 0x470   :  { %2114 = vmatmul.mubr.f32.vlgmr.msra.gmra.mrb[8].mxu0 %v6866_v35  ;;  %4065 = vmatmul.mubr.f32.vlgmr.msra.gmra.mrb[32].mxu1 %v6866_v35 }
 0x471   :  { %4915 = vmatpush1.bf16.msra.mxu1 %v6056_v14  ;;  %4946 = vmatpush3.bf16.msra.mxu0 %v6327_v25 }
 0x472   :  { %4917 = vmatprep.subr.bf16.mxu1 %v6072_v19  ;;  %4947 = vmatprep.subr.bf16.mxu0 %v7349_v12 }
 0x473   :  { %2278 = vmatprep.mubr.f32.mxu1 %v7350_v3  ;;  %4099 = vmatprep.mubr.msk.f32.mxu0 %vm5517_vm0, %v7350_v3 }
 0x475   :  { %v5426_v30 = vpop.eup %5425  ;;  %4919 = vmatpush1.bf16.msra.mxu1 %v6097_v43  ;;  %4949 = vmatpush3.bf16.msra.mxu0 %v6346_v32 }
 0x476   :  { %v2025_v33 = vadd.f32 1.0, %v5426_v30  ;;  %4921 = vmatprep.subr.bf16.mxu1 %v6112_v34  ;;  %4950 = vmatprep.subr.bf16.mxu0 %v7349_v12  ;;  %v5428_v9 = vpop.eup %5427  ;;  %v7413_v30 = vld [vmem:[#allocation18_spill] sm:$0xff] }
 0x477   :  { %v2032_v11 = vadd.f32 1.0, %v5428_v9  ;;  %v7415_v9 = vld [vmem:[#allocation8_spill] sm:$0xff] }
 0x478   :  { %5429 = vrcp.f32 %v2025_v33  ;;  %v7414_v33 = vld [vmem:[#allocation19_spill] sm:$0xff] }
 0x479   :  { %4923 = vmatpush1.bf16.msra.mxu1 %v6137_v54  ;;  %4952 = vmatpush3.bf16.msra.mxu0 %v6362_v39  ;;  %5431 = vrcp.f32 %v2032_v11  ;;  %v7416_v11 = vld [vmem:[#allocation20_spill] sm:$0xff] }
 0x47a   :  { %4925 = vmatprep.subr.bf16.mxu1 %v6151_v50  ;;  %4953 = vmatprep.subr.bf16.mxu0 %v7349_v12 }
 0x47d   :  { %4927 = vmatpush1.bf16.msra.mxu1 %v6175_v61  ;;  %4955 = vmatpush3.bf16.msra.mxu0 %v6374_v51 }
 0x47e   :  { %4929 = vmatprep.subr.bf16.mxu1 %v6189_v5  ;;  %4956 = vmatprep.subr.bf16.mxu0 %v7349_v12 }
 0x481   :  { %4931 = vmatpush1.bf16.msra.mxu1 %v6213_v20  ;;  %4958 = vmatpush3.bf16.msra.mxu0 %v6386_v57 }
 0x482   :  { %v5430_v16 = vpop.eup %5429  ;;  %4933 = vmatprep.subr.bf16.mxu1 %v6227_v26  ;;  %4959 = vmatprep.subr.bf16.mxu0 %v7349_v12 }
 0x483   :  { %v2035_v62 = vmul.f32 %v5430_v16, %v2018_v41  ;;  %v5432_v6 = vpop.eup %5431  ;;  %v7417_v41 = vld [vmem:[#allocation21_spill] sm:$0xff] }
 0x484   :  { %v2038_v44 = vsub.f32 1.0, %v5432_v6  ;;  %v2040_v17 = vmul.f32 %v5432_v6, %v6818_v4  ;;  %v7418_v16 = vld [vmem:[#allocation9_spill] sm:$0xff]  ;;  %v7420_v6 = vld [vmem:[#allocation50_spill] sm:$0xff] }
 0x485   :  { %v2036_v53 = vadd.f32 %v2035_v62, %v7409_v52  ;;  %4935 = vmatpush1.bf16.msra.mxu1 %v6251_v38  ;;  %4961 = vmatpush3.bf16.msra.mxu0 %v6398_v7  ;;  %v7419_v62 = vld [vmem:[#allocation10_spill] sm:$0xff] }
 0x486   :  { %4937 = vmatprep.subr.bf16.mxu1 %v6265_v49  ;;  %4962 = vmatprep.subr.bf16.mxu0 %v7349_v12 }
 0x487   :  { %5433 = vtanh.f32 %v2036_v53 }
 0x489   :  { %4939 = vmatpush1.bf16.msra.mxu1 %v6289_v1  ;;  %4964 = vmatpush3.bf16.msra.mxu0 %v6410_v24 }
 0x48a   :  { %4941 = vmatprep.subr.bf16.mxu1 %v6300_v8  ;;  %4965 = vmatprep.subr.bf16.mxu0 %v7349_v12 }
 0x48d   :  { %4943 = vmatpush1.bf16.msra.mxu1 %v6315_v22  ;;  %4967 = vmatpush3.bf16.msra.mxu0 %v6422_v55 }
 0x48e   :  { %4969 = vmatprep.subr.bf16.mxu0 %v6022_v63  ;;  %5000 = vmatprep.subr.bf16.mxu1 %v7349_v12 }
 0x491   :  { %v5434_v58 = vpop.eup %5433 }
 0x492   :  { %v2039_v37 = vmul.f32 %v5434_v58, %v2038_v44 }
 0x494   :  { %v6908_v47 = vadd.f32 %v2040_v17, %v2039_v37 }
 0x496   :  { %2279 = vmatmul.mubr.f32.vlgmr.msra.gmra.mrb[34].mxu1 %v6908_v47  ;;  %4100 = vmatmul.mubr.f32.vlgmr.msra.gmra.mrb[40].mxu0 %v6908_v47 }
 0x497   :  { %4971 = vmatpush1.bf16.msra.mxu0 %v6047_v10  ;;  %5002 = vmatpush3.bf16.msra.mxu1 %v5791_v45 }
 0x498   :  { %4973 = vmatprep.subr.bf16.mxu0 %v6070_v18  ;;  %5003 = vmatprep.subr.bf16.mxu1 %v7349_v12 }
 0x499   :  { %2447 = vmatprep.mubr.f32.mxu0 %v7350_v3  ;;  %4134 = vmatprep.mubr.msk.f32.mxu1 %vm5517_vm0, %v7350_v3 }
 0x49b   :  { %4975 = vmatpush1.bf16.msra.mxu0 %v6093_v27  ;;  %5005 = vmatpush3.bf16.msra.mxu1 %v5821_v56 }
 0x49c   :  { %4977 = vmatprep.subr.bf16.mxu0 %v6099_v28  ;;  %5006 = vmatprep.subr.bf16.mxu1 %v7349_v12 }
 0x49f   :  { %4979 = vmatpush1.bf16.msra.mxu0 %v7352_v29  ;;  %5008 = vmatpush3.bf16.msra.mxu1 %v7353_v59 }
 0x4a0   :  { %4981 = vmatprep.subr.bf16.mxu0 %v7354_v2  ;;  %5009 = vmatprep.subr.bf16.mxu1 %v7349_v12 }
 0x4a3   :  { %4983 = vmatpush1.bf16.msra.mxu0 %v7355_v42  ;;  %5011 = vmatpush3.bf16.msra.mxu1 %v7356_v0 }
 0x4a4   :  { %4985 = vmatprep.subr.bf16.mxu0 %v7357_v21  ;;  %5012 = vmatprep.subr.bf16.mxu1 %v7349_v12 }
 0x4a7   :  { %4987 = vmatpush1.bf16.msra.mxu0 %v7358_v40  ;;  %5014 = vmatpush3.bf16.msra.mxu1 %v7359_v60 }
 0x4a8   :  { %4989 = vmatprep.subr.bf16.mxu0 %v7410_v13  ;;  %5015 = vmatprep.subr.bf16.mxu1 %v7349_v12  ;;  %v7423_v13 = vld [vmem:[#allocation29_spill] sm:$0xff] }
 0x4ab   :  { %4991 = vmatpush1.bf16.msra.mxu0 %v7411_v48  ;;  %5017 = vmatpush3.bf16.msra.mxu1 %v7412_v15 }
 0x4ac   :  { %4993 = vmatprep.subr.bf16.mxu0 %v7413_v30  ;;  %5018 = vmatprep.subr.bf16.mxu1 %v7349_v12 }
 0x4af   :  { %4995 = vmatpush1.bf16.msra.mxu0 %v7414_v33  ;;  %5020 = vmatpush3.bf16.msra.mxu1 %v7415_v9 }
 0x4b0   :  { %4997 = vmatprep.subr.bf16.mxu0 %v7416_v11  ;;  %5021 = vmatprep.subr.bf16.mxu1 %v7349_v12 }
 0x4b3   :  { %4999 = vmatpush1.bf16.msra.mxu0 %v7417_v41  ;;  %5023 = vmatpush3.bf16.msra.mxu1 %v7418_v16 }
 0x4b4   :  { %5025 = vmatprep.subr.bf16.mxu1 %v7419_v62  ;;  %5056 = vmatprep.subr.bf16.mxu0 %v7349_v12  ;;  %v7422_v62 = vld [vmem:[#allocation52_spill] sm:$0xff] }
 0x543   :  { %v2115_v52 = vpop.f32.mrb[8].mxu0  ;;  %v2186_v53 = vpop.f32.mrb[32].mxu1 }
 0x544   :  { %v5321_v44 = vadd.f32 %v7420_v6, %v2115_v52  ;;  %v2117_v58 = vpop.f32.mrb[9].mxu0  ;;  %v4066_v37 = vpop.f32.mrb[33].mxu1  ;;  %v2187_v30 = vadd.f32 %v2186_v53, %v7422_v62 }
 0x545   :  { %v5323_v4 = vadd.f32 %v7421_v46, %v2117_v58 }
 0x546   :  { %v3459_v17 = vmul.f32 -1.442695, %v5321_v44 }
 0x547   :  { %v3460_v11 = vmul.f32 -1.442695, %v5323_v4 }
 0x548   :  { %5435 = vpow2.f32 %v3459_v17 }
 0x549   :  { %5437 = vpow2.f32 %v3460_v11 }
 0x552   :  { %v5436_v9 = vpop.eup %5435 }
 0x553   :  { %v2194_v41 = vadd.f32 1.0, %v5436_v9  ;;  %v5438_v16 = vpop.eup %5437 }
 0x554   :  { %v2201_v33 = vadd.f32 1.0, %v5438_v16  ;;  %v7425_v16 = vld [vmem:[#allocation42_spill] sm:$0xff] }
 0x555   :  { %5439 = vrcp.f32 %v2194_v41  ;;  %v7424_v41 = vld [vmem:[#allocation28_spill] sm:$0xff] }
 0x556   :  { %5441 = vrcp.f32 %v2201_v33 }
 0x55f   :  { %v5440_v15 = vpop.eup %5439 }
 0x560   :  { %v2204_v48 = vmul.f32 %v5440_v15, %v2187_v30  ;;  %v5442_v6 = vpop.eup %5441 }
 0x561   :  { %v2207_v53 = vsub.f32 1.0, %v5442_v6 }
 0x562   :  { %v2205_v52 = vadd.f32 %v2204_v48, %v7423_v13  ;;  %v2209_v13 = vmul.f32 %v5442_v6, %v6866_v35 }
 0x564   :  { %5443 = vtanh.f32 %v2205_v52 }
 0x569   :  { %v2280_v37 = vpop.f32.mrb[34].mxu1  ;;  %v2351_v44 = vpop.f32.mrb[40].mxu0 }
 0x56a   :  { %v2281_v58 = vadd.f32 %v2280_v37, %v6566_v36  ;;  %v2282_v4 = vpop.f32.mrb[35].mxu1  ;;  %v4101_v11 = vpop.f32.mrb[41].mxu0 }
 0x56b   :  { %v2283_v9 = vadd.f32 %v2282_v4, %v6568_v31  ;;  %v2352_v4 = vadd.f32 %v2351_v44, %v6585_v23 }
 0x56c   :  { %v2355_v17 = vadd.f32 %v2281_v58, %v7424_v41  ;;  %v7426_v41 = vld [vmem:[#allocation43_spill] sm:$0xff] }
 0x56d   :  { %v2362_v46 = vadd.f32 %v2283_v9, %v7425_v16 }
 0x56e   :  { %v5444_v62 = vpop.eup %5443  ;;  %v3461_v15 = vmul.f32 -1.442695, %v2355_v17 }
 0x56f   :  { %v2208_v30 = vmul.f32 %v5444_v62, %v2207_v53  ;;  %v3462_v33 = vmul.f32 -1.442695, %v2362_v46 }
 0x570   :  { %5445 = vpow2.f32 %v3461_v15 }
 0x571   :  { %v6956_v48 = vadd.f32 %v2209_v13, %v2208_v30  ;;  %5447 = vpow2.f32 %v3462_v33 }
 0x573   :  { %2448 = vmatmul.mubr.f32.vlgmr.msra.gmra.mrb[10].mxu0 %v6956_v48  ;;  %v3404_v52 = vadd.f32 %v6956_v48, %v6908_v47  ;;  %4135 = vmatmul.mubr.f32.vlgmr.msra.gmra.mrb[36].mxu1 %v6956_v48 }
 0x574   :  { %5027 = vmatpush1.bf16.msra.mxu1 %v6056_v14  ;;  %5058 = vmatpush3.bf16.msra.mxu0 %v6327_v25 }
 0x575   :  { %v3412_v37 = vmax.f32 %v3404_v52, 0.0  ;;  %5029 = vmatprep.subr.bf16.mxu1 %v6072_v19  ;;  %5059 = vmatprep.subr.bf16.mxu0 %v7349_v12 }
 0x576   :  { %2612 = vmatprep.mubr.f32.mxu1 %v7350_v3  ;;  %4169 = vmatprep.mubr.msk.f32.mxu0 %vm5517_vm0, %v7350_v3 }
 0x577   :  { %3420 = vst [vmem:[%s7248_s8 + $0x20] sm:$0xff] %v3412_v37  ;;  %v7429_v37 = vld [vmem:[#allocation7_spill] sm:$0xff] }
 0x578   :  { %5031 = vmatpush1.bf16.msra.mxu1 %v6097_v43  ;;  %5061 = vmatpush3.bf16.msra.mxu0 %v6346_v32 }
 0x579   :  { %5033 = vmatprep.subr.bf16.mxu1 %v6112_v34  ;;  %5062 = vmatprep.subr.bf16.mxu0 %v7349_v12 }
 0x57a   :  { %v5446_v46 = vpop.eup %5445 }
 0x57b   :  { %v2359_v62 = vadd.f32 1.0, %v5446_v46  ;;  %v5448_v6 = vpop.eup %5447  ;;  %v7430_v46 = vld [vmem:[#allocation18_spill] sm:$0xff] }
 0x57c   :  { %5035 = vmatpush1.bf16.msra.mxu1 %v6137_v54  ;;  %5064 = vmatpush3.bf16.msra.mxu0 %v6362_v39  ;;  %v2366_v58 = vadd.f32 1.0, %v5448_v6  ;;  %v7432_v6 = vld [vmem:[#allocation8_spill] sm:$0xff] }
 0x57d   :  { %5449 = vrcp.f32 %v2359_v62  ;;  %5037 = vmatprep.subr.bf16.mxu1 %v6151_v50  ;;  %5065 = vmatprep.subr.bf16.mxu0 %v7349_v12  ;;  %v7431_v62 = vld [vmem:[#allocation19_spill] sm:$0xff] }
 0x57e   :  { %5451 = vrcp.f32 %v2366_v58  ;;  %v7433_v58 = vld [vmem:[#allocation20_spill] sm:$0xff] }
 0x580   :  { %5039 = vmatpush1.bf16.msra.mxu1 %v6175_v61  ;;  %5067 = vmatpush3.bf16.msra.mxu0 %v6374_v51 }
 0x581   :  { %5041 = vmatprep.subr.bf16.mxu1 %v6189_v5  ;;  %5068 = vmatprep.subr.bf16.mxu0 %v7349_v12 }
 0x584   :  { %5043 = vmatpush1.bf16.msra.mxu1 %v6213_v20  ;;  %5070 = vmatpush3.bf16.msra.mxu0 %v6386_v57 }
 0x585   :  { %5045 = vmatprep.subr.bf16.mxu1 %v6227_v26  ;;  %5071 = vmatprep.subr.bf16.mxu0 %v7349_v12 }
 0x587   :  { %v5450_v11 = vpop.eup %5449 }
 0x588   :  { %v2369_v9 = vmul.f32 %v5450_v11, %v2352_v4  ;;  %5047 = vmatpush1.bf16.msra.mxu1 %v6251_v38  ;;  %5073 = vmatpush3.bf16.msra.mxu0 %v6398_v7  ;;  %v5452_v44 = vpop.eup %5451  ;;  %v7434_v4 = vld [vmem:[#allocation21_spill] sm:$0xff] }
 0x589   :  { %5049 = vmatprep.subr.bf16.mxu1 %v6265_v49  ;;  %5074 = vmatprep.subr.bf16.mxu0 %v7349_v12  ;;  %v2372_v16 = vsub.f32 1.0, %v5452_v44  ;;  %v2374_v30 = vmul.f32 %v5452_v44, %v6908_v47  ;;  %v7428_v47 = vld [vmem:[#allocation17_spill] sm:$0xff]  ;;  %v7437_v44 = vld [vmem:[#allocation50_spill] sm:$0xff] }
 0x58a   :  { %v2370_v17 = vadd.f32 %v2369_v9, %v7426_v41  ;;  %v7435_v11 = vld [vmem:[#allocation9_spill] sm:$0xff]  ;;  %v7436_v9 = vld [vmem:[#allocation10_spill] sm:$0xff] }
 0x58c   :  { %5453 = vtanh.f32 %v2370_v17  ;;  %5051 = vmatpush1.bf16.msra.mxu1 %v6289_v1  ;;  %5076 = vmatpush3.bf16.msra.mxu0 %v6410_v24 }
 0x58d   :  { %5053 = vmatprep.subr.bf16.mxu1 %v6300_v8  ;;  %5077 = vmatprep.subr.bf16.mxu0 %v7349_v12 }
 0x590   :  { %5055 = vmatpush1.bf16.msra.mxu1 %v6315_v22  ;;  %5079 = vmatpush3.bf16.msra.mxu0 %v6422_v55 }
 0x591   :  { %5081 = vmatprep.subr.bf16.mxu0 %v6022_v63  ;;  %5112 = vmatprep.subr.bf16.mxu1 %v7349_v12 }
 0x596   :  { %v5454_v53 = vpop.eup %5453 }
 0x597   :  { %v2373_v15 = vmul.f32 %v5454_v53, %v2372_v16 }
 0x599   :  { %v7003_v13 = vadd.f32 %v2374_v30, %v2373_v15 }
 0x59b   :  { %2613 = vmatmul.mubr.f32.vlgmr.msra.gmra.mrb[38].mxu1 %v7003_v13  ;;  %v3403_v33 = vadd.f32 %v7003_v13, %v6866_v35  ;;  %4170 = vmatmul.mubr.f32.vlgmr.msra.gmra.mrb[42].mxu0 %v7003_v13  ;;  %v7427_v35 = vld [vmem:[#allocation16_spill] sm:$0xff] }
 0x59c   :  { %5083 = vmatpush1.bf16.msra.mxu0 %v6047_v10  ;;  %5114 = vmatpush3.bf16.msra.mxu1 %v5791_v45 }
 0x59d   :  { %v3411_v52 = vmax.f32 %v3403_v33, 0.0  ;;  %5085 = vmatprep.subr.bf16.mxu0 %v6070_v18  ;;  %5115 = vmatprep.subr.bf16.mxu1 %v7349_v12  ;;  %v7438_v33 = vld [vmem:[#allocation51_spill] sm:$0xff] }
 0x59e   :  { %2781 = vmatprep.mubr.f32.mxu0 %v7350_v3  ;;  %4204 = vmatprep.mubr.msk.f32.mxu1 %vm5517_vm0, %v7350_v3 }
 0x59f   :  { %3419 = vst [vmem:[%s7248_s8 + $0x18] sm:$0xff] %v3411_v52 }
 0x5a0   :  { %5087 = vmatpush1.bf16.msra.mxu0 %v6093_v27  ;;  %5117 = vmatpush3.bf16.msra.mxu1 %v5821_v56 }
 0x5a1   :  { %5089 = vmatprep.subr.bf16.mxu0 %v6099_v28  ;;  %5118 = vmatprep.subr.bf16.mxu1 %v7349_v12 }
 0x5a4   :  { %5091 = vmatpush1.bf16.msra.mxu0 %v7352_v29  ;;  %5120 = vmatpush3.bf16.msra.mxu1 %v7353_v59 }
 0x5a5   :  { %5093 = vmatprep.subr.bf16.mxu0 %v7354_v2  ;;  %5121 = vmatprep.subr.bf16.mxu1 %v7349_v12 }
 0x5a8   :  { %5095 = vmatpush1.bf16.msra.mxu0 %v7355_v42  ;;  %5123 = vmatpush3.bf16.msra.mxu1 %v7356_v0 }
 0x5a9   :  { %5097 = vmatprep.subr.bf16.mxu0 %v7357_v21  ;;  %5124 = vmatprep.subr.bf16.mxu1 %v7349_v12 }
 0x5ac   :  { %5099 = vmatpush1.bf16.msra.mxu0 %v7358_v40  ;;  %5126 = vmatpush3.bf16.msra.mxu1 %v7359_v60 }
 0x5ad   :  { %5101 = vmatprep.subr.bf16.mxu0 %v7427_v35  ;;  %5127 = vmatprep.subr.bf16.mxu1 %v7349_v12  ;;  %v7440_v35 = vld [vmem:[#allocation31_spill] sm:$0xff] }
 0x5b0   :  { %5103 = vmatpush1.bf16.msra.mxu0 %v7428_v47  ;;  %5129 = vmatpush3.bf16.msra.mxu1 %v7429_v37 }
 0x5b1   :  { %5105 = vmatprep.subr.bf16.mxu0 %v7430_v46  ;;  %5130 = vmatprep.subr.bf16.mxu1 %v7349_v12 }
 0x5b4   :  { %5107 = vmatpush1.bf16.msra.mxu0 %v7431_v62  ;;  %5132 = vmatpush3.bf16.msra.mxu1 %v7432_v6 }
 0x5b5   :  { %5109 = vmatprep.subr.bf16.mxu0 %v7433_v58  ;;  %5133 = vmatprep.subr.bf16.mxu1 %v7349_v12 }
 0x5b8   :  { %5111 = vmatpush1.bf16.msra.mxu0 %v7434_v4  ;;  %5135 = vmatpush3.bf16.msra.mxu1 %v7435_v11 }
 0x5b9   :  { %5137 = vmatprep.subr.bf16.mxu1 %v7436_v9  ;;  %5168 = vmatprep.subr.bf16.mxu0 %v7349_v12  ;;  %v7439_v9 = vld [vmem:[#allocation52_spill] sm:$0xff] }
 0x646   :  { %v2449_v41 = vpop.f32.mrb[10].mxu0  ;;  %v2520_v17 = vpop.f32.mrb[36].mxu1 }
 0x647   :  { %v5325_v16 = vadd.f32 %v7437_v44, %v2449_v41  ;;  %v2451_v53 = vpop.f32.mrb[11].mxu0  ;;  %v4136_v15 = vpop.f32.mrb[37].mxu1  ;;  %v2521_v46 = vadd.f32 %v2520_v17, %v7439_v9  ;;  %v7442_v17 = vld [vmem:[#allocation40_spill] sm:$0xff] }
 0x648   :  { %v5327_v52 = vadd.f32 %v7438_v33, %v2451_v53 }
 0x649   :  { %v3464_v30 = vmul.f32 -1.442695, %v5325_v16 }
 0x64a   :  { %v3465_v58 = vmul.f32 -1.442695, %v5327_v52 }
 0x64b   :  { %5455 = vpow2.f32 %v3464_v30 }
 0x64c   :  { %5457 = vpow2.f32 %v3465_v58 }
 0x655   :  { %v5456_v6 = vpop.eup %5455 }
 0x656   :  { %v2528_v4 = vadd.f32 1.0, %v5456_v6  ;;  %v5458_v11 = vpop.eup %5457 }
 0x657   :  { %v2535_v62 = vadd.f32 1.0, %v5458_v11  ;;  %v7441_v11 = vld [vmem:[#allocation26_spill] sm:$0xff] }
 0x658   :  { %5459 = vrcp.f32 %v2528_v4 }
 0x659   :  { %5461 = vrcp.f32 %v2535_v62  ;;  %v7443_v62 = vld [vmem:[#allocation12_spill] sm:$0xff] }
 0x662   :  { %v5460_v37 = vpop.eup %5459 }
 0x663   :  { %v2538_v47 = vmul.f32 %v5460_v37, %v2521_v46  ;;  %v5462_v15 = vpop.eup %5461 }
 0x664   :  { %v2541_v4 = vsub.f32 1.0, %v5462_v15  ;;  %v2543_v46 = vmul.f32 %v5462_v15, %v6956_v48 }
 0x665   :  { %v2539_v41 = vadd.f32 %v2538_v47, %v7440_v35 }
 0x667   :  { %5463 = vtanh.f32 %v2539_v41 }
 0x66e   :  { %v2614_v16 = vpop.f32.mrb[38].mxu1  ;;  %v2685_v44 = vpop.f32.mrb[42].mxu0 }
 0x66f   :  { %v2615_v53 = vadd.f32 %v2614_v16, %v6566_v36  ;;  %v2616_v30 = vpop.f32.mrb[39].mxu1  ;;  %v4171_v58 = vpop.f32.mrb[43].mxu0 }
 0x670   :  { %v2617_v6 = vadd.f32 %v2616_v30, %v6568_v31  ;;  %v2686_v30 = vadd.f32 %v2685_v44, %v6585_v23 }
 0x671   :  { %v5464_v52 = vpop.eup %5463  ;;  %v2689_v33 = vadd.f32 %v2615_v53, %v7441_v11 }
 0x672   :  { %v2696_v9 = vadd.f32 %v2617_v6, %v7442_v17  ;;  %v2542_v37 = vmul.f32 %v5464_v52, %v2541_v4  ;;  %v7444_v4 = vld [vmem:[#allocation41_spill] sm:$0xff] }
 0x673   :  { %v3466_v35 = vmul.f32 -1.442695, %v2689_v33 }
 0x674   :  { %v7056_v47 = vadd.f32 %v2543_v46, %v2542_v37  ;;  %v3467_v16 = vmul.f32 -1.442695, %v2696_v9 }
 0x675   :  { %5465 = vpow2.f32 %v3466_v35 }
 0x676   :  { %2782 = vmatmul.mubr.f32.vlgmr.msra.gmra.mrb[12].mxu0 %v7056_v47  ;;  %v3405_v41 = vadd.f32 %v7056_v47, %v7443_v62  ;;  %4205 = vmatmul.mubr.f32.vlgmr.msra.gmra.mrb[40].mxu1 %v7056_v47  ;;  %5467 = vpow2.f32 %v3467_v16  ;;  %v7445_v62 = vld [vmem:[#allocation4_spill] sm:$0xff] }
 0x677   :  { %5139 = vmatpush1.bf16.msra.mxu1 %v6056_v14  ;;  %5170 = vmatpush3.bf16.msra.mxu0 %v6327_v25 }
 0x678   :  { %v3413_v53 = vmax.f32 %v3405_v41, 0.0  ;;  %5141 = vmatprep.subr.bf16.mxu1 %v6072_v19  ;;  %5171 = vmatprep.subr.bf16.mxu0 %v7349_v12 }
 0x679   :  { %2946 = vmatprep.mubr.f32.mxu1 %v7350_v3  ;;  %4239 = vmatprep.mubr.msk.f32.mxu0 %vm5517_vm0, %v7350_v3 }
 0x67a   :  { %3421 = vst [vmem:[%s7248_s8 + $0x28] sm:$0xff] %v3413_v53 }
 0x67b   :  { %5143 = vmatpush1.bf16.msra.mxu1 %v6097_v43  ;;  %5173 = vmatpush3.bf16.msra.mxu0 %v6346_v32 }
 0x67c   :  { %5145 = vmatprep.subr.bf16.mxu1 %v6112_v34  ;;  %5174 = vmatprep.subr.bf16.mxu0 %v7349_v12 }
 0x67f   :  { %v5466_v48 = vpop.eup %5465  ;;  %5147 = vmatpush1.bf16.msra.mxu1 %v6137_v54  ;;  %5176 = vmatpush3.bf16.msra.mxu0 %v6362_v39 }
 0x680   :  { %v2693_v9 = vadd.f32 1.0, %v5466_v48  ;;  %5149 = vmatprep.subr.bf16.mxu1 %v6151_v50  ;;  %5177 = vmatprep.subr.bf16.mxu0 %v7349_v12  ;;  %v5468_v33 = vpop.eup %5467  ;;  %v7457_v48 = vld [vmem:[#allocation51_spill] sm:$0xff] }
 0x681   :  { %v2700_v15 = vadd.f32 1.0, %v5468_v33 }
 0x682   :  { %5469 = vrcp.f32 %v2693_v9 }
 0x683   :  { %5151 = vmatpush1.bf16.msra.mxu1 %v6175_v61  ;;  %5179 = vmatpush3.bf16.msra.mxu0 %v6374_v51  ;;  %5471 = vrcp.f32 %v2700_v15 }
 0x684   :  { %5153 = vmatprep.subr.bf16.mxu1 %v6189_v5  ;;  %5180 = vmatprep.subr.bf16.mxu0 %v7349_v12 }
 0x687   :  { %5155 = vmatpush1.bf16.msra.mxu1 %v6213_v20  ;;  %5182 = vmatpush3.bf16.msra.mxu0 %v6386_v57 }
 0x688   :  { %5157 = vmatprep.subr.bf16.mxu1 %v6227_v26  ;;  %5183 = vmatprep.subr.bf16.mxu0 %v7349_v12 }
 0x68b   :  { %5159 = vmatpush1.bf16.msra.mxu1 %v6251_v38  ;;  %5185 = vmatpush3.bf16.msra.mxu0 %v6398_v7 }
 0x68c   :  { %v5470_v58 = vpop.eup %5469  ;;  %5161 = vmatprep.subr.bf16.mxu1 %v6265_v49  ;;  %5186 = vmatprep.subr.bf16.mxu0 %v7349_v12 }
 0x68d   :  { %v2703_v6 = vmul.f32 %v5470_v58, %v2686_v30  ;;  %v5472_v44 = vpop.eup %5471 }
 0x68e   :  { %v2706_v11 = vsub.f32 1.0, %v5472_v44  ;;  %v2708_v46 = vmul.f32 %v5472_v44, %v7003_v13 }
 0x68f   :  { %v2704_v52 = vadd.f32 %v2703_v6, %v7444_v4  ;;  %5163 = vmatpush1.bf16.msra.mxu1 %v6289_v1  ;;  %5188 = vmatpush3.bf16.msra.mxu0 %v6410_v24  ;;  %v7458_v4 = vld [vmem:[#allocation52_spill] sm:$0xff] }
 0x690   :  { %5165 = vmatprep.subr.bf16.mxu1 %v6300_v8  ;;  %5189 = vmatprep.subr.bf16.mxu0 %v7349_v12 }
 0x691   :  { %5473 = vtanh.f32 %v2704_v52 }
 0x693   :  { %5167 = vmatpush1.bf16.msra.mxu1 %v6315_v22  ;;  %5191 = vmatpush3.bf16.msra.mxu0 %v6422_v55 }
 0x694   :  { %5193 = vmatprep.subr.bf16.mxu0 %v6022_v63  ;;  %5224 = vmatprep.subr.bf16.mxu1 %v7349_v12 }
 0x69b   :  { %v5474_v17 = vpop.eup %5473 }
 0x69c   :  { %v2707_v37 = vmul.f32 %v5474_v17, %v2706_v11  ;;  %v7459_v17 = vld [vmem:[#allocation33_spill] sm:$0xff] }
 0x69e   :  { %v7103_v35 = vadd.f32 %v2708_v46, %v2707_v37 }
 0x6a0   :  { %2947 = vmatmul.mubr.f32.vlgmr.msra.gmra.mrb[42].mxu1 %v7103_v35  ;;  %v3402_v41 = vadd.f32 %v7103_v35, %v7445_v62  ;;  %4240 = vmatmul.mubr.f32.vlgmr.msra.gmra.mrb[44].mxu0 %v7103_v35 }
 0x6a1   :  { %5195 = vmatpush1.bf16.msra.mxu0 %v6047_v10  ;;  %5226 = vmatpush3.bf16.msra.mxu1 %v5791_v45  ;;  %v7446_v45 = vld [vmem:[#allocation16_spill] sm:$0xff]  ;;  %v7448_v10 = vld [vmem:[#allocation7_spill] sm:$0xff] }
 0x6a2   :  { %v3410_v63 = vmax.f32 %v3402_v41, 0.0  ;;  %5197 = vmatprep.subr.bf16.mxu0 %v6070_v18  ;;  %5227 = vmatprep.subr.bf16.mxu1 %v7349_v12  ;;  %v7449_v18 = vld [vmem:[#allocation18_spill] sm:$0xff] }
 0x6a3   :  { %3115 = vmatprep.mubr.f32.mxu0 %v7350_v3  ;;  %4274 = vmatprep.mubr.msk.f32.mxu1 %vm5517_vm0, %v7350_v3 }
 0x6a4   :  { %3418 = vst [vmem:[%s7248_s8 + $0x10] sm:$0xff] %v3410_v63 }
 0x6a5   :  { %5199 = vmatpush1.bf16.msra.mxu0 %v6093_v27  ;;  %5229 = vmatpush3.bf16.msra.mxu1 %v5821_v56  ;;  %v7447_v56 = vld [vmem:[#allocation17_spill] sm:$0xff]  ;;  %v7450_v27 = vld [vmem:[#allocation19_spill] sm:$0xff] }
 0x6a6   :  { %5201 = vmatprep.subr.bf16.mxu0 %v6099_v28  ;;  %5230 = vmatprep.subr.bf16.mxu1 %v7349_v12  ;;  %v7451_v28 = vld [vmem:[#allocation8_spill] sm:$0xff] }
 0x6a9   :  { %5203 = vmatpush1.bf16.msra.mxu0 %v7352_v29  ;;  %5232 = vmatpush3.bf16.msra.mxu1 %v7353_v59  ;;  %v7452_v29 = vld [vmem:[#allocation20_spill] sm:$0xff]  ;;  %v7453_v59 = vld [vmem:[#allocation21_spill] sm:$0xff] }
 0x6aa   :  { %5205 = vmatprep.subr.bf16.mxu0 %v7354_v2  ;;  %5233 = vmatprep.subr.bf16.mxu1 %v7349_v12  ;;  %v7454_v2 = vld [vmem:[#allocation9_spill] sm:$0xff] }
 0x6ad   :  { %5207 = vmatpush1.bf16.msra.mxu0 %v7355_v42  ;;  %5235 = vmatpush3.bf16.msra.mxu1 %v7356_v0  ;;  %v7455_v42 = vld [vmem:[#allocation10_spill] sm:$0xff] }
 0x6ae   :  { %5209 = vmatprep.subr.bf16.mxu0 %v7357_v21  ;;  %5236 = vmatprep.subr.bf16.mxu1 %v7349_v12 }
 0x6b1   :  { %5211 = vmatpush1.bf16.msra.mxu0 %v7358_v40  ;;  %5238 = vmatpush3.bf16.msra.mxu1 %v7359_v60  ;;  %v7456_v40 = vld [vmem:[#allocation50_spill] sm:$0xff] }
 0x6b2   :  { %5213 = vmatprep.subr.bf16.mxu0 %v7446_v45  ;;  %5239 = vmatprep.subr.bf16.mxu1 %v7349_v12 }
 0x6b5   :  { %5215 = vmatpush1.bf16.msra.mxu0 %v7447_v56  ;;  %5241 = vmatpush3.bf16.msra.mxu1 %v7448_v10 }
 0x6b6   :  { %5217 = vmatprep.subr.bf16.mxu0 %v7449_v18  ;;  %5242 = vmatprep.subr.bf16.mxu1 %v7349_v12 }
 0x6b9   :  { %5219 = vmatpush1.bf16.msra.mxu0 %v7450_v27  ;;  %5244 = vmatpush3.bf16.msra.mxu1 %v7451_v28 }
 0x6ba   :  { %5221 = vmatprep.subr.bf16.mxu0 %v7452_v29  ;;  %5245 = vmatprep.subr.bf16.mxu1 %v7349_v12 }
 0x6bd   :  { %5223 = vmatpush1.bf16.msra.mxu0 %v7453_v59  ;;  %5247 = vmatpush3.bf16.msra.mxu1 %v7454_v2  ;;  %v7460_v59 = vld [vmem:[#allocation24_spill] sm:$0xff] }
 0x6be   :  { %5249 = vmatprep.subr.bf16.mxu1 %v7455_v42  ;;  %5280 = vmatprep.subr.bf16.mxu0 %v7349_v12  ;;  %v7461_v42 = vld [vmem:[#allocation38_spill] sm:$0xff] }
 0x749   :  { %v2783_v0 = vpop.f32.mrb[12].mxu0  ;;  %v2854_v21 = vpop.f32.mrb[40].mxu1 }
 0x74a   :  { %v5329_v60 = vadd.f32 %v7456_v40, %v2783_v0  ;;  %v2785_v13 = vpop.f32.mrb[13].mxu0  ;;  %v4206_v16 = vpop.f32.mrb[41].mxu1  ;;  %v2855_v52 = vadd.f32 %v2854_v21, %v7458_v4 }
 0x74b   :  { %v5331_v9 = vadd.f32 %v7457_v48, %v2785_v13  ;;  %v7462_v13 = vld [vmem:[#allocation11_spill] sm:$0xff] }
 0x74c   :  { %v3469_v53 = vmul.f32 -1.442695, %v5329_v60 }
 0x74d   :  { %v3470_v33 = vmul.f32 -1.442695, %v5331_v9 }
 0x74e   :  { %5475 = vpow2.f32 %v3469_v53 }
 0x74f   :  { %5477 = vpow2.f32 %v3470_v33 }
 0x758   :  { %v5476_v15 = vpop.eup %5475 }
 0x759   :  { %v2862_v30 = vadd.f32 1.0, %v5476_v15  ;;  %v5478_v58 = vpop.eup %5477 }
 0x75a   :  { %v2869_v6 = vadd.f32 1.0, %v5478_v58 }
 0x75b   :  { %5479 = vrcp.f32 %v2862_v30 }
 0x75c   :  { %5481 = vrcp.f32 %v2869_v6 }
 0x765   :  { %v5480_v44 = vpop.eup %5479 }
 0x766   :  { %v2872_v11 = vmul.f32 %v5480_v44, %v2855_v52  ;;  %v5482_v46 = vpop.eup %5481  ;;  %v7464_v44 = vld [vmem:[#allocation35_spill] sm:$0xff] }
 0x767   :  { %v2875_v63 = vsub.f32 1.0, %v5482_v46  ;;  %v2877_v29 = vmul.f32 %v5482_v46, %v7056_v47 }
 0x768   :  { %v2873_v37 = vadd.f32 %v2872_v11, %v7459_v17 }
 0x76a   :  { %5483 = vtanh.f32 %v2873_v37 }
 0x773   :  { %v2948_v62 = vpop.f32.mrb[42].mxu1  ;;  %v3019_v41 = vpop.f32.mrb[44].mxu0 }
 0x774   :  { %v5484_v45 = vpop.eup %5483  ;;  %v2949_v56 = vadd.f32 %v2948_v62, %v6566_v36  ;;  %v2950_v10 = vpop.f32.mrb[43].mxu1 }
 0x775   :  { %v4241_v18 = vpop.f32.mrb[45].mxu0  ;;  %v2951_v27 = vadd.f32 %v2950_v10, %v6568_v31  ;;  %v2876_v28 = vmul.f32 %v5484_v45, %v2875_v63 }
 0x776   :  { %v3023_v2 = vadd.f32 %v2949_v56, %v7460_v59  ;;  %v7465_v18 = vld [vmem:[#allocation22_spill] sm:$0xff]  ;;  %v7467_v59 = vld [vmem:[#allocation36_spill] sm:$0xff] }
 0x777   :  { %v3030_v0 = vadd.f32 %v2951_v27, %v7461_v42  ;;  %v7156_v21 = vadd.f32 %v2877_v29, %v2876_v28  ;;  %v7466_v28 = vld [vmem:[#allocation53_spill] sm:$0xff] }
 0x778   :  { %v3471_v60 = vmul.f32 -1.442695, %v3023_v2 }
 0x779   :  { %3116 = vmatmul.mubr.f32.vlgmr.msra.gmra.mrb[14].mxu0 %v7156_v21  ;;  %v3406_v16 = vadd.f32 %v7156_v21, %v7462_v13  ;;  %4275 = vmatmul.mubr.f32.vlgmr.msra.gmra.mrb[44].mxu1 %v7156_v21  ;;  %v3472_v53 = vmul.f32 -1.442695, %v3030_v0 }
 0x77a   :  { %5485 = vpow2.f32 %v3471_v60  ;;  %5251 = vmatpush1.bf16.msra.mxu1 %v6056_v14  ;;  %5282 = vmatpush3.bf16.msra.mxu0 %v6327_v25 }
 0x77b   :  { %v3414_v47 = vmax.f32 %v3406_v16, 0.0  ;;  %5253 = vmatprep.subr.bf16.mxu1 %v6072_v19  ;;  %5283 = vmatprep.subr.bf16.mxu0 %v7349_v12  ;;  %5487 = vpow2.f32 %v3472_v53 }
 0x77c   :  { %3280 = vmatprep.mubr.f32.mxu1 %v7350_v3  ;;  %4309 = vmatprep.mubr.msk.f32.mxu0 %vm5517_vm0, %v7350_v3 }
 0x77d   :  { %3422 = vst [vmem:[%s7248_s8 + $0x30] sm:$0xff] %v3414_v47 }
 0x77e   :  { %5255 = vmatpush1.bf16.msra.mxu1 %v6097_v43  ;;  %5285 = vmatpush3.bf16.msra.mxu0 %v6346_v32 }
 0x77f   :  { %5257 = vmatprep.subr.bf16.mxu1 %v6112_v34  ;;  %5286 = vmatprep.subr.bf16.mxu0 %v7349_v12 }
 0x782   :  { %5259 = vmatpush1.bf16.msra.mxu1 %v6137_v54  ;;  %5288 = vmatpush3.bf16.msra.mxu0 %v6362_v39  ;;  %v3020_v54 = vadd.f32 %v3019_v41, %v6585_v23 }
 0x783   :  { %5261 = vmatprep.subr.bf16.mxu1 %v6151_v50  ;;  %5289 = vmatprep.subr.bf16.mxu0 %v7349_v12 }
 0x784   :  { %v5486_v14 = vpop.eup %5485 }
 0x785   :  { %v3027_v19 = vadd.f32 1.0, %v5486_v14  ;;  %v5488_v43 = vpop.eup %5487  ;;  %v7468_v14 = vld [vmem:[#allocation37_spill] sm:$0xff] }
 0x786   :  { %5263 = vmatpush1.bf16.msra.mxu1 %v6175_v61  ;;  %5291 = vmatpush3.bf16.msra.mxu0 %v6374_v51  ;;  %v3034_v34 = vadd.f32 1.0, %v5488_v43 }
 0x787   :  { %5489 = vrcp.f32 %v3027_v19  ;;  %5265 = vmatprep.subr.bf16.mxu1 %v6189_v5  ;;  %5292 = vmatprep.subr.bf16.mxu0 %v7349_v12  ;;  %v7463_v5 = vld [vmem:[#allocation39_spill] sm:$0xff] }
 0x788   :  { %5491 = vrcp.f32 %v3034_v34 }
 0x78a   :  { %5267 = vmatpush1.bf16.msra.mxu1 %v6213_v20  ;;  %5294 = vmatpush3.bf16.msra.mxu0 %v6386_v57 }
 0x78b   :  { %5269 = vmatprep.subr.bf16.mxu1 %v6227_v26  ;;  %5295 = vmatprep.subr.bf16.mxu0 %v7349_v12 }
 0x78e   :  { %5271 = vmatpush1.bf16.msra.mxu1 %v6251_v38  ;;  %5297 = vmatpush3.bf16.msra.mxu0 %v6398_v7 }
 0x78f   :  { %5273 = vmatprep.subr.bf16.mxu1 %v6265_v49  ;;  %5298 = vmatprep.subr.bf16.mxu0 %v7349_v12 }
 0x791   :  { %v5490_v50 = vpop.eup %5489 }
 0x792   :  { %v3037_v61 = vmul.f32 %v5490_v50, %v3020_v54  ;;  %5275 = vmatpush1.bf16.msra.mxu1 %v6289_v1  ;;  %5300 = vmatpush3.bf16.msra.mxu0 %v6410_v24  ;;  %v5492_v26 = vpop.eup %5491 }
 0x793   :  { %5277 = vmatprep.subr.bf16.mxu1 %v6300_v8  ;;  %5301 = vmatprep.subr.bf16.mxu0 %v7349_v12  ;;  %v3040_v38 = vsub.f32 1.0, %v5492_v26  ;;  %v3042_v32 = vmul.f32 %v5492_v26, %v7103_v35  ;;  %v3385_v8 = vld [vmem:[%s7248_s8 + $0x8] sm:$0xff] }
 0x794   :  { %v3038_v20 = vadd.f32 %v3037_v61, %v7463_v5 }
 0x796   :  { %5493 = vtanh.f32 %v3038_v20  ;;  %5279 = vmatpush1.bf16.msra.mxu1 %v6315_v22  ;;  %5303 = vmatpush3.bf16.msra.mxu0 %v6422_v55  ;;  %v3384_v20 = vld [vmem:[%s7248_s8] sm:$0xff] }
 0x7a0   :  { %v5494_v49 = vpop.eup %5493 }
 0x7a1   :  { %v3041_v25 = vmul.f32 %v5494_v49, %v3040_v38 }
 0x7a3   :  { %v7201_v1 = vadd.f32 %v3042_v32, %v3041_v25 }
 0x7a5   :  { %3281 = vmatmul.mubr.f32.vlgmr.msra.gmra.mrb[46].mxu1 %v7201_v1  ;;  %v3401_v39 = vadd.f32 %v3385_v8, %v7201_v1  ;;  %4310 = vmatmul.mubr.f32.vlgmr.msra.gmra.mrb[46].mxu0 %v7201_v1 }
 0x7a7   :  { %v3409_v22 = vmax.f32 %v3401_v39, 0.0 }
 0x7a9   :  { %3417 = vst [vmem:[%s7248_s8 + $0x8] sm:$0xff] %v3409_v22 }
 0x84c   :  { %v3117_v51 = vpop.f32.mrb[14].mxu0  ;;  %v3188_v57 = vpop.f32.mrb[44].mxu1 }
 0x84d   :  { %v5333_v7 = vadd.f32 %v7456_v40, %v3117_v51  ;;  %v3119_v24 = vpop.f32.mrb[15].mxu0  ;;  %v4276_v55 = vpop.f32.mrb[45].mxu1  ;;  %v3189_v58 = vadd.f32 %v3188_v57, %v7458_v4 }
 0x84e   :  { %v5335_v3 = vadd.f32 %v7457_v48, %v3119_v24 }
 0x84f   :  { %v3474_v12 = vmul.f32 -1.442695, %v5333_v7 }
 0x850   :  { %v3475_v35 = vmul.f32 -1.442695, %v5335_v3 }
 0x851   :  { %5495 = vpow2.f32 %v3474_v12 }
 0x852   :  { %5497 = vpow2.f32 %v3475_v35 }
 0x85b   :  { %v5496_v9 = vpop.eup %5495 }
 0x85c   :  { %v3196_v33 = vadd.f32 1.0, %v5496_v9  ;;  %v5498_v15 = vpop.eup %5497 }
 0x85d   :  { %v3203_v30 = vadd.f32 1.0, %v5498_v15 }
 0x85e   :  { %5499 = vrcp.f32 %v3196_v33 }
 0x85f   :  { %5501 = vrcp.f32 %v3203_v30 }
 0x868   :  { %v5500_v6 = vpop.eup %5499 }
 0x869   :  { %v3206_v52 = vmul.f32 %v5500_v6, %v3189_v58  ;;  %v5502_v11 = vpop.eup %5501 }
 0x86a   :  { %v3209_v17 = vsub.f32 1.0, %v5502_v11  ;;  %v3211_v46 = vmul.f32 %v5502_v11, %v7156_v21 }
 0x86b   :  { %v3207_v40 = vadd.f32 %v3206_v52, %v7464_v44 }
 0x86d   :  { %5503 = vtanh.f32 %v3207_v40 }
 0x877   :  { %v5504_v37 = vpop.eup %5503 }
 0x878   :  { %v3210_v48 = vmul.f32 %v5504_v37, %v3209_v17  ;;  %v3282_v62 = vpop.f32.mrb[46].mxu1  ;;  %v3353_v41 = vpop.f32.mrb[46].mxu0 }
 0x879   :  { %v3283_v63 = vadd.f32 %v3282_v62, %v6566_v36  ;;  %v3284_v45 = vpop.f32.mrb[47].mxu1  ;;  %v4311_v56 = vpop.f32.mrb[47].mxu0  ;;  %v3354_v16 = vadd.f32 %v3353_v41, %v6585_v23 }
 0x87a   :  { %v3212_v10 = vadd.f32 %v3211_v46, %v3210_v48  ;;  %v3285_v4 = vadd.f32 %v3284_v45, %v6568_v31 }
 0x87b   :  { %v3357_v27 = vadd.f32 %v3283_v63, %v7465_v18 }
 0x87c   :  { %3381 = vst [vmem:[%s7249_s9] sm:$0xff] %v3212_v10  ;;  %v3407_v29 = vadd.f32 %v3212_v10, %v7466_v28  ;;  %v3364_v2 = vadd.f32 %v3285_v4, %v7467_v59 }
 0x87d   :  { %v3476_v42 = vmul.f32 -1.442695, %v3357_v27 }
 0x87e   :  { %v3415_v0 = vmax.f32 %v3407_v29, 0.0  ;;  %v3477_v36 = vmul.f32 -1.442695, %v3364_v2 }
 0x87f   :  { %5505 = vpow2.f32 %v3476_v42 }
 0x880   :  { %3423 = vst [vmem:[%s7248_s8 + $0x38] sm:$0xff] %v3415_v0  ;;  %5507 = vpow2.f32 %v3477_v36 }
 0x889   :  { %v5506_v31 = vpop.eup %5505 }
 0x88a   :  { %v3361_v21 = vadd.f32 1.0, %v5506_v31  ;;  %v5508_v60 = vpop.eup %5507 }
 0x88b   :  { %v3368_v13 = vadd.f32 1.0, %v5508_v60 }
 0x88c   :  { %5509 = vrcp.f32 %v3361_v21 }
 0x88d   :  { %5511 = vrcp.f32 %v3368_v13 }
 0x896   :  { %v5510_v47 = vpop.eup %5509 }
 0x897   :  { %v3371_v53 = vmul.f32 %v5510_v47, %v3354_v16  ;;  %v5512_v43 = vpop.eup %5511 }
 0x898   :  { %v3374_v34 = vsub.f32 1.0, %v5512_v43  ;;  %v3376_v61 = vmul.f32 %v5512_v43, %v7201_v1 }
 0x899   :  { %v3372_v19 = vadd.f32 %v3371_v53, %v7468_v14 }
 0x89b   :  { %5513 = vtanh.f32 %v3372_v19 }
 0x8a5   :  { %v5514_v54 = vpop.eup %5513 }
 0x8a6   :  { %v3375_v50 = vmul.f32 %v5514_v54, %v3374_v34 }
 0x8a8   :  { %v3377_v5 = vadd.f32 %v3376_v61, %v3375_v50 }
 0x8aa   :  { %3479 = vst [vmem:[%s7249_s9 + $0x8] sm:$0xff] %v3377_v5  ;;  %v3400_v23 = vadd.f32 %v3384_v20, %v3377_v5 }
 0x8ac   :  { %v3408_v26 = vmax.f32 %v3400_v23, 0.0 }
 0x8ae   :  { %3416 = vst [vmem:[%s7248_s8] sm:$0xff] %v3408_v26 }

</bundles_post_ra>
